<compile_context>
chip_gen: v5e
topology: v5e:2x2
jax: 0.10.0
libtpu: 0.0.40
codegen_flags: <defaults>
</compile_context>

<pallas_src>
import jax
import jax.numpy as jnp
from jax import lax
from jax.experimental import pallas as pl
from jax.experimental.pallas import tpu as pltpu  # noqa: F401 (TPU backend)


# -----------------------------------------------------------------------------
# Kernel 1: fused extract_local_img_feat for all 4 point sets and all batches.
#   pts_ref : (BR, 3)   all point sets / batches concatenated along rows
#   tr_ref  : (BR, 25)  per-row composed transform:
#             [0:9]   M^T flat  (cam  = p @ M + c)
#             [9:12]  c
#             [12:21] P^T flat  (proj = p @ P + q, intrinsics folded, the
#                                redundant 1000x scale cancels in px/pz)
#             [21:24] q
#             [24]    per-row batch base offset b*HW (exact small integer)
#   feat_ref: (BHW, C)  channels-last flattened image features (all batches)
# -----------------------------------------------------------------------------
def make_extract_kernel(Himg, Wimg, B):
    HW = Himg * Wimg
    BHW = B * HW

    def kernel(pts_ref, tr_ref, feat_ref, featout_ref, coor_ref):
        p = pts_ref[...].astype(jnp.float32)          # (BR, 3)
        t = tr_ref[...]                               # (BR, 25)
        x = p[:, 0:1]
        y = p[:, 1:2]
        z = p[:, 2:3]

        # camera-space coordinates (output, sign-flipped y/z below)
        cx = x * t[:, 0:1] + y * t[:, 1:2] + z * t[:, 2:3] + t[:, 9:10]
        cy = x * t[:, 3:4] + y * t[:, 4:5] + z * t[:, 5:6] + t[:, 10:11]
        cz = x * t[:, 6:7] + y * t[:, 7:8] + z * t[:, 8:9] + t[:, 11:12]

        # pixel projection (intrinsics composed on host)
        px = x * t[:, 12:13] + y * t[:, 13:14] + z * t[:, 14:15] + t[:, 21:22]
        py = x * t[:, 15:16] + y * t[:, 16:17] + z * t[:, 17:18] + t[:, 22:23]
        pz = x * t[:, 18:19] + y * t[:, 19:20] + z * t[:, 20:21] + t[:, 23:24]

        depth_ok = jnp.abs(pz) > 1e-8
        inv_pz = pl.reciprocal(jnp.where(depth_ok, pz, 1.0), approx=True)

        u = (px * inv_pz - 128.0) * (1.0 / 128.0)
        v = (py * inv_pz - 128.0) * (1.0 / 128.0)

        # bilinear grid_sample (align_corners=True, padding_mode='zeros') as a
        # weighted one-hot (BR, BHW) @ (BHW, C) MXU matmul.
        gx = (u + 1.0) * 0.5 * (Wimg - 1)
        gy = (v + 1.0) * 0.5 * (Himg - 1)
        # clamp so the int32 cast can never wrap; out-of-range corners are
        # rejected by the validity check (same zero result as reference).
        gx = jnp.clip(gx, -2.0, float(Wimg) + 1.0)
        gy = jnp.clip(gy, -2.0, float(Himg) + 1.0)

        x0f = jnp.floor(gx)
        y0f = jnp.floor(gy)
        x0 = x0f.astype(jnp.int32)
        y0 = y0f.astype(jnp.int32)
        x1 = x0 + 1
        y1 = y0 + 1
        wx1 = gx - x0f
        wx0 = 1.0 - wx1
        wy1 = gy - y0f
        wy0 = 1.0 - wy1

        base = t[:, 24:25].astype(jnp.int32)                  # (BR, 1) = b*HW
        col = lax.broadcasted_iota(jnp.int32, (1, BHW), 1)    # (1, BHW)

        def corner(xc, yc, wc):
            valid = ((xc >= 0) & (xc < Wimg) & (yc >= 0) & (yc < Himg)
                     & depth_ok)
            xcc = jnp.clip(xc, 0, Wimg - 1)
            ycc = jnp.clip(yc, 0, Himg - 1)
            idx = base + ycc * Wimg + xcc                     # (BR, 1)
            w = jnp.where(valid, wc, 0.0)                     # (BR, 1)
            return jnp.where(col == idx, w, 0.0)              # (BR, BHW)

        wmat = corner(x0, y0, wx0 * wy0)
        wmat = wmat + corner(x1, y0, wx1 * wy0)
        wmat = wmat + corner(x0, y1, wx0 * wy1)
        wmat = wmat + corner(x1, y1, wx1 * wy1)

        feat = feat_ref[...].astype(jnp.float32)              # (BHW, C)
        sub = jnp.dot(wmat, feat, preferred_element_type=jnp.float32)
        featout_ref[...] = sub.astype(featout_ref.dtype)

        # returned points are img_coor_p * [1, -1, -1]; single store.
        coor_ref[...] = jnp.concatenate([cx, -cy, -cz], axis=1).astype(
            coor_ref.dtype)

    return kernel


# -----------------------------------------------------------------------------
# Kernel 2: fused "point pipeline":
#   encoder stand-in (per-point linear + tanh, per-group mean z)
#   + exact context_enc = Linear(768, 256)  (weights pre-split into 3 blocks)
#   + decoder stand-in (per-point MLP conditioned on z) + sigmoid.
# Both hands and all batches are stacked on the group axis (G = 2B).
# TODO(synk): PointTransformerEncoderV2 / PointTransformerDecoderOcc are
# external submodules; they are replaced by deterministic stand-ins with the
# same {'z': (B,256)} conditioning -> per-point sigmoid(logit) interface.
# -----------------------------------------------------------------------------
def make_pipeline_kernel(B, Na, Nq):
    G = 2 * B
    Ma = G * Na
    Mq = G * Nq
    inv_na = 1.0 / float(Na)

    def kernel(enc_in_ref, dec_in_ref, glob_ref,
               enc_w_ref, enc_b_ref,
               ctx_ws_ref, ctx_wo_ref, ctx_wg_ref, ctx_b_ref,
               dec_w1_ref, dec_b1_ref, dec_wz_ref, dec_w2_ref, dec_b2_ref,
               occ_ref):
        # ---- encoder stand-in: per-point linear + tanh, per-group mean z ----
        h = jnp.tanh(jnp.dot(enc_in_ref[...], enc_w_ref[...],
                             preferred_element_type=jnp.float32)
                     + enc_b_ref[...])                        # (Ma, D)
        row = lax.broadcasted_iota(jnp.int32, (G, Ma), 1)
        gid = lax.broadcasted_iota(jnp.int32, (G, Ma), 0)
        lo = gid * Na
        avg = jnp.where((row >= lo) & (row < lo + Na), inv_na, 0.0)
        z = jnp.dot(avg, h, preferred_element_type=jnp.float32)   # (G, D)

        # ---- cross-hand swap of z via a tiny permutation matmul -------------
        pi = lax.broadcasted_iota(jnp.int32, (G, G), 0)
        pj = lax.broadcasted_iota(jnp.int32, (G, G), 1)
        perm = jnp.where((pj == pi + B) | (pj == pi - B), 1.0, 0.0)
        z_other = jnp.dot(perm, z, preferred_element_type=jnp.float32)

        # ---- exact context_enc = Linear(768, 256) ----------------------------
        new_z = (jnp.dot(z, ctx_ws_ref[...],
                         preferred_element_type=jnp.float32)
                 + jnp.dot(z_other, ctx_wo_ref[...],
                           preferred_element_type=jnp.float32)
                 + jnp.dot(glob_ref[...], ctx_wg_ref[...],
                           preferred_element_type=jnp.float32)
                 + ctx_b_ref[...])                            # (G, 256)

        # ---- decoder stand-in: per-point MLP conditioned on new_z -----------
        zc = jnp.dot(new_z, dec_wz_ref[...],
                     preferred_element_type=jnp.float32)      # (G, H)
        rq = lax.broadcasted_iota(jnp.int32, (Mq, G), 0)
        gq = lax.broadcasted_iota(jnp.int32, (Mq, G), 1)
        lo_q = gq * Nq
        expand = jnp.where((rq >= lo_q) & (rq < lo_q + Nq), 1.0, 0.0)  # (Mq,G)
        hd = (jnp.dot(dec_in_ref[...], dec_w1_ref[...],
                      preferred_element_type=jnp.float32)
              + jnp.dot(expand, zc, preferred_element_type=jnp.float32)
              + dec_b1_ref[...])
        hd = jnp.maximum(hd, 0.0)
        logits = jnp.sum(hd * dec_w2_ref[...], axis=-1,
                         keepdims=True) + dec_b2_ref[...]     # (Mq, 1)
        occ_ref[...] = jax.nn.sigmoid(logits).astype(occ_ref.dtype)

    return kernel


# -----------------------------------------------------------------------------
# Host-side transform composition (tiny per-batch 3x3 math, folded so a single
# kernel specialization handles all (side, anchor) combinations).
# -----------------------------------------------------------------------------
def _compose_set_transform(camera_params, root_rot_mat, side, anchor):
    R_mat = camera_params['R'].astype(jnp.float32)            # (B, 3, 3)
    T = camera_params['T'].astype(jnp.float32)                # (B, 3)
    K = camera_params['camera'].astype(jnp.float32)           # (B, 3, 3)
    root = camera_params[f'{side}_root_xyz'].astype(jnp.float32)  # (B, 3)
    B = R_mat.shape[0]
    s = jnp.array([-1.0, 1.0, 1.0], jnp.float32)

    if anchor:
        # img_p = p/1000 + root * ([-1,1,1] if left else 1)
        M1 = jnp.broadcast_to(jnp.eye(3, dtype=jnp.float32) / 1000.0,
                              (B, 3, 3))
        c1 = root * s[None, :] if side == 'left' else root
    else:
        # img_p = ((0.4*p) @ rrm[:3,:3] + rrm[3,:3] + root) * (s if left)
        rrm = root_rot_mat[side].astype(jnp.float32)          # (B, 4, 4)
        M1 = 0.4 * rrm[:, :3, :3]
        c1 = rrm[:, 3, :3] + root
        if side == 'left':
            M1 = M1 * s[None, None, :]
            c1 = c1 * s[None, :]

    # extrinsics: cam = img_p @ R^T + T
    M = jnp.einsum('bij,bkj->bik', M1, R_mat)
    c = jnp.einsum('bj,bkj->bk', c1, R_mat) + T
    # intrinsics folded (1000x dropped; it cancels in px/pz)
    P = jnp.einsum('bij,bkj->bik', M, K)
    q = jnp.einsum('bj,bkj->bk', c, K)

    MT = jnp.swapaxes(M, 1, 2).reshape(B, 9)
    PT = jnp.swapaxes(P, 1, 2).reshape(B, 9)
    return jnp.concatenate([MT, c, PT, q], axis=1)            # (B, 24)


def _pad_last(x, to):
    pad = to - x.shape[-1]
    return jnp.pad(x, ((0, 0), (0, 0), (0, pad)))


# -----------------------------------------------------------------------------
# Model wrapper
# -----------------------------------------------------------------------------
class ArticulatedHandNetRefOccPallas:
    def __init__(self, params, Himg, Wimg):
        self.params = params
        self.Himg = Himg
        self.Wimg = Wimg

    # -- init_occ estimator ---------------------------------------------------
    def init_occ(self, img, camera_params, inputs, p, root_rot_mat,
                 bone_lengths, sample=True):
        # TODO(synk): the real init_occ_estimator is an external submodule;
        # deterministic stand-in (runs under stop_gradient, like torch.no_grad).
        w = jnp.array([0.3, -0.2, 0.1], jnp.float32)
        left = jax.nn.sigmoid(jnp.einsum('bnc,c->bn', p['left'], w))
        right = jax.nn.sigmoid(jnp.einsum('bnc,c->bn', p['right'], w))
        return lax.stop_gradient(left), lax.stop_gradient(right)

    # -- fused extract_local_img_feat (4 point sets x B batches, one call) -----
    def extract_all(self, feat_flat, camera_params, p, anchor_points,
                    root_rot_mat, B, HW, C):
        sets = [
            ('left', False, p['left']),
            ('right', False, p['right']),
            ('left', True, anchor_points['left']),
            ('right', True, anchor_points['right']),
        ]
        pts_list, tr_list, lens = [], [], []
        for side, anchor, pts in sets:
            n = pts.shape[1]
            tr = _compose_set_transform(camera_params, root_rot_mat, side,
                                        anchor)                # (B, 24)
            tr_list.append(jnp.broadcast_to(tr[:, None, :], (B, n, 24)))
            pts_list.append(pts.astype(jnp.float32))
            lens.append(n)
        pts_all = jnp.concatenate(pts_list, axis=1)            # (B, R, 3)
        tr_all = jnp.concatenate(tr_list, axis=1)              # (B, R, 24)
        R = pts_all.shape[1]
        base = (jnp.arange(B, dtype=jnp.float32) * float(HW))[:, None, None]
        base = jnp.broadcast_to(base, (B, R, 1))
        tr_all = jnp.concatenate([tr_all, base], axis=2)       # (B, R, 25)

        kernel = make_extract_kernel(self.Himg, self.Wimg, B)
        feat_all, coor_all = pl.pallas_call(
            kernel,
            out_shape=[
                jax.ShapeDtypeStruct((B * R, C), jnp.float32),
                jax.ShapeDtypeStruct((B * R, 3), jnp.float32),
            ],
        )(pts_all.reshape(B * R, 3), tr_all.reshape(B * R, 25), feat_flat)

        feat_all = feat_all.reshape(B, R, C)
        coor_all = coor_all.reshape(B, R, 3)
        feats, coors = [], []
        off = 0
        for n in lens:
            feats.append(feat_all[:, off:off + n])
            coors.append(coor_all[:, off:off + n])
            off += n
        return feats, coors

    # -- fused enc + context_enc + dec (one pallas_call) -----------------------
    def point_pipeline(self, enc_in, dec_in, img_global_tiled, B, Na, Nq):
        ctx_w = self.params['ctx_w']
        occ = pl.pallas_call(
            make_pipeline_kernel(B, Na, Nq),
            out_shape=jax.ShapeDtypeStruct((2 * B * Nq, 1), jnp.float32),
        )(enc_in, dec_in, img_global_tiled,
          self.params['enc_w'], self.params['enc_b'],
          ctx_w[0:256], ctx_w[256:512], ctx_w[512:768], self.params['ctx_b'],
          self.params['dec_w1'], self.params['dec_b1'],
          self.params['dec_wz'], self.params['dec_w2'], self.params['dec_b2'])
        occ = occ.reshape(2 * B, Nq)
        return occ[:B], occ[B:]

    # -- forward ---------------------------------------------------------------
    def forward(self, img, camera_params, inputs, p, anchor_points,
                root_rot_mat, bone_lengths, img_feat, sample=True):
        # TODO(synk): the ResNetSimple image encoder / image_final_layer /
        # hms_global_layer / dp_global_layer path (img_feat is None branch) is
        # not reproduced; we exercise the module's `img_feat is not None`
        # branch where (img_feat, img_global) are provided.
        img_feat_map, img_global = img_feat
        B, C, H, W = img_feat_map.shape
        feat_flat = jnp.transpose(img_feat_map, (0, 2, 3, 1)).reshape(
            B * H * W, C)

        feats, coors = self.extract_all(feat_flat, camera_params, p,
                                        anchor_points, root_rot_mat,
                                        B, H * W, C)
        left_q_feat, right_q_feat, left_a_feat, right_a_feat = feats
        left_q_pts, right_q_pts, left_a_pts, right_a_pts = coors

        left_p_r, right_p_r = self.init_occ(img, camera_params, inputs, p,
                                            root_rot_mat, bone_lengths,
                                            sample=sample)

        Na = left_a_feat.shape[1]
        Nq = left_q_feat.shape[1]
        left_labels = jnp.broadcast_to(jnp.array([1.0, 0.0], jnp.float32),
                                       (B, Na, 2))
        right_labels = jnp.broadcast_to(jnp.array([0.0, 1.0], jnp.float32),
                                        (B, Na, 2))
        left_anchor_feat = jnp.concatenate([left_a_feat, left_labels], 2)
        right_anchor_feat = jnp.concatenate([right_a_feat, right_labels], 2)

        all_pts = jnp.concatenate([left_a_pts, right_a_pts], 1)
        min_xyz = jnp.min(all_pts, axis=1)
        max_xyz = jnp.max(all_pts, axis=1)
        center_xyz = (max_xyz[:, None, :] + min_xyz[:, None, :]) / 2.0

        left_a_pts = left_a_pts - center_xyz
        right_a_pts = right_a_pts - center_xyz
        left_q_pts = left_q_pts - center_xyz
        right_q_pts = right_q_pts - center_xyz

        # glue: pad 37-dim encoder inputs (3 + 32 + 2) to 128 lanes (zero
        # weight rows make this mathematically identical).
        left_enc_in = _pad_last(
            jnp.concatenate([left_a_pts, left_anchor_feat], 2), 128)
        right_enc_in = _pad_last(
            jnp.concatenate([right_a_pts, right_anchor_feat], 2), 128)
        enc_in = jnp.concatenate([left_enc_in, right_enc_in], 0).reshape(
            2 * B * Na, 128)

        # glue: pad 67-dim (3 + 32 + 32) decoder point features to 128 lanes.
        left_p_feat = jnp.concatenate(
            [left_q_pts, left_q_feat,
             jnp.repeat(left_p_r[..., None], 32, axis=-1)], 2)
        right_p_feat = jnp.concatenate(
            [right_q_pts, right_q_feat,
             jnp.repeat(right_p_r[..., None], 32, axis=-1)], 2)
        dec_in = _pad_last(jnp.concatenate([left_p_feat, right_p_feat], 0),
                           128).reshape(2 * B * Nq, 128)

        img_global_tiled = jnp.concatenate([img_global, img_global], 0)

        return self.point_pipeline(enc_in, dec_in, img_global_tiled,
                                   B, Na, Nq)


# -----------------------------------------------------------------------------
# Deterministic parameter / input construction and run
# -----------------------------------------------------------------------------
def init_params(key):
    ks = jax.random.split(key, 10)
    return {
        # exact module: context_enc = nn.Linear(768, 256)
        'ctx_w': 0.02 * jax.random.normal(ks[0], (768, 256), jnp.float32),
        'ctx_b': 0.02 * jax.random.normal(ks[1], (1, 256), jnp.float32),
        # trans_enc stand-in (input 37-dim zero-padded to 128)
        'enc_w': 0.05 * jax.random.normal(ks[2], (128, 256), jnp.float32),
        'enc_b': 0.05 * jax.random.normal(ks[3], (1, 256), jnp.float32),
        # trans_dec stand-in (input 67-dim zero-padded to 128)
        'dec_w1': 0.05 * jax.random.normal(ks[4], (128, 32), jnp.float32),
        'dec_b1': 0.05 * jax.random.normal(ks[5], (1, 32), jnp.float32),
        'dec_wz': 0.05 * jax.random.normal(ks[6], (256, 32), jnp.float32),
        'dec_w2': 0.10 * jax.random.normal(ks[7], (1, 32), jnp.float32),
        'dec_b2': 0.10 * jax.random.normal(ks[8], (1, 1), jnp.float32),
    }


if __name__ == "__main__":
    B, Nq, Na, C, Himg, Wimg = 2, 8, 8, 32, 16, 16

    key = jax.random.PRNGKey(0)
    kparams, *kin = jax.random.split(key, 16)
    params = init_params(kparams)
    model = ArticulatedHandNetRefOccPallas(params, Himg, Wimg)

    img = jax.random.normal(kin[0], (B, 3, Himg, Wimg), jnp.float32)
    img_feat_map = jax.random.normal(kin[1], (B, C, Himg, Wimg), jnp.float32)
    img_global = jax.random.normal(kin[2], (B, 256), jnp.float32)

    p = {'left': 0.1 * jax.random.normal(kin[3], (B, Nq, 3), jnp.float32),
         'right': 0.1 * jax.random.normal(kin[4], (B, Nq, 3), jnp.float32)}
    anchor_points = {
        'left': 50.0 * jax.random.normal(kin[5], (B, Na, 3), jnp.float32),
        'right': 50.0 * jax.random.normal(kin[6], (B, Na, 3), jnp.float32)}

    root_rot_mat = {
        'left': jnp.eye(4, dtype=jnp.float32)[None]
                + 0.01 * jax.random.normal(kin[7], (B, 4, 4), jnp.float32),
        'right': jnp.eye(4, dtype=jnp.float32)[None]
                 + 0.01 * jax.random.normal(kin[8], (B, 4, 4), jnp.float32)}

    cam_intr = jnp.array([[500.0, 0.0, 128.0],
                          [0.0, 500.0, 128.0],
                          [0.0, 0.0, 1.0]], jnp.float32)
    camera_params = {
        'R': jnp.eye(3, dtype=jnp.float32)[None]
             + 0.01 * jax.random.normal(kin[9], (B, 3, 3), jnp.float32),
        'T': 0.01 * jax.random.normal(kin[10], (B, 3), jnp.float32),
        'camera': jnp.broadcast_to(cam_intr, (B, 3, 3)),
        'left_root_xyz': jnp.array([[0.05, 0.0, 0.5]], jnp.float32)
                         + 0.01 * jax.random.normal(kin[11], (B, 3), jnp.float32),
        'right_root_xyz': jnp.array([[-0.05, 0.0, 0.5]], jnp.float32)
                          + 0.01 * jax.random.normal(kin[12], (B, 3), jnp.float32),
    }

    inputs = jnp.zeros((B, 4), jnp.float32)          # unused by stand-ins
    bone_lengths = jnp.zeros((B, 20), jnp.float32)   # unused by stand-ins

    ref_left_p_r, ref_right_p_r = model.forward(
        img, camera_params, inputs, p, anchor_points, root_rot_mat,
        bone_lengths, img_feat=(img_feat_map, img_global))

    jax.block_until_ready((ref_left_p_r, ref_right_p_r))
    assert ref_left_p_r.shape == (B, Nq) and ref_right_p_r.shape == (B, Nq)
    assert bool(jnp.all(jnp.isfinite(ref_left_p_r)))
    assert bool(jnp.all(jnp.isfinite(ref_right_p_r)))
    print("KERNEL_OK")
</pallas_src>

<mosaic_0001>
module attributes {stable_mosaic.version = 11 : i64} {
  func.func @kernel(%arg0: memref<64x3xf32, #tpu.memory_space<vmem>>, %arg1: memref<64x25xf32, #tpu.memory_space<vmem>>, %arg2: memref<512x32xf32, #tpu.memory_space<vmem>>, %arg3: memref<64x32xf32, #tpu.memory_space<vmem>>, %arg4: memref<64x3xf32, #tpu.memory_space<vmem>>) attributes {dimension_semantics = [], scalar_prefetch = 0 : i64, scratch_operands = 0 : i64, tpu.core_type = #tpu.core_type<tc>} {
    %c0 = arith.constant 0 : index
    %c0_0 = arith.constant 0 : index
    %0 = vector.load %arg0[%c0, %c0_0] : memref<64x3xf32, #tpu.memory_space<vmem>>, vector<64x3xf32>
    %c0_1 = arith.constant 0 : index
    %c0_2 = arith.constant 0 : index
    %1 = vector.load %arg1[%c0_1, %c0_2] : memref<64x25xf32, #tpu.memory_space<vmem>>, vector<64x25xf32>
    %2 = vector.extract_strided_slice %0 {offsets = [0, 0], sizes = [64, 1], strides = [1, 1]} : vector<64x3xf32> to vector<64x1xf32>
    %3 = vector.extract_strided_slice %0 {offsets = [0, 1], sizes = [64, 1], strides = [1, 1]} : vector<64x3xf32> to vector<64x1xf32>
    %4 = vector.extract_strided_slice %0 {offsets = [0, 2], sizes = [64, 1], strides = [1, 1]} : vector<64x3xf32> to vector<64x1xf32>
    %5 = vector.extract_strided_slice %1 {offsets = [0, 0], sizes = [64, 1], strides = [1, 1]} : vector<64x25xf32> to vector<64x1xf32>
    %6 = arith.mulf %2, %5 : vector<64x1xf32>
    %7 = vector.extract_strided_slice %1 {offsets = [0, 1], sizes = [64, 1], strides = [1, 1]} : vector<64x25xf32> to vector<64x1xf32>
    %8 = arith.mulf %3, %7 : vector<64x1xf32>
    %9 = arith.addf %6, %8 : vector<64x1xf32>
    %10 = vector.extract_strided_slice %1 {offsets = [0, 2], sizes = [64, 1], strides = [1, 1]} : vector<64x25xf32> to vector<64x1xf32>
    %11 = arith.mulf %4, %10 : vector<64x1xf32>
    %12 = arith.addf %9, %11 : vector<64x1xf32>
    %13 = vector.extract_strided_slice %1 {offsets = [0, 9], sizes = [64, 1], strides = [1, 1]} : vector<64x25xf32> to vector<64x1xf32>
    %14 = arith.addf %12, %13 : vector<64x1xf32>
    %15 = vector.extract_strided_slice %1 {offsets = [0, 3], sizes = [64, 1], strides = [1, 1]} : vector<64x25xf32> to vector<64x1xf32>
    %16 = arith.mulf %2, %15 : vector<64x1xf32>
    %17 = vector.extract_strided_slice %1 {offsets = [0, 4], sizes = [64, 1], strides = [1, 1]} : vector<64x25xf32> to vector<64x1xf32>
    %18 = arith.mulf %3, %17 : vector<64x1xf32>
    %19 = arith.addf %16, %18 : vector<64x1xf32>
    %20 = vector.extract_strided_slice %1 {offsets = [0, 5], sizes = [64, 1], strides = [1, 1]} : vector<64x25xf32> to vector<64x1xf32>
    %21 = arith.mulf %4, %20 : vector<64x1xf32>
    %22 = arith.addf %19, %21 : vector<64x1xf32>
    %23 = vector.extract_strided_slice %1 {offsets = [0, 10], sizes = [64, 1], strides = [1, 1]} : vector<64x25xf32> to vector<64x1xf32>
    %24 = arith.addf %22, %23 : vector<64x1xf32>
    %25 = vector.extract_strided_slice %1 {offsets = [0, 6], sizes = [64, 1], strides = [1, 1]} : vector<64x25xf32> to vector<64x1xf32>
    %26 = arith.mulf %2, %25 : vector<64x1xf32>
    %27 = vector.extract_strided_slice %1 {offsets = [0, 7], sizes = [64, 1], strides = [1, 1]} : vector<64x25xf32> to vector<64x1xf32>
    %28 = arith.mulf %3, %27 : vector<64x1xf32>
    %29 = arith.addf %26, %28 : vector<64x1xf32>
    %30 = vector.extract_strided_slice %1 {offsets = [0, 8], sizes = [64, 1], strides = [1, 1]} : vector<64x25xf32> to vector<64x1xf32>
    %31 = arith.mulf %4, %30 : vector<64x1xf32>
    %32 = arith.addf %29, %31 : vector<64x1xf32>
    %33 = vector.extract_strided_slice %1 {offsets = [0, 11], sizes = [64, 1], strides = [1, 1]} : vector<64x25xf32> to vector<64x1xf32>
    %34 = arith.addf %32, %33 : vector<64x1xf32>
    %35 = vector.extract_strided_slice %1 {offsets = [0, 12], sizes = [64, 1], strides = [1, 1]} : vector<64x25xf32> to vector<64x1xf32>
    %36 = arith.mulf %2, %35 : vector<64x1xf32>
    %37 = vector.extract_strided_slice %1 {offsets = [0, 13], sizes = [64, 1], strides = [1, 1]} : vector<64x25xf32> to vector<64x1xf32>
    %38 = arith.mulf %3, %37 : vector<64x1xf32>
    %39 = arith.addf %36, %38 : vector<64x1xf32>
    %40 = vector.extract_strided_slice %1 {offsets = [0, 14], sizes = [64, 1], strides = [1, 1]} : vector<64x25xf32> to vector<64x1xf32>
    %41 = arith.mulf %4, %40 : vector<64x1xf32>
    %42 = arith.addf %39, %41 : vector<64x1xf32>
    %43 = vector.extract_strided_slice %1 {offsets = [0, 21], sizes = [64, 1], strides = [1, 1]} : vector<64x25xf32> to vector<64x1xf32>
    %44 = arith.addf %42, %43 : vector<64x1xf32>
    %45 = vector.extract_strided_slice %1 {offsets = [0, 15], sizes = [64, 1], strides = [1, 1]} : vector<64x25xf32> to vector<64x1xf32>
    %46 = arith.mulf %2, %45 : vector<64x1xf32>
    %47 = vector.extract_strided_slice %1 {offsets = [0, 16], sizes = [64, 1], strides = [1, 1]} : vector<64x25xf32> to vector<64x1xf32>
    %48 = arith.mulf %3, %47 : vector<64x1xf32>
    %49 = arith.addf %46, %48 : vector<64x1xf32>
    %50 = vector.extract_strided_slice %1 {offsets = [0, 17], sizes = [64, 1], strides = [1, 1]} : vector<64x25xf32> to vector<64x1xf32>
    %51 = arith.mulf %4, %50 : vector<64x1xf32>
    %52 = arith.addf %49, %51 : vector<64x1xf32>
    %53 = vector.extract_strided_slice %1 {offsets = [0, 22], sizes = [64, 1], strides = [1, 1]} : vector<64x25xf32> to vector<64x1xf32>
    %54 = arith.addf %52, %53 : vector<64x1xf32>
    %55 = vector.extract_strided_slice %1 {offsets = [0, 18], sizes = [64, 1], strides = [1, 1]} : vector<64x25xf32> to vector<64x1xf32>
    %56 = arith.mulf %2, %55 : vector<64x1xf32>
    %57 = vector.extract_strided_slice %1 {offsets = [0, 19], sizes = [64, 1], strides = [1, 1]} : vector<64x25xf32> to vector<64x1xf32>
    %58 = arith.mulf %3, %57 : vector<64x1xf32>
    %59 = arith.addf %56, %58 : vector<64x1xf32>
    %60 = vector.extract_strided_slice %1 {offsets = [0, 20], sizes = [64, 1], strides = [1, 1]} : vector<64x25xf32> to vector<64x1xf32>
    %61 = arith.mulf %4, %60 : vector<64x1xf32>
    %62 = arith.addf %59, %61 : vector<64x1xf32>
    %63 = vector.extract_strided_slice %1 {offsets = [0, 23], sizes = [64, 1], strides = [1, 1]} : vector<64x25xf32> to vector<64x1xf32>
    %64 = arith.addf %62, %63 : vector<64x1xf32>
    %65 = math.absf %64 : vector<64x1xf32>
    %cst = arith.constant 9.99999993E-9 : f32
    %66 = vector.broadcast %cst : f32 to vector<64x1xf32>
    %67 = arith.cmpf ogt, %65, %66 : vector<64x1xf32>
    %cst_3 = arith.constant 1.000000e+00 : f32
    %68 = vector.broadcast %cst_3 : f32 to vector<64x1xf32>
    %69 = arith.select %67, %64, %68 : vector<64x1xi1>, vector<64x1xf32>
    %70 = tpu.reciprocal %69 {approx = true} : vector<64x1xf32> -> vector<64x1xf32>
    %71 = arith.mulf %44, %70 : vector<64x1xf32>
    %cst_4 = arith.constant 1.280000e+02 : f32
    %72 = vector.broadcast %cst_4 : f32 to vector<64x1xf32>
    %73 = arith.subf %71, %72 : vector<64x1xf32>
    %cst_5 = arith.constant 7.812500e-03 : f32
    %74 = vector.broadcast %cst_5 : f32 to vector<64x1xf32>
    %75 = arith.mulf %73, %74 : vector<64x1xf32>
    %76 = arith.mulf %54, %70 : vector<64x1xf32>
    %cst_6 = arith.constant 1.280000e+02 : f32
    %77 = vector.broadcast %cst_6 : f32 to vector<64x1xf32>
    %78 = arith.subf %76, %77 : vector<64x1xf32>
    %cst_7 = arith.constant 7.812500e-03 : f32
    %79 = vector.broadcast %cst_7 : f32 to vector<64x1xf32>
    %80 = arith.mulf %78, %79 : vector<64x1xf32>
    %cst_8 = arith.constant 1.000000e+00 : f32
    %81 = vector.broadcast %cst_8 : f32 to vector<64x1xf32>
    %82 = arith.addf %75, %81 : vector<64x1xf32>
    %cst_9 = arith.constant 5.000000e-01 : f32
    %83 = vector.broadcast %cst_9 : f32 to vector<64x1xf32>
    %84 = arith.mulf %82, %83 : vector<64x1xf32>
    %cst_10 = arith.constant 1.500000e+01 : f32
    %85 = vector.broadcast %cst_10 : f32 to vector<64x1xf32>
    %86 = arith.mulf %84, %85 : vector<64x1xf32>
    %cst_11 = arith.constant 1.000000e+00 : f32
    %87 = vector.broadcast %cst_11 : f32 to vector<64x1xf32>
    %88 = arith.addf %80, %87 : vector<64x1xf32>
    %cst_12 = arith.constant 5.000000e-01 : f32
    %89 = vector.broadcast %cst_12 : f32 to vector<64x1xf32>
    %90 = arith.mulf %88, %89 : vector<64x1xf32>
    %cst_13 = arith.constant 1.500000e+01 : f32
    %91 = vector.broadcast %cst_13 : f32 to vector<64x1xf32>
    %92 = arith.mulf %90, %91 : vector<64x1xf32>
    %cst_14 = arith.constant -2.000000e+00 : f32
    %cst_15 = arith.constant 1.700000e+01 : f32
    %93 = vector.broadcast %cst_14 : f32 to vector<64x1xf32>
    %94 = arith.maximumf %93, %86 : vector<64x1xf32>
    %95 = vector.broadcast %cst_15 : f32 to vector<64x1xf32>
    %96 = arith.minimumf %95, %94 : vector<64x1xf32>
    %cst_16 = arith.constant -2.000000e+00 : f32
    %cst_17 = arith.constant 1.700000e+01 : f32
    %97 = vector.broadcast %cst_16 : f32 to vector<64x1xf32>
    %98 = arith.maximumf %97, %92 : vector<64x1xf32>
    %99 = vector.broadcast %cst_17 : f32 to vector<64x1xf32>
    %100 = arith.minimumf %99, %98 : vector<64x1xf32>
    %101 = math.floor %96 : vector<64x1xf32>
    %102 = math.floor %100 : vector<64x1xf32>
    %103 = arith.fptosi %101 : vector<64x1xf32> to vector<64x1xi32>
    %104 = arith.fptosi %102 : vector<64x1xf32> to vector<64x1xi32>
    %c1_i32 = arith.constant 1 : i32
    %105 = vector.broadcast %c1_i32 : i32 to vector<64x1xi32>
    %106 = arith.addi %103, %105 : vector<64x1xi32>
    %c1_i32_18 = arith.constant 1 : i32
    %107 = vector.broadcast %c1_i32_18 : i32 to vector<64x1xi32>
    %108 = arith.addi %104, %107 : vector<64x1xi32>
    %109 = arith.subf %96, %101 : vector<64x1xf32>
    %cst_19 = arith.constant 1.000000e+00 : f32
    %110 = vector.broadcast %cst_19 : f32 to vector<64x1xf32>
    %111 = arith.subf %110, %109 : vector<64x1xf32>
    %112 = arith.subf %100, %102 : vector<64x1xf32>
    %cst_20 = arith.constant 1.000000e+00 : f32
    %113 = vector.broadcast %cst_20 : f32 to vector<64x1xf32>
    %114 = arith.subf %113, %112 : vector<64x1xf32>
    %115 = vector.extract_strided_slice %1 {offsets = [0, 24], sizes = [64, 1], strides = [1, 1]} : vector<64x25xf32> to vector<64x1xf32>
    %116 = arith.fptosi %115 : vector<64x1xf32> to vector<64x1xi32>
    %117 = tpu.iota {dimensions = array<i32: 1>} : vector<1x512xi32>
    %118 = arith.mulf %111, %114 : vector<64x1xf32>
    %c0_i32 = arith.constant 0 : i32
    %119 = vector.broadcast %c0_i32 : i32 to vector<64x1xi32>
    %120 = arith.cmpi sge, %103, %119 : vector<64x1xi32>
    %c16_i32 = arith.constant 16 : i32
    %121 = vector.broadcast %c16_i32 : i32 to vector<64x1xi32>
    %122 = arith.cmpi slt, %103, %121 : vector<64x1xi32>
    %123 = arith.andi %120, %122 : vector<64x1xi1>
    %c0_i32_21 = arith.constant 0 : i32
    %124 = vector.broadcast %c0_i32_21 : i32 to vector<64x1xi32>
    %125 = arith.cmpi sge, %104, %124 : vector<64x1xi32>
    %126 = arith.andi %123, %125 : vector<64x1xi1>
    %c16_i32_22 = arith.constant 16 : i32
    %127 = vector.broadcast %c16_i32_22 : i32 to vector<64x1xi32>
    %128 = arith.cmpi slt, %104, %127 : vector<64x1xi32>
    %129 = arith.andi %126, %128 : vector<64x1xi1>
    %130 = arith.andi %129, %67 : vector<64x1xi1>
    %c0_i32_23 = arith.constant 0 : i32
    %c15_i32 = arith.constant 15 : i32
    %131 = vector.broadcast %c0_i32_23 : i32 to vector<64x1xi32>
    %132 = arith.maxsi %131, %103 : vector<64x1xi32>
    %133 = vector.broadcast %c15_i32 : i32 to vector<64x1xi32>
    %134 = arith.minsi %133, %132 : vector<64x1xi32>
    %c0_i32_24 = arith.constant 0 : i32
    %c15_i32_25 = arith.constant 15 : i32
    %135 = vector.broadcast %c0_i32_24 : i32 to vector<64x1xi32>
    %136 = arith.maxsi %135, %104 : vector<64x1xi32>
    %137 = vector.broadcast %c15_i32_25 : i32 to vector<64x1xi32>
    %138 = arith.minsi %137, %136 : vector<64x1xi32>
    %c16_i32_26 = arith.constant 16 : i32
    %139 = vector.broadcast %c16_i32_26 : i32 to vector<64x1xi32>
    %140 = arith.muli %138, %139 : vector<64x1xi32>
    %141 = arith.addi %116, %140 : vector<64x1xi32>
    %142 = arith.addi %141, %134 : vector<64x1xi32>
    %cst_27 = arith.constant 0.000000e+00 : f32
    %143 = vector.broadcast %cst_27 : f32 to vector<64x1xf32>
    %144 = arith.select %130, %118, %143 : vector<64x1xi1>, vector<64x1xf32>
    %145 = vector.broadcast %117 : vector<1x512xi32> to vector<64x512xi32>
    %146 = vector.broadcast %142 : vector<64x1xi32> to vector<64x512xi32>
    %147 = arith.cmpi eq, %145, %146 : vector<64x512xi32>
    %cst_28 = arith.constant 0.000000e+00 : f32
    %148 = vector.shape_cast %144 : vector<64x1xf32> to vector<64x1xf32>
    %149 = vector.broadcast %148 : vector<64x1xf32> to vector<64x512xf32>
    %150 = vector.broadcast %cst_28 : f32 to vector<64x512xf32>
    %151 = arith.select %147, %149, %150 : vector<64x512xi1>, vector<64x512xf32>
    %152 = arith.mulf %109, %114 : vector<64x1xf32>
    %c0_i32_29 = arith.constant 0 : i32
    %153 = vector.broadcast %c0_i32_29 : i32 to vector<64x1xi32>
    %154 = arith.cmpi sge, %106, %153 : vector<64x1xi32>
    %c16_i32_30 = arith.constant 16 : i32
    %155 = vector.broadcast %c16_i32_30 : i32 to vector<64x1xi32>
    %156 = arith.cmpi slt, %106, %155 : vector<64x1xi32>
    %157 = arith.andi %154, %156 : vector<64x1xi1>
    %c0_i32_31 = arith.constant 0 : i32
    %158 = vector.broadcast %c0_i32_31 : i32 to vector<64x1xi32>
    %159 = arith.cmpi sge, %104, %158 : vector<64x1xi32>
    %160 = arith.andi %157, %159 : vector<64x1xi1>
    %c16_i32_32 = arith.constant 16 : i32
    %161 = vector.broadcast %c16_i32_32 : i32 to vector<64x1xi32>
    %162 = arith.cmpi slt, %104, %161 : vector<64x1xi32>
    %163 = arith.andi %160, %162 : vector<64x1xi1>
    %164 = arith.andi %163, %67 : vector<64x1xi1>
    %c0_i32_33 = arith.constant 0 : i32
    %c15_i32_34 = arith.constant 15 : i32
    %165 = vector.broadcast %c0_i32_33 : i32 to vector<64x1xi32>
    %166 = arith.maxsi %165, %106 : vector<64x1xi32>
    %167 = vector.broadcast %c15_i32_34 : i32 to vector<64x1xi32>
    %168 = arith.minsi %167, %166 : vector<64x1xi32>
    %c0_i32_35 = arith.constant 0 : i32
    %c15_i32_36 = arith.constant 15 : i32
    %169 = vector.broadcast %c0_i32_35 : i32 to vector<64x1xi32>
    %170 = arith.maxsi %169, %104 : vector<64x1xi32>
    %171 = vector.broadcast %c15_i32_36 : i32 to vector<64x1xi32>
    %172 = arith.minsi %171, %170 : vector<64x1xi32>
    %c16_i32_37 = arith.constant 16 : i32
    %173 = vector.broadcast %c16_i32_37 : i32 to vector<64x1xi32>
    %174 = arith.muli %172, %173 : vector<64x1xi32>
    %175 = arith.addi %116, %174 : vector<64x1xi32>
    %176 = arith.addi %175, %168 : vector<64x1xi32>
    %cst_38 = arith.constant 0.000000e+00 : f32
    %177 = vector.broadcast %cst_38 : f32 to vector<64x1xf32>
    %178 = arith.select %164, %152, %177 : vector<64x1xi1>, vector<64x1xf32>
    %179 = vector.broadcast %117 : vector<1x512xi32> to vector<64x512xi32>
    %180 = vector.broadcast %176 : vector<64x1xi32> to vector<64x512xi32>
    %181 = arith.cmpi eq, %179, %180 : vector<64x512xi32>
    %cst_39 = arith.constant 0.000000e+00 : f32
    %182 = vector.shape_cast %178 : vector<64x1xf32> to vector<64x1xf32>
    %183 = vector.broadcast %182 : vector<64x1xf32> to vector<64x512xf32>
    %184 = vector.broadcast %cst_39 : f32 to vector<64x512xf32>
    %185 = arith.select %181, %183, %184 : vector<64x512xi1>, vector<64x512xf32>
    %186 = arith.addf %151, %185 : vector<64x512xf32>
    %187 = arith.mulf %111, %112 : vector<64x1xf32>
    %c0_i32_40 = arith.constant 0 : i32
    %188 = vector.broadcast %c0_i32_40 : i32 to vector<64x1xi32>
    %189 = arith.cmpi sge, %103, %188 : vector<64x1xi32>
    %c16_i32_41 = arith.constant 16 : i32
    %190 = vector.broadcast %c16_i32_41 : i32 to vector<64x1xi32>
    %191 = arith.cmpi slt, %103, %190 : vector<64x1xi32>
    %192 = arith.andi %189, %191 : vector<64x1xi1>
    %c0_i32_42 = arith.constant 0 : i32
    %193 = vector.broadcast %c0_i32_42 : i32 to vector<64x1xi32>
    %194 = arith.cmpi sge, %108, %193 : vector<64x1xi32>
    %195 = arith.andi %192, %194 : vector<64x1xi1>
    %c16_i32_43 = arith.constant 16 : i32
    %196 = vector.broadcast %c16_i32_43 : i32 to vector<64x1xi32>
    %197 = arith.cmpi slt, %108, %196 : vector<64x1xi32>
    %198 = arith.andi %195, %197 : vector<64x1xi1>
    %199 = arith.andi %198, %67 : vector<64x1xi1>
    %c0_i32_44 = arith.constant 0 : i32
    %c15_i32_45 = arith.constant 15 : i32
    %200 = vector.broadcast %c0_i32_44 : i32 to vector<64x1xi32>
    %201 = arith.maxsi %200, %103 : vector<64x1xi32>
    %202 = vector.broadcast %c15_i32_45 : i32 to vector<64x1xi32>
    %203 = arith.minsi %202, %201 : vector<64x1xi32>
    %c0_i32_46 = arith.constant 0 : i32
    %c15_i32_47 = arith.constant 15 : i32
    %204 = vector.broadcast %c0_i32_46 : i32 to vector<64x1xi32>
    %205 = arith.maxsi %204, %108 : vector<64x1xi32>
    %206 = vector.broadcast %c15_i32_47 : i32 to vector<64x1xi32>
    %207 = arith.minsi %206, %205 : vector<64x1xi32>
    %c16_i32_48 = arith.constant 16 : i32
    %208 = vector.broadcast %c16_i32_48 : i32 to vector<64x1xi32>
    %209 = arith.muli %207, %208 : vector<64x1xi32>
    %210 = arith.addi %116, %209 : vector<64x1xi32>
    %211 = arith.addi %210, %203 : vector<64x1xi32>
    %cst_49 = arith.constant 0.000000e+00 : f32
    %212 = vector.broadcast %cst_49 : f32 to vector<64x1xf32>
    %213 = arith.select %199, %187, %212 : vector<64x1xi1>, vector<64x1xf32>
    %214 = vector.broadcast %117 : vector<1x512xi32> to vector<64x512xi32>
    %215 = vector.broadcast %211 : vector<64x1xi32> to vector<64x512xi32>
    %216 = arith.cmpi eq, %214, %215 : vector<64x512xi32>
    %cst_50 = arith.constant 0.000000e+00 : f32
    %217 = vector.shape_cast %213 : vector<64x1xf32> to vector<64x1xf32>
    %218 = vector.broadcast %217 : vector<64x1xf32> to vector<64x512xf32>
    %219 = vector.broadcast %cst_50 : f32 to vector<64x512xf32>
    %220 = arith.select %216, %218, %219 : vector<64x512xi1>, vector<64x512xf32>
    %221 = arith.addf %186, %220 : vector<64x512xf32>
    %222 = arith.mulf %109, %112 : vector<64x1xf32>
    %c0_i32_51 = arith.constant 0 : i32
    %223 = vector.broadcast %c0_i32_51 : i32 to vector<64x1xi32>
    %224 = arith.cmpi sge, %106, %223 : vector<64x1xi32>
    %c16_i32_52 = arith.constant 16 : i32
    %225 = vector.broadcast %c16_i32_52 : i32 to vector<64x1xi32>
    %226 = arith.cmpi slt, %106, %225 : vector<64x1xi32>
    %227 = arith.andi %224, %226 : vector<64x1xi1>
    %c0_i32_53 = arith.constant 0 : i32
    %228 = vector.broadcast %c0_i32_53 : i32 to vector<64x1xi32>
    %229 = arith.cmpi sge, %108, %228 : vector<64x1xi32>
    %230 = arith.andi %227, %229 : vector<64x1xi1>
    %c16_i32_54 = arith.constant 16 : i32
    %231 = vector.broadcast %c16_i32_54 : i32 to vector<64x1xi32>
    %232 = arith.cmpi slt, %108, %231 : vector<64x1xi32>
    %233 = arith.andi %230, %232 : vector<64x1xi1>
    %234 = arith.andi %233, %67 : vector<64x1xi1>
    %c0_i32_55 = arith.constant 0 : i32
    %c15_i32_56 = arith.constant 15 : i32
    %235 = vector.broadcast %c0_i32_55 : i32 to vector<64x1xi32>
    %236 = arith.maxsi %235, %106 : vector<64x1xi32>
    %237 = vector.broadcast %c15_i32_56 : i32 to vector<64x1xi32>
    %238 = arith.minsi %237, %236 : vector<64x1xi32>
    %c0_i32_57 = arith.constant 0 : i32
    %c15_i32_58 = arith.constant 15 : i32
    %239 = vector.broadcast %c0_i32_57 : i32 to vector<64x1xi32>
    %240 = arith.maxsi %239, %108 : vector<64x1xi32>
    %241 = vector.broadcast %c15_i32_58 : i32 to vector<64x1xi32>
    %242 = arith.minsi %241, %240 : vector<64x1xi32>
    %c16_i32_59 = arith.constant 16 : i32
    %243 = vector.broadcast %c16_i32_59 : i32 to vector<64x1xi32>
    %244 = arith.muli %242, %243 : vector<64x1xi32>
    %245 = arith.addi %116, %244 : vector<64x1xi32>
    %246 = arith.addi %245, %238 : vector<64x1xi32>
    %cst_60 = arith.constant 0.000000e+00 : f32
    %247 = vector.broadcast %cst_60 : f32 to vector<64x1xf32>
    %248 = arith.select %234, %222, %247 : vector<64x1xi1>, vector<64x1xf32>
    %249 = vector.broadcast %117 : vector<1x512xi32> to vector<64x512xi32>
    %250 = vector.broadcast %246 : vector<64x1xi32> to vector<64x512xi32>
    %251 = arith.cmpi eq, %249, %250 : vector<64x512xi32>
    %cst_61 = arith.constant 0.000000e+00 : f32
    %252 = vector.shape_cast %248 : vector<64x1xf32> to vector<64x1xf32>
    %253 = vector.broadcast %252 : vector<64x1xf32> to vector<64x512xf32>
    %254 = vector.broadcast %cst_61 : f32 to vector<64x512xf32>
    %255 = arith.select %251, %253, %254 : vector<64x512xi1>, vector<64x512xf32>
    %256 = arith.addf %221, %255 : vector<64x512xf32>
    %c0_62 = arith.constant 0 : index
    %c0_63 = arith.constant 0 : index
    %257 = vector.load %arg2[%c0_62, %c0_63] : memref<512x32xf32, #tpu.memory_space<vmem>>, vector<512x32xf32>
    %cst_64 = arith.constant dense<0.000000e+00> : vector<64x32xf32>
    %258 = tpu.matmul %256, %257, %cst_64 {dimension_numbers = #tpu.dot_dimension_numbers<[1], [0], [0], [1], [0, 0, 1, 1], [], []>} : vector<64x512xf32>, vector<512x32xf32>, vector<64x32xf32> -> vector<64x32xf32>
    %c0_65 = arith.constant 0 : index
    %c0_66 = arith.constant 0 : index
    %259 = vector.load %arg3[%c0_65, %c0_66] : memref<64x32xf32, #tpu.memory_space<vmem>>, vector<64x32xf32>
    tpu.vector_store %arg3[%c0_65, %c0_66], %258 {strides = array<i32>} : memref<64x32xf32, #tpu.memory_space<vmem>>, vector<64x32xf32>,
    %cst_67 = arith.constant 0.000000e+00 : f32
    %260 = vector.broadcast %cst_67 : f32 to vector<64x1xf32>
    %261 = arith.subf %260, %24 : vector<64x1xf32>
    %cst_68 = arith.constant 0.000000e+00 : f32
    %262 = vector.broadcast %cst_68 : f32 to vector<64x1xf32>
    %263 = arith.subf %262, %34 : vector<64x1xf32>
    %264 = tpu.concatenate %14, %261, %263 in 1 : vector<64x1xf32>, vector<64x1xf32>, vector<64x1xf32> -> vector<64x3xf32>
    %c0_69 = arith.constant 0 : index
    %c0_70 = arith.constant 0 : index
    %265 = vector.load %arg4[%c0_69, %c0_70] : memref<64x3xf32, #tpu.memory_space<vmem>>, vector<64x3xf32>
    tpu.vector_store %arg4[%c0_69, %c0_70], %264 {strides = array<i32>} : memref<64x3xf32, #tpu.memory_space<vmem>>, vector<64x3xf32>,
    return
  }
}

</mosaic_0001>

<bundles_post_ra>
// kernel: tpu_custom_call.1
= control target key start
LH: loop header
LB: loop body
LE: loop exit
PB: predicated region body
PF: predicated region fallthrough
CT: control target
= control target key end

     0   :  { %s2697_s27 = smov 127   ;;  %s2698_s22 = smov 126   ;;  %s5699_s0 = inlined_call_operand.vmem [shape: f32[64,3], index: 0, kind: input, shape index: {}]   ;;  %s5700_s1 = inlined_call_operand.vmem [shape: f32[64,25], index: 1, kind: input, shape index: {}]   ;;  %s5701_s2 = inlined_call_operand.vmem [shape: f32[512,32], index: 2, kind: input, shape index: {}]   ;;  %s5702_s3 = inlined_call_operand.vmem [shape: f32[64,32], index: 3, kind: output, shape index: {0}]   ;;  %s5703_s4 = inlined_call_operand.vmem [shape: f32[64,3], index: 4, kind: output, shape index: {1}]  }
   0x1   :  { %v2743_v0 = vld [vmem:[%s5699_s0 + $0x20] sm:$0xff]  ;;  %v2753_v2 = vld [vmem:[%s5699_s0 + $0x10] sm:$0xff]  ;;  %v2787_v9 = vld [vmem:[%s5699_s0 + $0x28] sm:$0xff]  ;;  %s2700_s23 = smov 125   ;;  %s2701_s24 = smov 118  }
   0x2   :  { %v2748_v1 = vld [vmem:[%s5700_s1 + $0x20] sm:$0xff]  ;;  %v2762_v4 = vld [vmem:[%s5700_s1 + $0x10] sm:$0xff]  ;;  %v2796_v10 = vld [vmem:[%s5700_s1 + $0x28] sm:$0xff]  ;;  %s2702_s25 = smov 122   ;;  %s2703_s26 = smov 117  }
   0x3   :  { %v2757_v3 = vmul.f32 %v2748_v1, %v2743_v0  ;;  %v2767_v5 = vld [vmem:[%s5699_s0] sm:$0xff]  ;;  %v2776_v7 = vmul.f32 %v2762_v4, %v2753_v2  ;;  %v2801_v11 = vld [vmem:[%s5699_s0 + $0x18] sm:$0xff]  ;;  %v2811_v13 = vld [vmem:[%s5699_s0 + $0x8] sm:$0xff]  ;;  %v2820_v15 = vmul.f32 %v2796_v10, %v2787_v9  ;;  %s2704_s28 = smov 116   ;;  %s2705_s29 = smov 107  }
   0x4   :  { %v2772_v6 = vld [vmem:[%s5700_s1] sm:$0xff]  ;;  %v2806_v12 = vld [vmem:[%s5700_s1 + $0x18] sm:$0xff]  ;;  %v2816_v14 = vld [vmem:[%s5700_s1 + $0x8] sm:$0xff]  ;;  %s2706_s30 = smov 113   ;;  %s2707_s5 = smov 106  }
   0x5   :  { %5801 = vst [vmem:[#allocation2_spill] sm:$0xff] %v2757_v3  ;;  %v2780_v8 = vmul.f32 %v2772_v6, %v2767_v5  ;;  %56 = vrot.lane.b32.xlu2 %v2757_v3, %s2697_s27  ;;  %52 = vrot.lane.b32.xlu1 %v2776_v7, %s2697_s27  ;;  %v2824_v16 = vmul.f32 %v2806_v12, %v2801_v11  ;;  %v2839_v18 = vld [vmem:[%s5699_s0 + $0x38] sm:$0xff]  ;;  %v2849_v20 = vld [vmem:[%s5699_s0 + $0x30] sm:$0xff]  ;;  %s2699_s0 = smov 119   ;;  %s2708_s6 = smov 110  }
   0x6   :  { %5802 = vst [vmem:[#allocation3_spill] sm:$0xff] %v2776_v7  ;;  %v2828_v17 = vmul.f32 %v2816_v14, %v2811_v13  ;;  %v2844_v19 = vld [vmem:[%s5700_s1 + $0x38] sm:$0xff]  ;;  %v2854_v21 = vld [vmem:[%s5700_s1 + $0x30] sm:$0xff]  ;;  %s2709_s7 = smov 105   ;;  %s2713_s12 = smov 1  }
   0x7   :  { %5803 = vst [vmem:[#allocation4_spill] sm:$0xff] %v2780_v8  ;;  %48 = vrot.lane.b32.xlu0 %v2780_v8, %s2697_s27  ;;  %v2858_v22 = vmul.f32 %v2844_v19, %v2839_v18  ;;  %v2862_v23 = vmul.f32 %v2854_v21, %v2849_v20 }
   0x8   :  { %5804 = vst [vmem:[#allocation5_spill] sm:$0xff] %v2820_v15 }
   0x9   :  { %5805 = vst [vmem:[#allocation6_spill] sm:$0xff] %v2824_v16 }
   0xa   :  { %5806 = vst [vmem:[#allocation7_spill] sm:$0xff] %v2828_v17 }
   0xb   :  { %5807 = vst [vmem:[#allocation8_spill] sm:$0xff] %v2858_v22 }
   0xc   :  { %5808 = vst [vmem:[#allocation9_spill] sm:$0xff] %v2862_v23 }
   0xd   :  { %58 = vrot.lane.b32.xlu2 %v2820_v15, %s2697_s27  ;;  %54 = vrot.lane.b32.xlu1 %v2824_v16, %s2697_s27 }
   0xf   :  { %50 = vrot.lane.b32.xlu0 %v2828_v17, %s2697_s27 }
  0x15   :  { %80 = vrot.lane.b32.xlu2 %v2780_v8, %s2698_s22  ;;  %62 = vrot.lane.b32.xlu1 %v2858_v22, %s2697_s27 }
  0x17   :  { %60 = vrot.lane.b32.xlu0 %v2862_v23, %s2697_s27 }
  0x1d   :  { %86 = vrot.lane.b32.xlu2 %v2824_v16, %s2698_s22  ;;  %84 = vrot.lane.b32.xlu1 %v2776_v7, %s2698_s22 }
  0x1f   :  { %82 = vrot.lane.b32.xlu0 %v2828_v17, %s2698_s22 }
  0x25   :  { %92 = vrot.lane.b32.xlu2 %v2862_v23, %s2698_s22  ;;  %90 = vrot.lane.b32.xlu1 %v2820_v15, %s2698_s22 }
  0x27   :  { %88 = vrot.lane.b32.xlu0 %v2757_v3, %s2698_s22 }
  0x2d   :  { %122 = vrot.lane.b32.xlu2 %v2816_v14, %s2699_s0  ;;  %120 = vrot.lane.b32.xlu1 %v2772_v6, %s2699_s0 }
  0x2f   :  { %94 = vrot.lane.b32.xlu0 %v2858_v22, %s2698_s22 }
  0x35   :  { %128 = vrot.lane.b32.xlu2 %v2748_v1, %s2699_s0  ;;  %126 = vrot.lane.b32.xlu1 %v2806_v12, %s2699_s0 }
  0x37   :  { %124 = vrot.lane.b32.xlu0 %v2762_v4, %s2699_s0 }
  0x3d   :  { %134 = vrot.lane.b32.xlu2 %v2844_v19, %s2699_s0  ;;  %132 = vrot.lane.b32.xlu1 %v2854_v21, %s2699_s0 }
  0x3f   :  { %130 = vrot.lane.b32.xlu0 %v2796_v10, %s2699_s0 }
  0x45   :  { %156 = vrot.lane.b32.xlu2 %v2762_v4, %s2700_s23  ;;  %154 = vrot.lane.b32.xlu1 %v2816_v14, %s2700_s23 }
  0x47   :  { %152 = vrot.lane.b32.xlu0 %v2772_v6, %s2700_s23 }
  0x4d   :  { %162 = vrot.lane.b32.xlu2 %v2796_v10, %s2700_s23  ;;  %160 = vrot.lane.b32.xlu1 %v2748_v1, %s2700_s23 }
  0x4f   :  { %158 = vrot.lane.b32.xlu0 %v2806_v12, %s2700_s23 }
  0x55   :  { %166 = vrot.lane.b32.xlu1 %v2844_v19, %s2700_s23 }
  0x57   :  { %164 = vrot.lane.b32.xlu0 %v2854_v21, %s2700_s23 }
  0x5f   :  { %v2900_v24 = vpop.permute.xlu2 %56 }
  0x60   :  { %5809 = vst [vmem:[#allocation10_spill] sm:$0xff] %v2900_v24 }
  0x67   :  { %v2902_v25 = vpop.permute.xlu2 %58 }
  0x68   :  { %5810 = vst [vmem:[#allocation11_spill] sm:$0xff] %v2902_v25 }
  0x6f   :  { %v2904_v26 = vpop.permute.xlu2 %80 }
  0x70   :  { %5811 = vst [vmem:[#allocation12_spill] sm:$0xff] %v2904_v26 }
  0x77   :  { %v2906_v27 = vpop.permute.xlu2 %86  ;;  %v2908_v28 = vpop.permute.xlu1 %52 }
  0x78   :  { %5812 = vst [vmem:[#allocation13_spill] sm:$0xff] %v2906_v27 }
  0x79   :  { %5813 = vst [vmem:[#allocation14_spill] sm:$0xff] %v2908_v28  ;;  %v2910_v29 = vpop.permute.xlu0 %48 }
  0x7a   :  { %5814 = vst [vmem:[#allocation15_spill] sm:$0xff] %v2910_v29 }
  0x7f   :  { %v2912_v30 = vpop.permute.xlu2 %92  ;;  %v2914_v31 = vpop.permute.xlu1 %54 }
  0x80   :  { %5815 = vst [vmem:[#allocation16_spill] sm:$0xff] %v2912_v30 }
  0x81   :  { %5816 = vst [vmem:[#allocation17_spill] sm:$0xff] %v2914_v31  ;;  %v2916_v32 = vpop.permute.xlu0 %50 }
  0x82   :  { %5817 = vst [vmem:[#allocation18_spill] sm:$0xff] %v2916_v32 }
  0x87   :  { %v2918_v33 = vpop.permute.xlu2 %122  ;;  %v2920_v34 = vpop.permute.xlu1 %62 }
  0x88   :  { %5818 = vst [vmem:[#allocation19_spill] sm:$0xff] %v2918_v33 }
  0x89   :  { %5819 = vst [vmem:[#allocation20_spill] sm:$0xff] %v2920_v34  ;;  %v2922_v35 = vpop.permute.xlu0 %60 }
  0x8a   :  { %5820 = vst [vmem:[#allocation21_spill] sm:$0xff] %v2922_v35 }
  0x8f   :  { %v2924_v36 = vpop.permute.xlu2 %128  ;;  %v2926_v37 = vpop.permute.xlu1 %84 }
  0x90   :  { %5821 = vst [vmem:[#allocation22_spill] sm:$0xff] %v2924_v36 }
  0x91   :  { %5822 = vst [vmem:[#allocation23_spill] sm:$0xff] %v2926_v37  ;;  %v2928_v38 = vpop.permute.xlu0 %82 }
  0x92   :  { %5823 = vst [vmem:[#allocation24_spill] sm:$0xff] %v2928_v38 }
  0x97   :  { %v2930_v39 = vpop.permute.xlu2 %134  ;;  %v2932_v40 = vpop.permute.xlu1 %90 }
  0x98   :  { %5824 = vst [vmem:[#allocation25_spill] sm:$0xff] %v2930_v39 }
  0x99   :  { %5825 = vst [vmem:[#allocation26_spill] sm:$0xff] %v2932_v40  ;;  %v2934_v41 = vpop.permute.xlu0 %88 }
  0x9a   :  { %5826 = vst [vmem:[#allocation27_spill] sm:$0xff] %v2934_v41 }
  0x9f   :  { %v157_v42 = vpop.permute.xlu2 %156  ;;  %v2936_v43 = vpop.permute.xlu1 %120 }
  0xa0   :  { %5827 = vst [vmem:[#allocation28_spill] sm:$0xff] %v2936_v43  ;;  %v2939_v44 = vmul.f32 %v157_v42, %v2753_v2 }
  0xa1   :  { %v2941_v45 = vpop.permute.xlu0 %94 }
  0xa2   :  { %5828 = vst [vmem:[#allocation29_spill] sm:$0xff] %v2939_v44  ;;  %196 = vrot.lane.b32.xlu1 %v2939_v44, %s2697_s27 }
  0xa3   :  { %5829 = vst [vmem:[#allocation30_spill] sm:$0xff] %v2941_v45 }
  0xa7   :  { %v163_v46 = vpop.permute.xlu2 %162  ;;  %v2945_v47 = vpop.permute.xlu1 %126 }
  0xa8   :  { %5830 = vst [vmem:[#allocation31_spill] sm:$0xff] %v2945_v47  ;;  %v2948_v48 = vmul.f32 %v163_v46, %v2787_v9 }
  0xa9   :  { %v2950_v49 = vpop.permute.xlu0 %124 }
  0xaa   :  { %5831 = vst [vmem:[#allocation32_spill] sm:$0xff] %v2948_v48  ;;  %202 = vrot.lane.b32.xlu1 %v2948_v48, %s2697_s27 }
  0xab   :  { %5832 = vst [vmem:[#allocation33_spill] sm:$0xff] %v2950_v49 }
  0xaf   :  { %v2954_v50 = vpop.permute.xlu1 %132 }
  0xb0   :  { %5833 = vst [vmem:[#allocation34_spill] sm:$0xff] %v2954_v50 }
  0xb1   :  { %v2956_v51 = vpop.permute.xlu0 %130 }
  0xb2   :  { %5834 = vst [vmem:[#allocation35_spill] sm:$0xff] %v2956_v51 }
  0xb7   :  { %v155_v52 = vpop.permute.xlu1 %154 }
  0xb8   :  { %v2959_v54 = vmul.f32 %v155_v52, %v2811_v13 }
  0xb9   :  { %v153_v53 = vpop.permute.xlu0 %152 }
  0xba   :  { %5835 = vst [vmem:[#allocation36_spill] sm:$0xff] %v2959_v54  ;;  %v2962_v55 = vmul.f32 %v153_v53, %v2767_v5  ;;  %194 = vrot.lane.b32.xlu0 %v2959_v54, %s2697_s27 }
  0xbc   :  { %5836 = vst [vmem:[#allocation37_spill] sm:$0xff] %v2962_v55  ;;  %224 = vrot.lane.b32.xlu1 %v2962_v55, %s2698_s22  ;;  %192 = vrot.lane.b32.xlu2 %v2962_v55, %s2697_s27 }
  0xbf   :  { %v161_v56 = vpop.permute.xlu1 %160 }
  0xc0   :  { %v2971_v58 = vmul.f32 %v161_v56, %v2743_v0 }
  0xc1   :  { %v159_v57 = vpop.permute.xlu0 %158 }
  0xc2   :  { %5837 = vst [vmem:[#allocation38_spill] sm:$0xff] %v2971_v58  ;;  %v2974_v59 = vmul.f32 %v159_v57, %v2801_v11  ;;  %200 = vrot.lane.b32.xlu0 %v2971_v58, %s2697_s27 }
  0xc4   :  { %5838 = vst [vmem:[#allocation39_spill] sm:$0xff] %v2974_v59  ;;  %230 = vrot.lane.b32.xlu1 %v2974_v59, %s2698_s22  ;;  %198 = vrot.lane.b32.xlu2 %v2974_v59, %s2697_s27 }
  0xc7   :  { %v167_v60 = vpop.permute.xlu1 %166 }
  0xc8   :  { %v2983_v62 = vmul.f32 %v167_v60, %v2839_v18 }
  0xc9   :  { %v165_v61 = vpop.permute.xlu0 %164 }
  0xca   :  { %5839 = vst [vmem:[#allocation40_spill] sm:$0xff] %v2983_v62  ;;  %v2986_v63 = vmul.f32 %v165_v61, %v2849_v20  ;;  %206 = vrot.lane.b32.xlu0 %v2983_v62, %s2697_s27 }
  0xcc   :  { %5840 = vst [vmem:[#allocation41_spill] sm:$0xff] %v2986_v63  ;;  %236 = vrot.lane.b32.xlu1 %v2986_v63, %s2698_s22  ;;  %204 = vrot.lane.b32.xlu2 %v2986_v63, %s2697_s27 }
  0xd2   :  { %228 = vrot.lane.b32.xlu0 %v2939_v44, %s2698_s22 }
  0xd4   :  { %258 = vrot.lane.b32.xlu1 %v2816_v14, %s2701_s24  ;;  %226 = vrot.lane.b32.xlu2 %v2959_v54, %s2698_s22 }
  0xda   :  { %234 = vrot.lane.b32.xlu0 %v2948_v48, %s2698_s22 }
  0xdc   :  { %264 = vrot.lane.b32.xlu1 %v2748_v1, %s2701_s24  ;;  %232 = vrot.lane.b32.xlu2 %v2971_v58, %s2698_s22 }
  0xe2   :  { %256 = vrot.lane.b32.xlu0 %v2772_v6, %s2701_s24 }
  0xe4   :  { %270 = vrot.lane.b32.xlu1 %v2844_v19, %s2701_s24  ;;  %238 = vrot.lane.b32.xlu2 %v2983_v62, %s2698_s22 }
  0xea   :  { %262 = vrot.lane.b32.xlu0 %v2806_v12, %s2701_s24 }
  0xec   :  { %292 = vrot.lane.b32.xlu1 %v2762_v4, %s2702_s25  ;;  %260 = vrot.lane.b32.xlu2 %v2762_v4, %s2701_s24 }
  0xf2   :  { %268 = vrot.lane.b32.xlu0 %v2854_v21, %s2701_s24 }
  0xf4   :  { %298 = vrot.lane.b32.xlu1 %v2796_v10, %s2702_s25  ;;  %266 = vrot.lane.b32.xlu2 %v2796_v10, %s2701_s24 }
  0xfa   :  { %290 = vrot.lane.b32.xlu0 %v2816_v14, %s2702_s25 }
  0xfc   :  { %288 = vrot.lane.b32.xlu2 %v2772_v6, %s2702_s25 }
 0x102   :  { %296 = vrot.lane.b32.xlu0 %v2748_v1, %s2702_s25 }
 0x104   :  { %294 = vrot.lane.b32.xlu2 %v2806_v12, %s2702_s25 }
 0x10a   :  { %302 = vrot.lane.b32.xlu0 %v2844_v19, %s2702_s25 }
 0x10c   :  { %300 = vrot.lane.b32.xlu2 %v2854_v21, %s2702_s25 }
 0x114   :  { %v3022_v46 = vpop.permute.xlu1 %196 }
 0x115   :  { %5842 = vst [vmem:[#allocation43_spill] sm:$0xff] %v3022_v46 }
 0x116   :  { %v3020_v42 = vpop.permute.xlu2 %192 }
 0x117   :  { %5841 = vst [vmem:[#allocation42_spill] sm:$0xff] %v3020_v42 }
 0x11c   :  { %v3026_v53 = vpop.permute.xlu1 %202 }
 0x11d   :  { %5844 = vst [vmem:[#allocation45_spill] sm:$0xff] %v3026_v53 }
 0x11e   :  { %v3024_v52 = vpop.permute.xlu2 %198 }
 0x11f   :  { %5843 = vst [vmem:[#allocation44_spill] sm:$0xff] %v3024_v52 }
 0x126   :  { %v3028_v56 = vpop.permute.xlu2 %204 }
 0x127   :  { %5845 = vst [vmem:[#allocation46_spill] sm:$0xff] %v3028_v56 }
 0x12c   :  { %v3032_v60 = vpop.permute.xlu0 %194 }
 0x12d   :  { %5847 = vst [vmem:[#allocation48_spill] sm:$0xff] %v3032_v60 }
 0x12e   :  { %v3030_v57 = vpop.permute.xlu1 %224  ;;  %v3034_v61 = vpop.permute.xlu2 %226 }
 0x12f   :  { %5846 = vst [vmem:[#allocation47_spill] sm:$0xff] %v3030_v57 }
 0x130   :  { %5848 = vst [vmem:[#allocation49_spill] sm:$0xff] %v3034_v61 }
 0x134   :  { %v3038_v40 = vpop.permute.xlu0 %200 }
 0x135   :  { %5850 = vst [vmem:[#allocation51_spill] sm:$0xff] %v3038_v40 }
 0x136   :  { %v3036_v51 = vpop.permute.xlu1 %230  ;;  %v3040_v25 = vpop.permute.xlu2 %232 }
 0x137   :  { %5849 = vst [vmem:[#allocation50_spill] sm:$0xff] %v3036_v51 }
 0x138   :  { %5851 = vst [vmem:[#allocation52_spill] sm:$0xff] %v3040_v25 }
 0x13c   :  { %v3044_v49 = vpop.permute.xlu0 %206 }
 0x13d   :  { %5853 = vst [vmem:[#allocation54_spill] sm:$0xff] %v3044_v49 }
 0x13e   :  { %v3042_v15 = vpop.permute.xlu1 %236  ;;  %v3046_v37 = vpop.permute.xlu2 %238 }
 0x13f   :  { %5852 = vst [vmem:[#allocation53_spill] sm:$0xff] %v3042_v15 }
 0x140   :  { %5854 = vst [vmem:[#allocation55_spill] sm:$0xff] %v3046_v37 }
 0x144   :  { %v3050_v7 = vpop.permute.xlu0 %228 }
 0x145   :  { %5856 = vst [vmem:[#allocation57_spill] sm:$0xff] %v3050_v7 }
 0x146   :  { %v3048_v28 = vpop.permute.xlu1 %258  ;;  %v3052_v50 = vpop.permute.xlu2 %260 }
 0x147   :  { %5855 = vst [vmem:[#allocation56_spill] sm:$0xff] %v3048_v28 }
 0x148   :  { %5857 = vst [vmem:[#allocation58_spill] sm:$0xff] %v3052_v50 }
 0x14c   :  { %v3056_v30 = vpop.permute.xlu0 %234 }
 0x14d   :  { %5859 = vst [vmem:[#allocation60_spill] sm:$0xff] %v3056_v30 }
 0x14e   :  { %v3054_v39 = vpop.permute.xlu1 %264  ;;  %v3058_v45 = vpop.permute.xlu2 %266 }
 0x14f   :  { %5858 = vst [vmem:[#allocation59_spill] sm:$0xff] %v3054_v39 }
 0x150   :  { %5860 = vst [vmem:[#allocation61_spill] sm:$0xff] %v3058_v45 }
 0x154   :  { %v3062_v23 = vpop.permute.xlu0 %256 }
 0x155   :  { %5862 = vst [vmem:[#allocation63_spill] sm:$0xff] %v3062_v23 }
 0x156   :  { %v3060_v35 = vpop.permute.xlu1 %270  ;;  %v289_v34 = vpop.permute.xlu2 %288 }
 0x157   :  { %5861 = vst [vmem:[#allocation62_spill] sm:$0xff] %v3060_v35  ;;  %v3065_v22 = vmul.f32 %v289_v34, %v2767_v5 }
 0x159   :  { %5863 = vst [vmem:[#allocation64_spill] sm:$0xff] %v3065_v22  ;;  %328 = vrot.lane.b32.xlu1 %v3065_v22, %s2697_s27 }
 0x15c   :  { %v3069_v36 = vpop.permute.xlu0 %262 }
 0x15d   :  { %5864 = vst [vmem:[#allocation65_spill] sm:$0xff] %v3069_v36 }
 0x15e   :  { %v293_v47 = vpop.permute.xlu1 %292  ;;  %v295_v41 = vpop.permute.xlu2 %294 }
 0x15f   :  { %v3072_v27 = vmul.f32 %v293_v47, %v2753_v2  ;;  %v3075_v31 = vmul.f32 %v295_v41, %v2801_v11 }
 0x161   :  { %5865 = vst [vmem:[#allocation66_spill] sm:$0xff] %v3072_v27  ;;  %332 = vrot.lane.b32.xlu0 %v3072_v27, %s2697_s27  ;;  %334 = vrot.lane.b32.xlu1 %v3075_v31, %s2697_s27 }
 0x162   :  { %5866 = vst [vmem:[#allocation67_spill] sm:$0xff] %v3075_v31 }
 0x164   :  { %v3081_v16 = vpop.permute.xlu0 %268 }
 0x165   :  { %5867 = vst [vmem:[#allocation68_spill] sm:$0xff] %v3081_v16 }
 0x166   :  { %v299_v34 = vpop.permute.xlu1 %298  ;;  %v301_v3 = vpop.permute.xlu2 %300 }
 0x167   :  { %v3084_v24 = vmul.f32 %v299_v34, %v2787_v9  ;;  %v3087_v47 = vmul.f32 %v301_v3, %v2849_v20 }
 0x169   :  { %5868 = vst [vmem:[#allocation69_spill] sm:$0xff] %v3084_v24  ;;  %338 = vrot.lane.b32.xlu0 %v3084_v24, %s2697_s27  ;;  %340 = vrot.lane.b32.xlu1 %v3087_v47, %s2697_s27 }
 0x16a   :  { %5869 = vst [vmem:[#allocation70_spill] sm:$0xff] %v3087_v47 }
 0x16c   :  { %v291_v41 = vpop.permute.xlu0 %290 }
 0x16d   :  { %v3094_v43 = vmul.f32 %v291_v41, %v2811_v13 }
 0x16f   :  { %5870 = vst [vmem:[#allocation71_spill] sm:$0xff] %v3094_v43  ;;  %330 = vrot.lane.b32.xlu2 %v3094_v43, %s2697_s27 }
 0x171   :  { %360 = vrot.lane.b32.xlu0 %v3065_v22, %s2698_s22  ;;  %362 = vrot.lane.b32.xlu1 %v3094_v43, %s2698_s22 }
 0x174   :  { %v297_v3 = vpop.permute.xlu0 %296 }
 0x175   :  { %v3103_v34 = vmul.f32 %v297_v3, %v2743_v0 }
 0x177   :  { %5871 = vst [vmem:[#allocation72_spill] sm:$0xff] %v3103_v34  ;;  %336 = vrot.lane.b32.xlu2 %v3103_v34, %s2697_s27 }
 0x179   :  { %366 = vrot.lane.b32.xlu0 %v3075_v31, %s2698_s22  ;;  %368 = vrot.lane.b32.xlu1 %v3103_v34, %s2698_s22 }
 0x17c   :  { %v303_v41 = vpop.permute.xlu0 %302 }
 0x17d   :  { %v3112_v33 = vmul.f32 %v303_v41, %v2839_v18 }
 0x17f   :  { %5872 = vst [vmem:[#allocation73_spill] sm:$0xff] %v3112_v33  ;;  %342 = vrot.lane.b32.xlu2 %v3112_v33, %s2697_s27 }
 0x181   :  { %372 = vrot.lane.b32.xlu0 %v3087_v47, %s2698_s22  ;;  %374 = vrot.lane.b32.xlu1 %v3112_v33, %s2698_s22 }
 0x187   :  { %364 = vrot.lane.b32.xlu2 %v3072_v27, %s2698_s22 }
 0x189   :  { %394 = vrot.lane.b32.xlu0 %v2816_v14, %s2703_s26  ;;  %396 = vrot.lane.b32.xlu1 %v2762_v4, %s2703_s26 }
 0x18f   :  { %370 = vrot.lane.b32.xlu2 %v3084_v24, %s2698_s22 }
 0x191   :  { %400 = vrot.lane.b32.xlu0 %v2748_v1, %s2703_s26  ;;  %402 = vrot.lane.b32.xlu1 %v2796_v10, %s2703_s26 }
 0x197   :  { %392 = vrot.lane.b32.xlu2 %v2772_v6, %s2703_s26 }
 0x199   :  { %406 = vrot.lane.b32.xlu0 %v2844_v19, %s2703_s26  ;;  %424 = vrot.lane.b32.xlu1 %v2772_v6, %s2704_s28 }
 0x19f   :  { %398 = vrot.lane.b32.xlu2 %v2806_v12, %s2703_s26 }
 0x1a1   :  { %428 = vrot.lane.b32.xlu0 %v2762_v4, %s2704_s28  ;;  %430 = vrot.lane.b32.xlu1 %v2806_v12, %s2704_s28 }
 0x1a7   :  { %404 = vrot.lane.b32.xlu2 %v2854_v21, %s2703_s26 }
 0x1a9   :  { %434 = vrot.lane.b32.xlu0 %v2796_v10, %s2704_s28  ;;  %436 = vrot.lane.b32.xlu1 %v2854_v21, %s2704_s28 }
 0x1af   :  { %426 = vrot.lane.b32.xlu2 %v2816_v14, %s2704_s28 }
 0x1b7   :  { %432 = vrot.lane.b32.xlu2 %v2748_v1, %s2704_s28 }
 0x1bf   :  { %438 = vrot.lane.b32.xlu2 %v2844_v19, %s2704_s28 }
 0x1c9   :  { %v3140_v3 = vpop.permute.xlu2 %330 }
 0x1ca   :  { %5873 = vst [vmem:[#allocation74_spill] sm:$0xff] %v3140_v3 }
 0x1cb   :  { %v3142_v41 = vpop.permute.xlu1 %328 }
 0x1cc   :  { %5874 = vst [vmem:[#allocation75_spill] sm:$0xff] %v3142_v41 }
 0x1d1   :  { %v3144_v26 = vpop.permute.xlu2 %336 }
 0x1d2   :  { %5875 = vst [vmem:[#allocation76_spill] sm:$0xff] %v3144_v26 }
 0x1d3   :  { %v3146_v38 = vpop.permute.xlu0 %332  ;;  %v3148_v32 = vpop.permute.xlu1 %334 }
 0x1d4   :  { %5876 = vst [vmem:[#allocation77_spill] sm:$0xff] %v3146_v38 }
 0x1d5   :  { %5877 = vst [vmem:[#allocation78_spill] sm:$0xff] %v3148_v32 }
 0x1d9   :  { %v3150_v17 = vpop.permute.xlu2 %342 }
 0x1da   :  { %5878 = vst [vmem:[#allocation79_spill] sm:$0xff] %v3150_v17 }
 0x1db   :  { %v3152_v29 = vpop.permute.xlu0 %338  ;;  %v3154_v8 = vpop.permute.xlu1 %340 }
 0x1dc   :  { %5879 = vst [vmem:[#allocation80_spill] sm:$0xff] %v3152_v29 }
 0x1dd   :  { %5880 = vst [vmem:[#allocation81_spill] sm:$0xff] %v3154_v8 }
 0x1e1   :  { %v3156_v47 = vpop.permute.xlu2 %364 }
 0x1e2   :  { %5881 = vst [vmem:[#allocation82_spill] sm:$0xff] %v3156_v47 }
 0x1e3   :  { %v3158_v24 = vpop.permute.xlu0 %360  ;;  %v3160_v31 = vpop.permute.xlu1 %362 }
 0x1e4   :  { %5882 = vst [vmem:[#allocation83_spill] sm:$0xff] %v3158_v24 }
 0x1e5   :  { %5883 = vst [vmem:[#allocation84_spill] sm:$0xff] %v3160_v31 }
 0x1e9   :  { %v3162_v45 = vpop.permute.xlu2 %370 }
 0x1ea   :  { %5884 = vst [vmem:[#allocation85_spill] sm:$0xff] %v3162_v45 }
 0x1eb   :  { %v3164_v35 = vpop.permute.xlu0 %366  ;;  %v3166_v27 = vpop.permute.xlu1 %368 }
 0x1ec   :  { %5885 = vst [vmem:[#allocation86_spill] sm:$0xff] %v3164_v35 }
 0x1ed   :  { %5886 = vst [vmem:[#allocation87_spill] sm:$0xff] %v3166_v27 }
 0x1f1   :  { %v3168_v38 = vpop.permute.xlu2 %392 }
 0x1f2   :  { %5887 = vst [vmem:[#allocation88_spill] sm:$0xff] %v3168_v38 }
 0x1f3   :  { %v3170_v32 = vpop.permute.xlu0 %372  ;;  %v3172_v41 = vpop.permute.xlu1 %374 }
 0x1f4   :  { %5888 = vst [vmem:[#allocation89_spill] sm:$0xff] %v3170_v32 }
 0x1f5   :  { %5889 = vst [vmem:[#allocation90_spill] sm:$0xff] %v3172_v41 }
 0x1f9   :  { %v3174_v29 = vpop.permute.xlu2 %398 }
 0x1fa   :  { %5890 = vst [vmem:[#allocation91_spill] sm:$0xff] %v3174_v29 }
 0x1fb   :  { %v3176_v8 = vpop.permute.xlu0 %394  ;;  %v3178_v47 = vpop.permute.xlu1 %396 }
 0x1fc   :  { %5891 = vst [vmem:[#allocation92_spill] sm:$0xff] %v3176_v8 }
 0x1fd   :  { %5892 = vst [vmem:[#allocation93_spill] sm:$0xff] %v3178_v47 }
 0x201   :  { %v3180_v24 = vpop.permute.xlu2 %404 }
 0x202   :  { %5893 = vst [vmem:[#allocation94_spill] sm:$0xff] %v3180_v24 }
 0x203   :  { %v3182_v22 = vpop.permute.xlu0 %400  ;;  %v3184_v45 = vpop.permute.xlu1 %402 }
 0x204   :  { %5894 = vst [vmem:[#allocation95_spill] sm:$0xff] %v3182_v22 }
 0x205   :  { %5895 = vst [vmem:[#allocation96_spill] sm:$0xff] %v3184_v45 }
 0x209   :  { %v427_v35 = vpop.permute.xlu2 %426 }
 0x20a   :  { %v3189_v32 = vmul.f32 %v427_v35, %v2811_v13 }
 0x20b   :  { %v3186_v37 = vpop.permute.xlu0 %406  ;;  %v425_v38 = vpop.permute.xlu1 %424 }
 0x20c   :  { %5896 = vst [vmem:[#allocation97_spill] sm:$0xff] %v3186_v37  ;;  %v3192_v30 = vmul.f32 %v425_v38, %v2767_v5  ;;  %466 = vrot.lane.b32.xlu1 %v3189_v32, %s2697_s27 }
 0x20e   :  { %464 = vrot.lane.b32.xlu0 %v3192_v30, %s2697_s27 }
 0x211   :  { %v433_v24 = vpop.permute.xlu2 %432 }
 0x212   :  { %v3199_v45 = vmul.f32 %v433_v24, %v2743_v0 }
 0x213   :  { %v429_v29 = vpop.permute.xlu0 %428  ;;  %v431_v47 = vpop.permute.xlu1 %430 }
 0x214   :  { %v3202_v49 = vmul.f32 %v429_v29, %v2753_v2  ;;  %v3205_v35 = vmul.f32 %v431_v47, %v2801_v11  ;;  %472 = vrot.lane.b32.xlu1 %v3199_v45, %s2697_s27 }
 0x216   :  { %468 = vrot.lane.b32.xlu2 %v3202_v49, %s2697_s27  ;;  %470 = vrot.lane.b32.xlu0 %v3205_v35, %s2697_s27 }
 0x219   :  { %v439_v38 = vpop.permute.xlu2 %438 }
 0x21a   :  { %v3214_v24 = vmul.f32 %v439_v38, %v2839_v18 }
 0x21b   :  { %v435_v62 = vpop.permute.xlu0 %434  ;;  %v437_v53 = vpop.permute.xlu1 %436 }
 0x21c   :  { %v3217_v29 = vmul.f32 %v435_v62, %v2787_v9  ;;  %v3220_v47 = vmul.f32 %v437_v53, %v2849_v20  ;;  %478 = vrot.lane.b32.xlu1 %v3214_v24, %s2697_s27 }
 0x21e   :  { %474 = vrot.lane.b32.xlu2 %v3217_v29, %s2697_s27  ;;  %476 = vrot.lane.b32.xlu0 %v3220_v47, %s2697_s27 }
 0x224   :  { %500 = vrot.lane.b32.xlu1 %v3202_v49, %s2698_s22 }
 0x226   :  { %496 = vrot.lane.b32.xlu2 %v3192_v30, %s2698_s22  ;;  %498 = vrot.lane.b32.xlu0 %v3189_v32, %s2698_s22 }
 0x22c   :  { %506 = vrot.lane.b32.xlu1 %v3217_v29, %s2698_s22 }
 0x22e   :  { %502 = vrot.lane.b32.xlu2 %v3205_v35, %s2698_s22  ;;  %504 = vrot.lane.b32.xlu0 %v3199_v45, %s2698_s22 }
 0x234   :  { %528 = vrot.lane.b32.xlu1 %v2772_v6, %s2705_s29 }
 0x236   :  { %508 = vrot.lane.b32.xlu2 %v3220_v47, %s2698_s22  ;;  %510 = vrot.lane.b32.xlu0 %v3214_v24, %s2698_s22 }
 0x23c   :  { %534 = vrot.lane.b32.xlu1 %v2806_v12, %s2705_s29 }
 0x23e   :  { %530 = vrot.lane.b32.xlu2 %v2816_v14, %s2705_s29  ;;  %532 = vrot.lane.b32.xlu0 %v2762_v4, %s2705_s29 }
 0x244   :  { %540 = vrot.lane.b32.xlu1 %v2854_v21, %s2705_s29 }
 0x246   :  { %536 = vrot.lane.b32.xlu2 %v2748_v1, %s2705_s29  ;;  %538 = vrot.lane.b32.xlu0 %v2796_v10, %s2705_s29 }
 0x24c   :  { %562 = vrot.lane.b32.xlu1 %v2816_v14, %s2706_s30 }
 0x24e   :  { %542 = vrot.lane.b32.xlu2 %v2844_v19, %s2705_s29  ;;  %560 = vrot.lane.b32.xlu0 %v2772_v6, %s2706_s30 }
 0x254   :  { %568 = vrot.lane.b32.xlu1 %v2748_v1, %s2706_s30 }
 0x256   :  { %564 = vrot.lane.b32.xlu2 %v2762_v4, %s2706_s30  ;;  %566 = vrot.lane.b32.xlu0 %v2806_v12, %s2706_s30 }
 0x25c   :  { %574 = vrot.lane.b32.xlu1 %v2844_v19, %s2706_s30 }
 0x25e   :  { %570 = vrot.lane.b32.xlu2 %v2796_v10, %s2706_s30  ;;  %572 = vrot.lane.b32.xlu0 %v2854_v21, %s2706_s30 }
 0x270   :  { %v3260_v62 = vpop.permute.xlu2 %468 }
 0x278   :  { %v3262_v53 = vpop.permute.xlu2 %474 }
 0x27e   :  { %v3264_v38 = vpop.permute.xlu1 %466 }
 0x280   :  { %v3266_v48 = vpop.permute.xlu2 %496  ;;  %v3268_v39 = vpop.permute.xlu0 %464 }
 0x286   :  { %v3270_v25 = vpop.permute.xlu1 %472 }
 0x288   :  { %v3272_v50 = vpop.permute.xlu2 %502  ;;  %v3274_v40 = vpop.permute.xlu0 %470 }
 0x28e   :  { %v3276_v58 = vpop.permute.xlu1 %478 }
 0x290   :  { %v3278_v23 = vpop.permute.xlu2 %508  ;;  %v3280_v7 = vpop.permute.xlu0 %476 }
 0x296   :  { %v3282_v28 = vpop.permute.xlu1 %500 }
 0x298   :  { %v3284_v57 = vpop.permute.xlu2 %530  ;;  %v3286_v46 = vpop.permute.xlu0 %498 }
 0x29e   :  { %v3288_v44 = vpop.permute.xlu1 %506 }
 0x2a0   :  { %v3290_v61 = vpop.permute.xlu2 %536  ;;  %v3292_v42 = vpop.permute.xlu0 %504 }
 0x2a6   :  { %v3294_v55 = vpop.permute.xlu1 %528 }
 0x2a8   :  { %v3296_v60 = vpop.permute.xlu2 %542  ;;  %v3298_v54 = vpop.permute.xlu0 %510 }
 0x2ae   :  { %v3300_v37 = vpop.permute.xlu1 %534 }
 0x2b0   :  { %v565_v41 = vpop.permute.xlu2 %564  ;;  %v3305_v33 = vpop.permute.xlu0 %532 }
 0x2b1   :  { %v3303_v17 = vmul.f32 %v565_v41, %v2753_v2 }
 0x2b3   :  { %604 = vrot.lane.b32.xlu1 %v3303_v17, %s2697_s27 }
 0x2b6   :  { %v3309_v22 = vpop.permute.xlu1 %540 }
 0x2b8   :  { %v571_v27 = vpop.permute.xlu2 %570  ;;  %v3314_v34 = vpop.permute.xlu0 %538 }
 0x2b9   :  { %v3312_v26 = vmul.f32 %v571_v27, %v2787_v9 }
 0x2bb   :  { %5897 = vst [vmem:[#allocation98_spill] sm:$0xff] %v3312_v26  ;;  %610 = vrot.lane.b32.xlu1 %v3312_v26, %s2697_s27 }
 0x2be   :  { %v563_v8 = vpop.permute.xlu1 %562 }
 0x2bf   :  { %v3319_v41 = vmul.f32 %v563_v8, %v2811_v13 }
 0x2c0   :  { %v561_v31 = vpop.permute.xlu0 %560 }
 0x2c1   :  { %5898 = vst [vmem:[#allocation99_spill] sm:$0xff] %v3319_v41  ;;  %v3322_v3 = vmul.f32 %v561_v31, %v2767_v5  ;;  %602 = vrot.lane.b32.xlu0 %v3319_v41, %s2697_s27 }
 0x2c3   :  { %632 = vrot.lane.b32.xlu1 %v3322_v3, %s2698_s22  ;;  %600 = vrot.lane.b32.xlu2 %v3322_v3, %s2697_s27 }
 0x2c6   :  { %v569_v27 = vpop.permute.xlu1 %568 }
 0x2c7   :  { %v3331_v43 = vmul.f32 %v569_v27, %v2743_v0 }
 0x2c8   :  { %v567_v16 = vpop.permute.xlu0 %566 }
 0x2c9   :  { %5899 = vst [vmem:[#allocation100_spill] sm:$0xff] %v3331_v43  ;;  %v3334_v8 = vmul.f32 %v567_v16, %v2801_v11  ;;  %608 = vrot.lane.b32.xlu0 %v3331_v43, %s2697_s27 }
 0x2cb   :  { %638 = vrot.lane.b32.xlu1 %v3334_v8, %s2698_s22  ;;  %606 = vrot.lane.b32.xlu2 %v3334_v8, %s2697_s27 }
 0x2ce   :  { %v575_v31 = vpop.permute.xlu1 %574 }
 0x2cf   :  { %v3343_v15 = vmul.f32 %v575_v31, %v2839_v18 }
 0x2d0   :  { %v573_v56 = vpop.permute.xlu0 %572 }
 0x2d1   :  { %5900 = vst [vmem:[#allocation101_spill] sm:$0xff] %v3343_v15  ;;  %v3346_v27 = vmul.f32 %v573_v56, %v2849_v20  ;;  %614 = vrot.lane.b32.xlu0 %v3343_v15, %s2697_s27 }
 0x2d3   :  { %5901 = vst [vmem:[#allocation102_spill] sm:$0xff] %v3346_v27  ;;  %644 = vrot.lane.b32.xlu1 %v3346_v27, %s2698_s22  ;;  %612 = vrot.lane.b32.xlu2 %v3346_v27, %s2697_s27 }
 0x2d9   :  { %636 = vrot.lane.b32.xlu0 %v3303_v17, %s2698_s22 }
 0x2db   :  { %666 = vrot.lane.b32.xlu1 %v2816_v14, %s2707_s5  ;;  %634 = vrot.lane.b32.xlu2 %v3319_v41, %s2698_s22 }
 0x2e1   :  { %642 = vrot.lane.b32.xlu0 %v3312_v26, %s2698_s22 }
 0x2e3   :  { %672 = vrot.lane.b32.xlu1 %v2748_v1, %s2707_s5  ;;  %640 = vrot.lane.b32.xlu2 %v3331_v43, %s2698_s22 }
 0x2e9   :  { %664 = vrot.lane.b32.xlu0 %v2772_v6, %s2707_s5 }
 0x2eb   :  { %678 = vrot.lane.b32.xlu1 %v2844_v19, %s2707_s5  ;;  %646 = vrot.lane.b32.xlu2 %v3343_v15, %s2698_s22 }
 0x2f1   :  { %670 = vrot.lane.b32.xlu0 %v2806_v12, %s2707_s5 }
 0x2f3   :  { %700 = vrot.lane.b32.xlu1 %v2762_v4, %s2708_s6  ;;  %668 = vrot.lane.b32.xlu2 %v2762_v4, %s2707_s5 }
 0x2f9   :  { %676 = vrot.lane.b32.xlu0 %v2854_v21, %s2707_s5 }
 0x2fb   :  { %706 = vrot.lane.b32.xlu1 %v2796_v10, %s2708_s6  ;;  %674 = vrot.lane.b32.xlu2 %v2796_v10, %s2707_s5 }
 0x301   :  { %698 = vrot.lane.b32.xlu0 %v2816_v14, %s2708_s6 }
 0x303   :  { %696 = vrot.lane.b32.xlu2 %v2772_v6, %s2708_s6 }
 0x309   :  { %704 = vrot.lane.b32.xlu0 %v2748_v1, %s2708_s6 }
 0x30b   :  { %702 = vrot.lane.b32.xlu2 %v2806_v12, %s2708_s6 }
 0x311   :  { %710 = vrot.lane.b32.xlu0 %v2844_v19, %s2708_s6 }
 0x313   :  { %708 = vrot.lane.b32.xlu2 %v2854_v21, %s2708_s6 }
 0x31d   :  { %v3380_v16 = vpop.permute.xlu2 %600 }
 0x325   :  { %v3382_v56 = vpop.permute.xlu1 %604  ;;  %v3384_v31 = vpop.permute.xlu2 %606 }
 0x326   :  { %5902 = vst [vmem:[#allocation103_spill] sm:$0xff] %v3384_v31 }
 0x32d   :  { %v3386_v63 = vpop.permute.xlu1 %610  ;;  %v3388_v36 = vpop.permute.xlu2 %612 }
 0x32e   :  { %5903 = vst [vmem:[#allocation104_spill] sm:$0xff] %v3386_v63 }
 0x32f   :  { %5904 = vst [vmem:[#allocation105_spill] sm:$0xff] %v3388_v36 }
 0x333   :  { %v3390_v51 = vpop.permute.xlu0 %602 }
 0x334   :  { %5905 = vst [vmem:[#allocation106_spill] sm:$0xff] %v3390_v51 }
 0x335   :  { %v3392_v52 = vpop.permute.xlu1 %632  ;;  %v3394_v59 = vpop.permute.xlu2 %634 }
 0x336   :  { %5906 = vst [vmem:[#allocation107_spill] sm:$0xff] %v3392_v52 }
 0x337   :  { %5907 = vst [vmem:[#allocation108_spill] sm:$0xff] %v3394_v59 }
 0x33b   :  { %v3396_v15 = vpop.permute.xlu0 %608 }
 0x33c   :  { %5908 = vst [vmem:[#allocation109_spill] sm:$0xff] %v3396_v15 }
 0x33d   :  { %v3398_v43 = vpop.permute.xlu1 %638  ;;  %v3400_v41 = vpop.permute.xlu2 %640 }
 0x33e   :  { %5909 = vst [vmem:[#allocation110_spill] sm:$0xff] %v3398_v43 }
 0x33f   :  { %5910 = vst [vmem:[#allocation111_spill] sm:$0xff] %v3400_v41 }
 0x343   :  { %v3402_v27 = vpop.permute.xlu0 %614 }
 0x344   :  { %5911 = vst [vmem:[#allocation112_spill] sm:$0xff] %v3402_v27 }
 0x345   :  { %v3404_v26 = vpop.permute.xlu1 %644  ;;  %v3406_v31 = vpop.permute.xlu2 %646 }
 0x346   :  { %5912 = vst [vmem:[#allocation113_spill] sm:$0xff] %v3404_v26 }
 0x347   :  { %5913 = vst [vmem:[#allocation114_spill] sm:$0xff] %v3406_v31 }
 0x34b   :  { %v3408_v63 = vpop.permute.xlu0 %636 }
 0x34c   :  { %5914 = vst [vmem:[#allocation115_spill] sm:$0xff] %v3408_v63 }
 0x34d   :  { %v3410_v36 = vpop.permute.xlu1 %666  ;;  %v3412_v51 = vpop.permute.xlu2 %668 }
 0x34e   :  { %5915 = vst [vmem:[#allocation116_spill] sm:$0xff] %v3410_v36 }
 0x34f   :  { %5916 = vst [vmem:[#allocation117_spill] sm:$0xff] %v3412_v51 }
 0x353   :  { %v3414_v52 = vpop.permute.xlu0 %642 }
 0x354   :  { %5917 = vst [vmem:[#allocation118_spill] sm:$0xff] %v3414_v52 }
 0x355   :  { %v3416_v59 = vpop.permute.xlu1 %672  ;;  %v3418_v15 = vpop.permute.xlu2 %674 }
 0x356   :  { %5918 = vst [vmem:[#allocation119_spill] sm:$0xff] %v3416_v59 }
 0x357   :  { %5919 = vst [vmem:[#allocation120_spill] sm:$0xff] %v3418_v15 }
 0x35b   :  { %v3420_v43 = vpop.permute.xlu0 %664 }
 0x35d   :  { %v3422_v41 = vpop.permute.xlu1 %678  ;;  %v697_v27 = vpop.permute.xlu2 %696 }
 0x35e   :  { %5920 = vst [vmem:[#allocation121_spill] sm:$0xff] %v3422_v41  ;;  %v720_v26 = vmul.f32 %v697_v27, %v2767_v5 }
 0x360   :  { %736 = vrot.lane.b32.xlu1 %v720_v26, %s2697_s27 }
 0x363   :  { %v3426_v31 = vpop.permute.xlu0 %670 }
 0x364   :  { %5921 = vst [vmem:[#allocation122_spill] sm:$0xff] %v3426_v31 }
 0x365   :  { %v701_v36 = vpop.permute.xlu1 %700  ;;  %v703_v63 = vpop.permute.xlu2 %702 }
 0x366   :  { %v3429_v51 = vmul.f32 %v701_v36, %v2753_v2  ;;  %v3432_v59 = vmul.f32 %v703_v63, %v2801_v11 }
 0x368   :  { %740 = vrot.lane.b32.xlu0 %v3429_v51, %s2697_s27  ;;  %742 = vrot.lane.b32.xlu1 %v3432_v59, %s2697_s27 }
 0x36b   :  { %v3438_v41 = vpop.permute.xlu0 %676 }
 0x36c   :  { %5922 = vst [vmem:[#allocation123_spill] sm:$0xff] %v3438_v41  ;;  %v488_v41 = vadd.f32 %v3268_v39, %v3192_v30 }
 0x36d   :  { %v707_v5 = vpop.permute.xlu1 %706  ;;  %v709_v27 = vpop.permute.xlu2 %708 }
 0x36e   :  { %v3441_v15 = vmul.f32 %v707_v5, %v2787_v9  ;;  %v3444_v52 = vmul.f32 %v709_v27, %v2849_v20 }
 0x370   :  { %746 = vrot.lane.b32.xlu0 %v3441_v15, %s2697_s27  ;;  %748 = vrot.lane.b32.xlu1 %v3444_v52, %s2697_s27 }
 0x373   :  { %v699_v2 = vpop.permute.xlu0 %698 }
 0x374   :  { %v3451_v11 = vmul.f32 %v699_v2, %v2811_v13 }
 0x376   :  { %738 = vrot.lane.b32.xlu2 %v3451_v11, %s2697_s27 }
 0x378   :  { %768 = vrot.lane.b32.xlu0 %v720_v26, %s2698_s22  ;;  %770 = vrot.lane.b32.xlu1 %v3451_v11, %s2698_s22 }
 0x37b   :  { %v705_v9 = vpop.permute.xlu0 %704 }
 0x37c   :  { %v3459_v20 = vmul.f32 %v705_v9, %v2743_v0 }
 0x37e   :  { %744 = vrot.lane.b32.xlu2 %v3459_v20, %s2697_s27 }
 0x380   :  { %774 = vrot.lane.b32.xlu0 %v3432_v59, %s2698_s22  ;;  %776 = vrot.lane.b32.xlu1 %v3459_v20, %s2698_s22 }
 0x383   :  { %v711_v13 = vpop.permute.xlu0 %710 }
 0x384   :  { %v3468_v36 = vmul.f32 %v711_v13, %v2839_v18  ;;  %v489_v13 = vadd.f32 %v3264_v38, %v3189_v32 }
 0x386   :  { %5923 = vst [vmem:[#allocation124_spill] sm:$0xff] %v3468_v36  ;;  %750 = vrot.lane.b32.xlu2 %v3468_v36, %s2697_s27  ;;  %s2710_s27 = smov 24  }
 0x388   :  { %780 = vrot.lane.b32.xlu0 %v3444_v52, %s2698_s22  ;;  %782 = vrot.lane.b32.xlu1 %v3468_v36, %s2698_s22  ;;  %v491_v36 = vadd.f32 %v3274_v40, %v3205_v35  ;;  %v493_v40 = vadd.f32 %v3262_v53, %v3217_v29 }
 0x38e   :  { %772 = vrot.lane.b32.xlu2 %v3429_v51, %s2698_s22 }
 0x390   :  { %802 = vrot.lane.b32.xlu0 %v2816_v14, %s2709_s7  ;;  %804 = vrot.lane.b32.xlu1 %v2762_v4, %s2709_s7 }
 0x396   :  { %778 = vrot.lane.b32.xlu2 %v3441_v15, %s2698_s22 }
 0x398   :  { %808 = vrot.lane.b32.xlu0 %v2748_v1, %s2709_s7  ;;  %810 = vrot.lane.b32.xlu1 %v2796_v10, %s2709_s7 }
 0x39e   :  { %800 = vrot.lane.b32.xlu2 %v2772_v6, %s2709_s7 }
 0x3a0   :  { %814 = vrot.lane.b32.xlu0 %v2844_v19, %s2709_s7 }
 0x3a6   :  { %806 = vrot.lane.b32.xlu2 %v2806_v12, %s2709_s7 }
 0x3ae   :  { %812 = vrot.lane.b32.xlu2 %v2854_v21, %s2709_s7 }
 0x3d0   :  { %v739_v0 = vpop.permute.xlu2 %738 }
 0x3d2   :  { %v737_v18 = vpop.permute.xlu1 %736 }
 0x3d3   :  { %v760_v21 = vadd.f32 %v737_v18, %v720_v26  ;;  %v521_v26 = vadd.f32 %v3286_v46, %v489_v13 }
 0x3d8   :  { %v3488_v14 = vpop.permute.xlu2 %744 }
 0x3d9   :  { %5924 = vst [vmem:[#allocation125_spill] sm:$0xff] %v3488_v14  ;;  %v495_v14 = vadd.f32 %v3276_v58, %v3214_v24  ;;  %v520_v58 = vadd.f32 %v3266_v48, %v488_v41  ;;  %v525_v24 = vadd.f32 %v3288_v44, %v493_v40  ;;  %v5940_v40 = vld [vmem:[#allocation112_spill] sm:$0xff] }
 0x3da   :  { %v743_v4 = vpop.permute.xlu1 %742  ;;  %v741_v63 = vpop.permute.xlu0 %740 }
 0x3db   :  { %v552_v29 = vadd.f32 %v3294_v55, %v520_v58  ;;  %v762_v44 = vadd.f32 %v741_v63, %v3429_v51  ;;  %v3555_v41 = vadd.f32 %v3314_v34, %v525_v24  ;;  %v5934_v34 = vld [vmem:[#allocation105_spill] sm:$0xff] }
 0x3e0   :  { %v3490_v5 = vpop.permute.xlu2 %750 }
 0x3e1   :  { %5925 = vst [vmem:[#allocation126_spill] sm:$0xff] %v3490_v5  ;;  %v492_v5 = vadd.f32 %v3270_v25, %v3199_v45  ;;  %v490_v25 = vadd.f32 %v3260_v62, %v3202_v49  ;;  %v527_v45 = vadd.f32 %v3298_v54, %v495_v14  ;;  %v763_v54 = vadd.f32 %v743_v4, %v3432_v59  ;;  %v5931_v14 = vld [vmem:[#allocation104_spill] sm:$0xff] }
 0x3e2   :  { %v3492_v27 = vpop.permute.xlu1 %748  ;;  %v747_v1 = vpop.permute.xlu0 %746 }
 0x3e3   :  { %v524_v32 = vadd.f32 %v3292_v42, %v492_v5  ;;  %v522_v35 = vadd.f32 %v3282_v28, %v490_v25  ;;  %v3523_v42 = vadd.f32 %v3284_v57, %v521_v26  ;;  %v3537_v28 = vadd.f32 %v3296_v60, %v527_v45  ;;  %v5939_v25 = vld [vmem:[#allocation101_spill] sm:$0xff] }
 0x3e4   :  { %v624_v60 = vadd.f32 %v3380_v16, %v3322_v3  ;;  %v5932_v3 = vld [vmem:[#allocation107_spill] sm:$0xff]  ;;  %v631_v45 = vadd.f32 %v5940_v40, %v5939_v25  ;;  %v766_v58 = vadd.f32 %v3492_v27, %v3444_v52 }
 0x3e5   :  { %v3528_v49 = vadd.f32 %v3290_v61, %v524_v32  ;;  %v3547_v55 = vadd.f32 %v3305_v33, %v522_v35  ;;  %v5929_v33 = vld [vmem:[#allocation103_spill] sm:$0xff]  ;;  %v5943_v35 = vmov 0 }
 0x3e6   :  { %v656_v16 = vadd.f32 %v5932_v3, %v624_v60  ;;  %v5952_v3 = vld [vmem:[#allocation125_spill] sm:$0xff] }
 0x3e8   :  { %v773_v10 = vpop.permute.xlu2 %772  ;;  %v688_v26 = vadd.f32 %v3420_v43, %v656_v16  ;;  %v764_v16 = vadd.f32 %v5952_v3, %v3459_v20 }
 0x3e9   :  { %v794_v53 = vadd.f32 %v773_v10, %v762_v44  ;;  %v5933_v10 = vld [vmem:[#allocation102_spill] sm:$0xff] }
 0x3ea   :  { %v771_v2 = vpop.permute.xlu1 %770  ;;  %v769_v6 = vpop.permute.xlu0 %768 }
 0x3eb   :  { %v792_v31 = vadd.f32 %v769_v6, %v760_v21  ;;  %v5935_v6 = vld [vmem:[#allocation99_spill] sm:$0xff]  ;;  %v5938_v21 = vld [vmem:[#allocation109_spill] sm:$0xff] }
 0x3f0   :  { %v3494_v9 = vpop.permute.xlu2 %778 }
 0x3f2   :  { %v3496_v19 = vpop.permute.xlu1 %776  ;;  %v775_v12 = vpop.permute.xlu0 %774 }
 0x3f3   :  { %5926 = vst [vmem:[#allocation127_spill] sm:$0xff] %v3496_v19  ;;  %v494_v19 = vadd.f32 %v3280_v7, %v3220_v47  ;;  %v523_v7 = vadd.f32 %v3272_v50, %v491_v36  ;;  %v761_v50 = vadd.f32 %v739_v0, %v3451_v11  ;;  %v795_v59 = vadd.f32 %v775_v12, %v763_v54  ;;  %v5937_v12 = vld [vmem:[#allocation100_spill] sm:$0xff] }
 0x3f4   :  { %v628_v13 = vadd.f32 %v5938_v21, %v5937_v12  ;;  %v5956_v12 = vld [vmem:[#allocation117_spill] sm:$0xff] }
 0x3f5   :  { %v526_v47 = vadd.f32 %v3278_v23, %v494_v19  ;;  %v3544_v57 = vadd.f32 %v3300_v37, %v523_v7  ;;  %v793_v62 = vadd.f32 %v771_v2, %v761_v50  ;;  %v626_v37 = vadd.f32 %v3382_v56, %v3303_v17  ;;  %v5936_v19 = vld [vmem:[#allocation106_spill] sm:$0xff]  ;;  %v5947_v50 = vld [vmem:[#allocation108_spill] sm:$0xff] }
 0x3f6   :  { %v630_v2 = vadd.f32 %v5934_v34, %v5933_v10  ;;  %v625_v17 = vadd.f32 %v5936_v19, %v5935_v6  ;;  %v765_v56 = vadd.f32 %v747_v1, %v3441_v15  ;;  %v5954_v10 = vld [vmem:[#allocation122_spill] sm:$0xff] }
 0x3f7   :  { %v3550_v61 = vadd.f32 %v3309_v22, %v526_v47  ;;  %v5930_v22 = vld [vmem:[#allocation98_spill] sm:$0xff] }
 0x3f8   :  { %v801_v18 = vpop.permute.xlu2 %800  ;;  %v3563_v4 = vadd.f32 %v5931_v14, %v5930_v22  ;;  %v797_v7 = vadd.f32 %v3494_v9, %v765_v56  ;;  %v657_v44 = vadd.f32 %v5947_v50, %v625_v17  ;;  %v5951_v22 = vld [vmem:[#allocation113_spill] sm:$0xff]  ;;  %v5955_v56 = vld [vmem:[#allocation116_spill] sm:$0xff] }
 0x3f9   :  { %v824_v30 = vadd.f32 %v801_v18, %v792_v31  ;;  %v627_v31 = vadd.f32 %v5929_v33, %v3334_v8  ;;  %v3608_v14 = vadd.f32 %v5951_v22, %v630_v2  ;;  %v5957_v2 = vld [vmem:[#allocation124_spill] sm:$0xff] }
 0x3fa   :  { %v3512_v38 = vpop.permute.xlu1 %782  ;;  %v781_v39 = vpop.permute.xlu0 %780 }
 0x3fb   :  { %v832_v46 = vand.u32 2147483647, %v824_v30  ;;  %v798_v24 = vadd.f32 %v781_v39, %v766_v58 }
 0x3fd   :  { %vm3532_vm0 = vcmp.gt.f32.partialorder %v832_v46, 1e-08 }
 0x3fe   :  { %v848_v23 = vsel %vm3532_vm0, %v824_v30, 1.0 }
 0x3ff   :  { %2673 = vrcp.f32 %v848_v23  ;;  %v5948_v23 = vld [vmem:[#allocation115_spill] sm:$0xff] }
 0x400   :  { %v807_v51 = vpop.permute.xlu2 %806 }
 0x401   :  { %v827_v36 = vadd.f32 %v807_v51, %v795_v59  ;;  %v658_v59 = vadd.f32 %v5948_v23, %v626_v37 }
 0x402   :  { %v805_v11 = vpop.permute.xlu1 %804  ;;  %v803_v0 = vpop.permute.xlu0 %802 }
 0x403   :  { %v826_v63 = vadd.f32 %v805_v11, %v794_v53  ;;  %v825_v5 = vadd.f32 %v803_v0, %v793_v62  ;;  %v835_v8 = vand.u32 2147483647, %v827_v36  ;;  %v5949_v62 = vld [vmem:[#allocation110_spill] sm:$0xff]  ;;  %v690_v21 = vadd.f32 %v5956_v12, %v658_v59 }
 0x404   :  { %v659_v53 = vadd.f32 %v5949_v62, %v627_v31 }
 0x405   :  { %v834_v18 = vand.u32 2147483647, %v826_v63  ;;  %v833_v32 = vand.u32 2147483647, %v825_v5  ;;  %v2674_v30 = vpop.eup %2673  ;;  %vm3579_vm1 = vcmp.gt.f32.partialorder %v835_v8, 1e-08  ;;  %v689_v8 = vadd.f32 %v5955_v56, %v657_v44 }
 0x406   :  { %v864_v15 = vmul.f32 %v2674_v30, %v552_v29  ;;  %v888_v1 = vmul.f32 %v2674_v30, %v688_v26  ;;  %v851_v43 = vsel %vm3579_vm1, %v827_v36, 1.0  ;;  %v5950_v36 = vld [vmem:[#allocation111_spill] sm:$0xff]  ;;  %v691_v31 = vadd.f32 %v5954_v10, %v659_v53 }
 0x407   :  { %vm3583_vm2 = vcmp.gt.f32.partialorder %v834_v18, 1e-08  ;;  %2675 = vrcp.f32 %v851_v43  ;;  %vm3591_vm3 = vcmp.gt.f32.partialorder %v833_v32, 1e-08  ;;  %v3605_v0 = vadd.f32 %v5950_v36, %v628_v13  ;;  %v5958_v13 = vld [vmem:[#allocation126_spill] sm:$0xff]  ;;  %v5959_v18 = vld [vmem:[#allocation127_spill] sm:$0xff] }
 0x408   :  { %v5944_v35 = vsel %vm3583_vm2, 4294967295, %v5943_v35  ;;  %v850_v47 = vsel %vm3583_vm2, %v826_v63, 1.0  ;;  %v2541_v27 = vadd.f32 -128.0, %v864_v15  ;;  %v2549_v9 = vadd.f32 -128.0, %v888_v1  ;;  %v813_v54 = vpop.permute.xlu2 %812  ;;  %v5953_v63 = vld [vmem:[#allocation114_spill] sm:$0xff] }
 0x409   :  { %2677 = vrcp.f32 %v850_v47  ;;  %v849_v29 = vsel %vm3591_vm3, %v825_v5, 1.0  ;;  %v3599_v60 = vadd.f32 %v813_v54, %v798_v24  ;;  %v3614_v5 = vadd.f32 %v5953_v63, %v631_v45 }
 0x40a   :  { %2679 = vrcp.f32 %v849_v29  ;;  %v811_v39 = vpop.permute.xlu1 %810  ;;  %v880_v51 = vmul.f32 0.0078125, %v2541_v27  ;;  %v904_v33 = vmul.f32 0.0078125, %v2549_v9  ;;  %v809_v19 = vpop.permute.xlu0 %808  ;;  %v767_v26 = vadd.f32 %v5958_v13, %v5957_v2 }
 0x40b   :  { %v3602_v11 = vadd.f32 %v811_v39, %v797_v7  ;;  %v838_v37 = vand.u32 2147483647, %v3599_v60  ;;  %v796_v20 = vadd.f32 %v5959_v18, %v764_v16  ;;  %v5960_v1 = vmov 0 }
 0x40c   :  { %v912_v34 = vadd.f32 1.0, %v880_v51  ;;  %v936_v6 = vadd.f32 1.0, %v904_v33 }
 0x40d   :  { %v2676_v17 = vpop.eup %2675  ;;  %v837_v45 = vand.u32 2147483647, %v3602_v11  ;;  %vm3625_vm4 = vcmp.gt.f32.partialorder %v838_v37, 1e-08  ;;  %v828_v43 = vadd.f32 %v809_v19, %v796_v20 }
 0x40e   :  { %v944_v30 = vmul.f32 0.5, %v936_v6  ;;  %v867_v25 = vmul.f32 %v2676_v17, %v3544_v57  ;;  %v891_v40 = vmul.f32 %v2676_v17, %v691_v31  ;;  %v5961_v1 = vsel %vm3625_vm4, 4294967295, %v5960_v1 }
 0x40f   :  { %v2678_v32 = vpop.eup %2677  ;;  %v920_v24 = vmul.f32 0.5, %v912_v34  ;;  %vm3630_vm5 = vcmp.gt.f32.partialorder %v837_v45, 1e-08  ;;  %v854_v34 = vsel %vm3625_vm4, %v3599_v60, 1.0  ;;  %v836_v6 = vand.u32 2147483647, %v828_v43 }
 0x410   :  { %v2680_v58 = vpop.eup %2679  ;;  %v866_v7 = vmul.f32 %v2678_v32, %v3547_v55  ;;  %v890_v15 = vmul.f32 %v2678_v32, %v690_v21  ;;  %v952_v47 = vmul.f32 15.0, %v944_v30  ;;  %v2544_v27 = vadd.f32 -128.0, %v867_v25  ;;  %v5966_v45 = vld [vmem:[#allocation118_spill] sm:$0xff] }
 0x411   :  { %v2552_v9 = vadd.f32 -128.0, %v891_v40  ;;  %v865_v57 = vmul.f32 %v2680_v58, %v3523_v42  ;;  %v889_v50 = vmul.f32 %v2680_v58, %v689_v8  ;;  %v5962_v55 = vmov 0 }
 0x412   :  { %v2543_v29 = vadd.f32 -128.0, %v866_v7  ;;  %v2551_v54 = vadd.f32 -128.0, %v890_v15  ;;  %v976_v44 = vmax.f32 %v952_v47, -2.0  ;;  %v883_v23 = vmul.f32 0.0078125, %v2544_v27  ;;  %v815_v47 = vpop.permute.xlu0 %814 }
 0x413   :  { %v907_v59 = vmul.f32 0.0078125, %v2552_v9  ;;  %v5963_v55 = vsel %vm3630_vm5, 4294967295, %v5962_v55  ;;  %v2542_v53 = vadd.f32 -128.0, %v865_v57  ;;  %v2550_v51 = vadd.f32 -128.0, %v889_v50 }
 0x414   :  { %v882_v39 = vmul.f32 0.0078125, %v2543_v29  ;;  %v906_v62 = vmul.f32 0.0078125, %v2551_v54  ;;  %v928_v33 = vmul.f32 15.0, %v920_v24  ;;  %v3634_v36 = vmin.f32 %v976_v44, 17.0 }
 0x415   :  { %v915_v22 = vadd.f32 1.0, %v883_v23  ;;  %v939_v3 = vadd.f32 1.0, %v907_v59  ;;  %v881_v42 = vmul.f32 0.0078125, %v2542_v53  ;;  %v905_v63 = vmul.f32 0.0078125, %v2550_v51  ;;  %v5968_v23 = vld [vmem:[#allocation120_spill] sm:$0xff]  ;;  %v5969_v51 = vld [vmem:[#allocation121_spill] sm:$0xff] }
 0x416   :  { %v914_v16 = vadd.f32 1.0, %v882_v39  ;;  %v938_v37 = vadd.f32 1.0, %v906_v62  ;;  %v1000_v12 = vfloor.f32 %v3634_v36  ;;  %v853_v13 = vsel %vm3630_vm5, %v3602_v11, 1.0 }
 0x417   :  { %v923_v10 = vmul.f32 0.5, %v915_v22  ;;  %v947_v31 = vmul.f32 0.5, %v939_v3  ;;  %v913_v56 = vadd.f32 1.0, %v881_v42  ;;  %v937_v8 = vadd.f32 1.0, %v905_v63  ;;  %v5970_v22 = vld [vmem:[#allocation123_spill] sm:$0xff] }
 0x418   :  { %v922_v19 = vmul.f32 0.5, %v914_v16  ;;  %v946_v17 = vmul.f32 0.5, %v938_v37  ;;  %v960_v18 = vmax.f32 %v928_v33, -2.0  ;;  %2681 = vrcp.f32 %v853_v13 }
 0x419   :  { %v931_v21 = vmul.f32 15.0, %v923_v10  ;;  %v955_v2 = vmul.f32 15.0, %v947_v31  ;;  %v921_v30 = vmul.f32 0.5, %v913_v56  ;;  %v945_v40 = vmul.f32 0.5, %v937_v8 }
 0x41a   :  { %v930_v20 = vmul.f32 15.0, %v922_v19  ;;  %v954_v32 = vmul.f32 15.0, %v946_v17  ;;  %vm3643_vm6 = vcmp.gt.f32.partialorder %v836_v6, 1e-08  ;;  %v5964_v60 = vmov 0 }
 0x41b   :  { %v979_v25 = vmax.f32 %v955_v2, -2.0  ;;  %v5965_v60 = vsel %vm3643_vm6, 4294967295, %v5964_v60  ;;  %v661_v58 = vadd.f32 %v5966_v45, %v3563_v4  ;;  %v799_v7 = vadd.f32 %v3512_v38, %v767_v26  ;;  %v5967_v38 = vld [vmem:[#allocation119_spill] sm:$0xff] }
 0x41c   :  { %v978_v15 = vmax.f32 %v954_v32, -2.0  ;;  %v963_v24 = vmax.f32 %v931_v21, -2.0  ;;  %v3652_v11 = vcvt.f32.s32 %v1000_v12  ;;  %2683 = vrcp.f32 %v854_v34 }
 0x41d   :  { %v3654_v27 = vmin.f32 %v979_v25, 17.0  ;;  %v852_v9 = vsel %vm3643_vm6, %v828_v43, 1.0  ;;  %v3658_v29 = vmin.f32 %v960_v18, 17.0  ;;  %v962_v54 = vmax.f32 %v930_v20, -2.0 }
 0x41e   :  { %v3660_v57 = vmin.f32 %v978_v15, 17.0  ;;  %v929_v4 = vmul.f32 15.0, %v921_v30  ;;  %v692_v26 = vadd.f32 %v5967_v38, %v3605_v0  ;;  %v953_v50 = vmul.f32 15.0, %v945_v40  ;;  %v2682_v53 = vpop.eup %2681 }
 0x41f   :  { %2685 = vrcp.f32 %v852_v9  ;;  %v831_v44 = vadd.f32 %v815_v47, %v799_v7  ;;  %v693_v59 = vadd.f32 %v5968_v23, %v661_v58  ;;  %v3666_v62 = vmin.f32 %v963_v24, 17.0 }
 0x420   :  { %v1002_v39 = vfloor.f32 %v3660_v57  ;;  %v1003_v43 = vfloor.f32 %v3654_v27  ;;  %v3671_v33 = vadd.f32 %v5969_v51, %v3614_v5  ;;  %v694_v3 = vadd.f32 %v5970_v22, %v3608_v14 }
 0x421   :  { %v839_v0 = vand.u32 2147483647, %v831_v44  ;;  %vm1189_vm7 = vcmp.gt.s32.totalorder %v3652_v11, 0  ;;  %v992_v16 = vfloor.f32 %v3658_v29  ;;  %v3677_v37 = vmin.f32 %v962_v54, 17.0 }
 0x422   :  { %v3681_v42 = vcvt.f32.s32 %v1002_v39  ;;  %v961_v63 = vmax.f32 %v929_v4, -2.0  ;;  %v2684_v10 = vpop.eup %2683  ;;  %v977_v31 = vmax.f32 %v953_v50, -2.0  ;;  %v893_v34 = vmul.f32 %v2682_v53, %v693_v59 }
 0x423   :  { %vm3683_vm8 = vcmp.gt.f32.partialorder %v839_v0, 1e-08  ;;  %v5971_v5 = vmov 0  ;;  %v1190_v14 = vsel %vm1189_vm7, %v3652_v11, 0  ;;  %v995_v6 = vfloor.f32 %v3666_v62 }
 0x424   :  { %v5972_v5 = vsel %vm3683_vm8, 4294967295, %v5971_v5  ;;  %v3691_v19 = vcvt.f32.s32 %v1003_v43  ;;  %v870_v17 = vmul.f32 %v2684_v10, %v3550_v61  ;;  %v894_v56 = vmul.f32 %v2684_v10, %v694_v3 }
 0x425   :  { %v2686_v8 = vpop.eup %2685  ;;  %v869_v21 = vmul.f32 %v2682_v53, %v3555_v41  ;;  %v2554_v2 = vadd.f32 -128.0, %v893_v34  ;;  %v855_v13 = vsel %vm3683_vm8, %v831_v44, 1.0  ;;  %vm1205_vm9 = vcmp.lt.s32.totalorder %v1190_v14, 15 }
 0x426   :  { %v2547_v18 = vadd.f32 -128.0, %v870_v17  ;;  %v2555_v20 = vadd.f32 -128.0, %v894_v56  ;;  %v868_v32 = vmul.f32 %v2686_v8, %v3528_v49  ;;  %vm1193_vm10 = vcmp.gt.s32.totalorder %v3681_v42, 0 }
 0x427   :  { %v909_v30 = vmul.f32 0.0078125, %v2554_v2  ;;  %v892_v25 = vmul.f32 %v2686_v8, %v692_v26  ;;  %2687 = vrcp.f32 %v855_v13  ;;  %v1206_v40 = vsel %vm1205_vm9, %v1190_v14, 15 }
 0x428   :  { %v3699_v61 = vmin.f32 %v961_v63, 17.0  ;;  %v886_v45 = vmul.f32 0.0078125, %v2547_v18  ;;  %v910_v58 = vmul.f32 0.0078125, %v2555_v20  ;;  %v2545_v41 = vadd.f32 -128.0, %v868_v32 }
 0x429   :  { %v3701_v7 = vmin.f32 %v977_v31, 17.0  ;;  %v941_v15 = vadd.f32 1.0, %v909_v30  ;;  %v2553_v24 = vadd.f32 -128.0, %v892_v25  ;;  %v1221_v47 = vmul.u32 16, %v1206_v40 }
 0x42a   :  { %v2546_v9 = vadd.f32 -128.0, %v869_v21  ;;  %v942_v54 = vadd.f32 1.0, %v910_v58  ;;  %v884_v4 = vmul.f32 0.0078125, %v2545_v41  ;;  %v1194_v49 = vsel %vm1193_vm10, %v3681_v42, 0 }
 0x42b   :  { %v949_v38 = vmul.f32 0.5, %v941_v15  ;;  %v908_v26 = vmul.f32 0.0078125, %v2553_v24  ;;  %1229 = vrot.lane.b32.xlu1 %v1221_v47, %s2710_s27  ;;  %vm1195_vm11 = vcmp.gt.s32.totalorder %v3691_v19, 0  ;;  %v3710_v50 = vcvt.f32.s32 %v992_v16 }
 0x42c   :  { %v993_v44 = vfloor.f32 %v3699_v61  ;;  %v918_v23 = vadd.f32 1.0, %v886_v45  ;;  %v950_v59 = vmul.f32 0.5, %v942_v54  ;;  %v916_v53 = vadd.f32 1.0, %v884_v4 }
 0x42d   :  { %v2688_v51 = vpop.eup %2687  ;;  %v1001_v22 = vfloor.f32 %v3701_v7  ;;  %v957_v3 = vmul.f32 15.0, %v949_v38  ;;  %v940_v0 = vadd.f32 1.0, %v908_v26  ;;  %vm1209_vm12 = vcmp.lt.s32.totalorder %v1194_v49, 15 }
 0x42e   :  { %v885_v63 = vmul.f32 0.0078125, %v2546_v9  ;;  %v958_v10 = vmul.f32 15.0, %v950_v59  ;;  %v924_v31 = vmul.f32 0.5, %v916_v53  ;;  %v1196_v34 = vsel %vm1195_vm11, %v3691_v19, 0 }
 0x42f   :  { %v981_v14 = vmax.f32 %v957_v3, -2.0  ;;  %v948_v17 = vmul.f32 0.5, %v940_v0  ;;  %v871_v56 = vmul.f32 %v2688_v51, %v3537_v28  ;;  %v895_v8 = vmul.f32 %v2688_v51, %v3671_v33 }
 0x430   :  { %v926_v21 = vmul.f32 0.5, %v918_v23  ;;  %v982_v2 = vmax.f32 %v958_v10, -2.0  ;;  %v932_v13 = vmul.f32 15.0, %v924_v31  ;;  %v1210_v18 = vsel %vm1209_vm12, %v1194_v49, 15 }
 0x431   :  { %v3717_v20 = vmin.f32 %v981_v14, 17.0  ;;  %v956_v32 = vmul.f32 15.0, %v948_v17  ;;  %v2548_v30 = vadd.f32 -128.0, %v871_v56  ;;  %v2556_v25 = vadd.f32 -128.0, %v895_v8 }
 0x432   :  { %v3721_v40 = vcvt.f32.s32 %v1001_v22  ;;  %v3723_v45 = vmin.f32 %v982_v2, 17.0  ;;  %v964_v58 = vmax.f32 %v932_v13, -2.0  ;;  %vm1211_vm13 = vcmp.lt.s32.totalorder %v1196_v34, 15 }
 0x433   :  { %v1005_v28 = vfloor.f32 %v3717_v20  ;;  %v980_v33 = vmax.f32 %v956_v32, -2.0  ;;  %v887_v41 = vmul.f32 0.0078125, %v2548_v30  ;;  %v911_v15 = vmul.f32 0.0078125, %v2556_v25 }
 0x434   :  { %v917_v24 = vadd.f32 1.0, %v885_v63  ;;  %v934_v47 = vmul.f32 15.0, %v926_v21  ;;  %v5734_v9 = vfloor.f32 %v3723_v45  ;;  %v1223_v54 = vmul.u32 16, %v1210_v18 }
 0x435   :  { %v3729_v4 = vcvt.f32.s32 %v1005_v28  ;;  %v3731_v49 = vmin.f32 %v980_v33, 17.0  ;;  %v919_v38 = vadd.f32 1.0, %v887_v41  ;;  %v943_v26 = vadd.f32 1.0, %v911_v15 }
 0x436   :  { %v3735_v23 = vcvt.f32.s32 %v5734_v9  ;;  %v3737_v59 = vmin.f32 %v964_v58, 17.0  ;;  %1233 = vrot.lane.b32.xlu0 %v1223_v54, %s2710_s27  ;;  %v1212_v53 = vsel %vm1211_vm13, %v1196_v34, 15  ;;  %vm1191_vm14 = vcmp.gt.s32.totalorder %v3721_v40, 0 }
 0x437   :  { %v1004_v51 = vfloor.f32 %v3731_v49  ;;  %v927_v3 = vmul.f32 0.5, %v919_v38  ;;  %v951_v0 = vmul.f32 0.5, %v943_v26  ;;  %v1224_v63 = vmul.u32 16, %v1212_v53 }
 0x438   :  { %v925_v10 = vmul.f32 0.5, %v917_v24  ;;  %v1192_v31 = vsel %vm1191_vm14, %v3721_v40, 0  ;;  %vm1199_vm15 = vcmp.gt.s32.totalorder %v3729_v4, 0  ;;  %vm1201_vm7 = vcmp.gt.s32.totalorder %v3735_v23, 0 }
 0x439   :  { %v966_v14 = vmax.f32 %v934_v47, -2.0  ;;  %v3748_v17 = vcvt.f32.s32 %v1004_v51  ;;  %v959_v34 = vmul.f32 15.0, %v951_v0  ;;  %1235 = vrot.lane.b32.xlu1 %v1224_v63, %s2710_s27  ;;  %vm1207_vm9 = vcmp.lt.s32.totalorder %v1192_v31, 15 }
 0x43a   :  { %v996_v56 = vfloor.f32 %v3737_v59  ;;  %v1208_v8 = vsel %vm1207_vm9, %v1192_v31, 15  ;;  %v1200_v21 = vsel %vm1199_vm15, %v3729_v4, 0  ;;  %v1202_v2 = vsel %vm1201_vm7, %v3735_v23, 0 }
 0x43b   :  { %v935_v13 = vmul.f32 15.0, %v927_v3  ;;  %v983_v18 = vmax.f32 %v959_v34, -2.0  ;;  %v1222_v32 = vmul.u32 16, %v1208_v8  ;;  %vm1215_vm10 = vcmp.lt.s32.totalorder %v1200_v21, 15 }
 0x43c   :  { %v1216_v30 = vsel %vm1215_vm10, %v1200_v21, 15  ;;  %vm1217_vm11 = vcmp.lt.s32.totalorder %v1202_v2, 15  ;;  %vm1197_vm12 = vcmp.gt.s32.totalorder %v3748_v17, 0  ;;  %vm1157_vm13 = vcmp.gt.s32.totalorder %v3710_v50, 0 }
 0x43d   :  { %v933_v25 = vmul.f32 15.0, %v925_v10  ;;  %v3756_v58 = vmin.f32 %v983_v18, 17.0  ;;  %1231 = vrot.lane.b32.xlu2 %v1222_v32, %s2710_s27  ;;  %v1226_v33 = vmul.u32 16, %v1216_v30  ;;  %v1218_v41 = vsel %vm1217_vm11, %v1202_v2, 15 }
 0x43e   :  { %v3759_v15 = vmin.f32 %v966_v14, 17.0  ;;  %v1227_v24 = vmul.u32 16, %v1218_v41  ;;  %v1198_v47 = vsel %vm1197_vm12, %v3748_v17, 0  ;;  %v3764_v54 = vcvt.f32.s32 %v993_v44 }
 0x43f   :  { %v967_v38 = vmax.f32 %v935_v13, -2.0  ;;  %v1007_v26 = vfloor.f32 %v3756_v58  ;;  %1239 = vrot.lane.b32.xlu0 %v1226_v33, %s2710_s27  ;;  %vm1213_vm14 = vcmp.lt.s32.totalorder %v1198_v47, 15  ;;  %v1158_v53 = vsel %vm1157_vm13, %v3710_v50, 0 }
 0x440   :  { %v1214_v3 = vsel %vm1213_vm14, %v1198_v47, 15  ;;  %vm1159_vm15 = vcmp.gt.s32.totalorder %v3764_v54, 0  ;;  %v3772_v0 = vcvt.f32.s32 %v995_v6  ;;  %v3776_v63 = vcvt.f32.s32 %v996_v56 }
 0x441   :  { %v965_v10 = vmax.f32 %v933_v25, -2.0  ;;  %v3780_v31 = vcvt.f32.s32 %v1007_v26  ;;  %1241 = vrot.lane.b32.xlu1 %v1227_v24, %s2710_s27  ;;  %v1225_v14 = vmul.u32 16, %v1214_v3  ;;  %v994_v34 = vfloor.f32 %v3677_v37 }
 0x442   :  { %v1160_v8 = vsel %vm1159_vm15, %v3764_v54, 0  ;;  %v5756_v21 = vfloor.f32 %v3759_v15  ;;  %v3786_v2 = vmin.f32 %v967_v38, 17.0  ;;  %vm1173_vm7 = vcmp.lt.s32.totalorder %v1158_v53, 15 }
 0x443   :  { %vm1203_vm9 = vcmp.gt.s32.totalorder %v3780_v31, 0  ;;  %vm1163_vm10 = vcmp.gt.s32.totalorder %v3772_v0, 0  ;;  %vm1165_vm11 = vcmp.gt.s32.totalorder %v3776_v63, 0  ;;  %v3792_v18 = vmin.f32 %v965_v10, 17.0 }
 0x444   :  { %v1204_v13 = vsel %vm1203_vm9, %v3780_v31, 0  ;;  %vm1175_vm12 = vcmp.lt.s32.totalorder %v1160_v8, 15  ;;  %v1174_v32 = vsel %vm1173_vm7, %v1158_v53, 15  ;;  %v3795_v25 = vcvt.f32.s32 %v994_v34 }
 0x445   :  { %1237 = vrot.lane.b32.xlu2 %v1225_v14, %s2710_s27  ;;  %vm1219_vm13 = vcmp.lt.s32.totalorder %v1204_v13, 15  ;;  %v999_v33 = vfloor.f32 %v3786_v2  ;;  %v1164_v41 = vsel %vm1163_vm10, %v3772_v0, 0  ;;  %v1166_v24 = vsel %vm1165_vm11, %v3776_v63, 0 }
 0x446   :  { %v1220_v30 = vsel %vm1219_vm13, %v1204_v13, 15  ;;  %v3803_v47 = vcvt.f32.s32 %v5756_v21  ;;  %v1176_v38 = vsel %vm1175_vm12, %v1160_v8, 15  ;;  %v997_v3 = vfloor.f32 %v3792_v18 }
 0x447   :  { %1253 = vrot.lane.b32.xlu0 %v1174_v32, %s2710_s27  ;;  %v1228_v53 = vmul.u32 16, %v1220_v30  ;;  %vm1179_vm14 = vcmp.lt.s32.totalorder %v1164_v41, 15  ;;  %vm1181_vm15 = vcmp.lt.s32.totalorder %v1166_v24, 15  ;;  %vm1161_vm7 = vcmp.gt.s32.totalorder %v3795_v25, 0 }
 0x448   :  { %vm1169_vm9 = vcmp.gt.s32.totalorder %v3803_v47, 0  ;;  %v3811_v10 = vcvt.f32.s32 %v999_v33  ;;  %v3814_v14 = vsub.f32 %v3677_v37, %v994_v34  ;;  %v3819_v8 = vsub.f32 %v3660_v57, %v1002_v39 }
 0x449   :  { %1255 = vrot.lane.b32.xlu1 %v1176_v38, %s2710_s27  ;;  %v1180_v13 = vsel %vm1179_vm14, %v1164_v41, 15  ;;  %v1182_v32 = vsel %vm1181_vm15, %v1166_v24, 15  ;;  %v1162_v30 = vsel %vm1161_vm7, %v3795_v25, 0  ;;  %v3825_v38 = vcvt.f32.s32 %v997_v3 }
 0x44a   :  { %v1170_v9 = vsel %vm1169_vm9, %v3803_v47, 0  ;;  %v5737_v37 = vsub.f32 1.0, %v3814_v14  ;;  %v5754_v34 = vsub.f32 1.0, %v3819_v8  ;;  %v3833_v57 = vsub.f32 %v3658_v29, %v992_v16 }
 0x44b   :  { %vm1171_vm10 = vcmp.gt.s32.totalorder %v3811_v10, 0  ;;  %v3840_v39 = vsub.f32 %v3634_v36, %v1000_v12  ;;  %vm1093_vm11 = vcmp.ge.s32.totalorder %v3710_v50, 0  ;;  %vm1101_vm12 = vcmp.lt.s32.totalorder %v3710_v50, 16 }
 0x44c   :  { %v3848_v29 = vmul.f32 %v5754_v34, %v5737_v37  ;;  %v5757_v16 = vsub.f32 1.0, %v3833_v57  ;;  %vm5735_vm14 = vcmp.ge.s32.totalorder %v3652_v11, 0  ;;  %v3858_v12 = vsub.f32 %v3737_v59, %v996_v56  ;;  %vm3866_vm9 = vmand %vm1093_vm11, %vm1101_vm12 }
 0x44d   :  { %1243 = vrot.lane.b32.xlu2 %v1228_v53, %s2710_s27  ;;  %v1064_v36 = vsub.f32 1.0, %v3840_v39  ;;  %v3863_v41 = vsub.f32 %v3731_v49, %v1004_v51  ;;  %v1172_v24 = vsel %vm1171_vm10, %v3811_v10, 0  ;;  %vm5736_vm15 = vcmp.lt.s32.totalorder %v3652_v11, 16  ;;  %vm1125_vm7 = vmand %vm3866_vm9, %vm5735_vm14 }
 0x44e   :  { %v5740_v49 = vsub.f32 1.0, %v3858_v12  ;;  %vm1105_vm10 = vcmp.lt.s32.totalorder %v3776_v63, 16  ;;  %vm5975_vm11 = vcmp.lt.s32.totalorder %v1162_v30, 15  ;;  %vm1141_vm12 = vmand %vm1125_vm7, %vm5736_vm15  ;;  %vm1187_vm14 = vcmp.lt.s32.totalorder %v1172_v24, 15 }
 0x44f   :  { %1259 = vrot.lane.b32.xlu0 %v1180_v13, %s2710_s27  ;;  %v1085_v59 = vmul.f32 %v1064_v36, %v5757_v16  ;;  %v1068_v51 = vsub.f32 1.0, %v3863_v41  ;;  %v1178_v56 = vsel %vm5975_vm11, %v1162_v30, 15  ;;  %v3890_v13 = vsub.f32 %v3666_v62, %v995_v6  ;;  %vm1149_vm7 = vmand %vm1141_vm12, %vm3532_vm0 }
 0x450   :  { %vm5976_vm11 = vcmp.gt.s32.totalorder %v3825_v38, 0  ;;  %vm5977_vm15 = vcmp.lt.s32.totalorder %v1170_v9, 15  ;;  %vm5978_vm13 = vcmp.ge.s32.totalorder %v3776_v63, 0  ;;  %vm5981_vm12 = vcmp.ge.s32.totalorder %v3748_v17, 0 }
 0x451   :  { %1261 = vrot.lane.b32.xlu1 %v1182_v32, %s2710_s27  ;;  %v3895_v32 = vsub.f32 %v3654_v27, %v1003_v43  ;;  %v1168_v30 = vsel %vm5976_vm11, %v3825_v38, 0  ;;  %v1089_v62 = vmul.f32 %v1068_v51, %v5740_v49  ;;  %v1186_v6 = vsel %vm5977_vm15, %v1170_v9, 15  ;;  %vm3912_vm2 = vmand %vm5978_vm13, %vm1105_vm10 }
 0x452   :  { %v3908_v37 = vsel %vm1149_vm7, %v1085_v59, 0.0  ;;  %v5979_v27 = vmov 0  ;;  %v5741_v43 = vsub.f32 1.0, %v3890_v13  ;;  %vm1129_vm11 = vmand %vm3912_vm2, %vm5981_vm12  ;;  %vm5742_vm15 = vcmp.lt.s32.totalorder %v3748_v17, 16 }
 0x453   :  { %v5980_v27 = vsel %vm3912_vm2, 4294967295, %v5979_v27  ;;  %v3927_v9 = vsub.f32 %v3786_v2, %v999_v33  ;;  %v3932_v59 = vsub.f32 %v3756_v58, %v1007_v26  ;;  %v1188_v49 = vsel %vm1187_vm14, %v1172_v24, 15  ;;  %vm1145_vm13 = vmand %vm1129_vm11, %vm5742_vm15 }
 0x454   :  { %vm1183_vm10 = vcmp.lt.s32.totalorder %v1168_v30, 15  ;;  %vm1153_vm7 = vmand %vm1145_vm13, %vm3643_vm6  ;;  %v3950_v26 = vsub.f32 %v3792_v18, %v997_v3  ;;  %v3955_v24 = vsub.f32 %v3717_v20, %v1005_v28  ;;  %vm1100_vm14 = vcmp.ge.s32.totalorder %v3811_v10, 0 }
 0x455   :  { %1257 = vrot.lane.b32.xlu2 %v1178_v56, %s2710_s27  ;;  %v1067_v56 = vsub.f32 1.0, %v3895_v32  ;;  %v5746_v2 = vsub.f32 1.0, %v3927_v9  ;;  %v3944_v33 = vsel %vm1153_vm7, %v1089_v62, 0.0  ;;  %v5752_v58 = vsub.f32 1.0, %v3932_v59 }
 0x456   :  { %vm1108_vm12 = vcmp.lt.s32.totalorder %v3811_v10, 16  ;;  %vm5744_vm11 = vcmp.ge.s32.totalorder %v3780_v31, 0  ;;  %v5749_v62 = vsub.f32 1.0, %v3950_v26  ;;  %v5982_v20 = vmov 0 }
 0x457   :  { %1265 = vrot.lane.b32.xlu0 %v1186_v6, %s2710_s27  ;;  %v3938_v6 = vmul.f32 %v1067_v56, %v5741_v43  ;;  %v1069_v43 = vsub.f32 1.0, %v3955_v24  ;;  %v1092_v18 = vmul.f32 %v5752_v58, %v5746_v2  ;;  %vm3967_vm13 = vmand %vm1100_vm14, %vm1108_vm12  ;;  %vm5750_vm7 = vcmp.lt.s32.totalorder %v3780_v31, 16 }
 0x458   :  { %v5983_v20 = vsel %vm3967_vm13, 4294967295, %v5982_v20  ;;  %vm1098_vm15 = vcmp.ge.s32.totalorder %v3825_v38, 0  ;;  %vm1106_vm2 = vcmp.lt.s32.totalorder %v3825_v38, 16  ;;  %v3983_v3 = vsub.f32 %v3699_v61, %v993_v44 }
 0x459   :  { %1267 = vrot.lane.b32.xlu1 %v1188_v49, %s2710_s27  ;;  %v1184_v49 = vsel %vm1183_vm10, %v1168_v30, 15  ;;  %v1090_v28 = vmul.f32 %v1069_v43, %v5749_v62  ;;  %vm1132_vm10 = vmand %vm3967_vm13, %vm5744_vm11  ;;  %v3986_v30 = vadd.s32 1, %v3764_v54  ;;  %vm5753_vm12 = vcmp.ge.s32.totalorder %v3729_v4, 0 }
 0x45a   :  { %vm1148_vm14 = vmand %vm1132_vm10, %vm5750_vm7  ;;  %v5984_v2 = vmov 0  ;;  %v4000_v61 = vadd.s32 1, %v3776_v63  ;;  %vm5751_vm10 = vcmp.lt.s32.totalorder %v3729_v4, 16  ;;  %v4010_v44 = vsub.f32 %v3701_v7, %v1001_v22 }
 0x45b   :  { %vm1156_vm11 = vmand %vm1148_vm14, %vm3683_vm8  ;;  %vm1430_vm14 = vcmp.lt.s32.totalorder %v3986_v30, 16  ;;  %v4025_v7 = vadd.s32 1, %v3710_v50  ;;  %vm5759_vm7 = vcmp.lt.s32.totalorder %v3721_v40, 16  ;;  %v5986_v22 = vmov 0 }
 0x45c   :  { %vm3995_vm13 = vmand %vm1098_vm15, %vm1106_vm2  ;;  %vm1422_vm15 = vcmp.ge.s32.totalorder %v3986_v30, 0  ;;  %v1065_v63 = vsub.f32 1.0, %v4010_v44  ;;  %v1413_v50 = vmul.f32 %v1064_v36, %v3833_v57  ;;  %v5989_v21 = vmov 0 }
 0x45d   :  { %1263 = vrot.lane.b32.xlu2 %v1184_v49, %s2710_s27  ;;  %v3993_v49 = vsel %vm1156_vm11, %v1092_v18, 0.0  ;;  %v5985_v2 = vsel %vm3995_vm13, 4294967295, %v5984_v2  ;;  %vm1130_vm4 = vmand %vm3995_vm13, %vm5753_vm12  ;;  %v1417_v18 = vmul.f32 %v1068_v51, %v3858_v12  ;;  %vm1433_vm12 = vcmp.lt.s32.totalorder %v4000_v61, 16 }
 0x45e   :  { %vm1146_vm2 = vmand %vm1130_vm4, %vm5751_vm10  ;;  %vm5755_vm4 = vcmp.ge.s32.totalorder %v3721_v40, 0  ;;  %v1414_v58 = vmul.f32 %v1065_v63, %v3983_v3  ;;  %v1416_v51 = vmul.f32 %v1067_v56, %v3890_v13  ;;  %v4056_v16 = vadd.s32 1, %v3772_v0 }
 0x45f   :  { %vm1154_vm11 = vmand %vm1146_vm2, %vm3630_vm5  ;;  %vm5992_vm13 = vcmp.ge.s32.totalorder %v3748_v17, 0  ;;  %v4075_v56 = vadd.s32 1, %v3825_v38  ;;  %v4185_v48 = vmul.f32 %v3895_v32, %v3890_v13 }
 0x460   :  { %v4022_v62 = vsel %vm1154_vm11, %v1090_v28, 0.0  ;;  %vm4029_vm10 = vmand %vm1422_vm15, %vm1430_vm14  ;;  %vm1425_vm11 = vcmp.ge.s32.totalorder %v4000_v61, 0  ;;  %v1418_v28 = vmul.f32 %v1069_v43, %v3950_v26  ;;  %5991 = vst [vmem:[#allocation98_spill] sm:$0xff] %v4056_v16  ;;  %vm1424_vm8 = vcmp.ge.s32.totalorder %v4056_v16, 0 }
 0x461   :  { %v5987_v22 = vsel %vm4029_vm10, 4294967295, %v5986_v22  ;;  %vm1446_vm2 = vmand %vm4029_vm10, %vm5755_vm4  ;;  %vm5993_vm10 = vcmp.lt.s32.totalorder %v3748_v17, 16  ;;  %5997 = vst [vmem:[#allocation107_spill] sm:$0xff] %v4075_v56  ;;  %v4163_v43 = vmul.f32 %v4010_v44, %v3983_v3 }
 0x462   :  { %vm1454_vm15 = vmand %vm1446_vm2, %vm5759_vm7  ;;  %vm1421_vm7 = vcmp.ge.s32.totalorder %v4025_v7, 0 }
 0x463   :  { %vm1462_vm14 = vmand %vm1454_vm15, %vm3591_vm3  ;;  %vm1429_vm15 = vcmp.lt.s32.totalorder %v4025_v7, 16 }
 0x464   :  { %v4049_v34 = vsel %vm1462_vm14, %v1414_v58, 0.0  ;;  %vm4051_vm4 = vmand %vm1425_vm11, %vm1433_vm12  ;;  %v6000_v58 = vsub.f32 1.0, %v3833_v57 }
 0x465   :  { %5988 = vst [vmem:[#allocation103_spill] sm:$0xff] %v4049_v34  ;;  %v5990_v21 = vsel %vm4051_vm4, 4294967295, %v5989_v21  ;;  %vm1449_vm2 = vmand %vm4051_vm4, %vm5992_vm13  ;;  %vm5998_vm13 = vcmp.ge.s32.totalorder %v3652_v11, 0  ;;  %v4099_v34 = vadd.s32 1, %v3652_v11 }
 0x466   :  { %vm1457_vm14 = vmand %vm1449_vm2, %vm5993_vm10  ;;  %vm1432_vm10 = vcmp.lt.s32.totalorder %v4056_v16, 16  ;;  %vm5999_vm2 = vcmp.lt.s32.totalorder %v3652_v11, 16  ;;  %v1693_v38 = vmul.f32 %v3840_v39, %v6000_v58  ;;  %v6006_v11 = vmov 0 }
 0x467   :  { %vm1465_vm12 = vmand %vm1457_vm14, %vm3643_vm6  ;;  %6004 = vst [vmem:[#allocation105_spill] sm:$0xff] %v4099_v34  ;;  %v1981_v58 = vmul.f32 %v3840_v39, %v3833_v57  ;;  %v6011_v57 = vfloor.f32 %v3759_v15 }
 0x468   :  { %v4068_v36 = vsel %vm1465_vm12, %v1417_v18, 0.0  ;;  %vm4070_vm11 = vmand %vm1421_vm7, %vm1429_vm15  ;;  %vm5764_vm15 = vcmp.ge.s32.totalorder %v3691_v19, 0 }
 0x469   :  { %5994 = vst [vmem:[#allocation104_spill] sm:$0xff] %v4068_v36  ;;  %vm1445_vm4 = vmand %vm4070_vm11, %vm5998_vm13  ;;  %v6002_v36 = vmov 0  ;;  %vm5768_vm13 = vcmp.lt.s32.totalorder %v3691_v19, 16  ;;  %v1046_v39 = vsub.f32 %v3759_v15, %v6011_v57  ;;  %v6015_v15 = vsub.f32 1.0, %v3932_v59 }
 0x46a   :  { %vm1453_vm14 = vmand %vm1445_vm4, %vm5999_vm2  ;;  %vm1426_vm2 = vcmp.ge.s32.totalorder %v4075_v56, 0  ;;  %v4170_v57 = vadd.s32 1, %v3795_v25 }
 0x46b   :  { %vm1461_vm7 = vmand %vm1453_vm14, %vm3532_vm0  ;;  %vm1434_vm14 = vcmp.lt.s32.totalorder %v4075_v56, 16  ;;  %v6012_v56 = vfloor.f32 %v3723_v45  ;;  %v4154_v53 = vmul.f32 %v6015_v15, %v3927_v9 }
 0x46c   :  { %v4091_v18 = vsel %vm1461_vm7, %v1413_v50, 0.0  ;;  %vm4093_vm12 = vmand %vm1424_vm8, %vm1432_vm10 }
 0x46d   :  { %6001 = vst [vmem:[#allocation102_spill] sm:$0xff] %v4091_v18  ;;  %v6003_v36 = vsel %vm4093_vm12, 4294967295, %v6002_v36  ;;  %vm1448_vm4 = vmand %vm4093_vm12, %vm5764_vm15  ;;  %vm6008_vm15 = vcmp.ge.s32.totalorder %v3729_v4, 0  ;;  %vm1701_vm12 = vcmp.ge.s32.totalorder %v4099_v34, 0  ;;  %v1049_v18 = vsub.f32 1.0, %v3983_v3 }
 0x46e   :  { %vm1456_vm8 = vmand %vm1448_vm4, %vm5768_vm13  ;;  %vm6009_vm4 = vcmp.lt.s32.totalorder %v3729_v4, 16  ;;  %v6021_v3 = vsub.f32 1.0, %v3814_v14 }
 0x46f   :  { %vm1464_vm10 = vmand %vm1456_vm8, %vm3579_vm1 }
 0x470   :  { %v4111_v50 = vsel %vm1464_vm10, %v1416_v51, 0.0  ;;  %vm4113_vm7 = vmand %vm1426_vm2, %vm1434_vm14  ;;  %vm1717_vm2 = vcmp.lt.s32.totalorder %v4099_v34, 16  ;;  %v1086_v51 = vmul.f32 %v1065_v63, %v1049_v18  ;;  %v1062_v34 = vsub.f32 %v3723_v45, %v6012_v56 }
 0x471   :  { %6005 = vst [vmem:[#allocation99_spill] sm:$0xff] %v4111_v50  ;;  %v6007_v11 = vsel %vm4113_vm7, 4294967295, %v6006_v11  ;;  %vm1450_vm6 = vmand %vm4113_vm7, %vm6008_vm15  ;;  %v6013_v63 = vsub.f32 1.0, %v3819_v8  ;;  %v4157_v45 = vmul.f32 %v4010_v44, %v1049_v18  ;;  %v4190_v44 = vmul.f32 %v3819_v8, %v6021_v3 }
 0x472   :  { %vm1458_vm8 = vmand %vm1450_vm6, %vm6009_vm4  ;;  %v4196_v18 = vmul.f32 %v3819_v8, %v3814_v14  ;;  %v4210_v3 = vadd.s32 1, %v3803_v47  ;;  %v4232_v8 = vadd.s32 1, %v3811_v10  ;;  %v6031_v10 = vsub.f32 1.0, %v3858_v12 }
 0x473   :  { %vm1466_vm14 = vmand %vm1458_vm8, %vm3630_vm5  ;;  %vm1103_vm5 = vcmp.lt.s32.totalorder %v3795_v25, 16 }
 0x474   :  { %v4130_v50 = vsel %vm1466_vm14, %v1418_v28, 0.0  ;;  %vm1709_vm10 = vmand %vm3866_vm9, %vm1701_vm12  ;;  %v1415_v28 = vmul.f32 %v6013_v63, %v3814_v14  ;;  %vm1094_vm9 = vcmp.ge.s32.totalorder %v3764_v54, 0  ;;  %vm1107_vm14 = vcmp.lt.s32.totalorder %v3803_v47, 16 }
 0x475   :  { %6010 = vst [vmem:[#allocation106_spill] sm:$0xff] %v4130_v50  ;;  %vm1725_vm13 = vmand %vm1709_vm10, %vm1717_vm2  ;;  %vm6020_vm10 = vcmp.lt.s32.totalorder %v3721_v40, 16  ;;  %v6028_v14 = vmov 0 }
 0x476   :  { %vm1733_vm15 = vmand %vm1725_vm13, %vm3532_vm0  ;;  %vm1102_vm13 = vcmp.lt.s32.totalorder %v3764_v54, 16  ;;  %v1054_v54 = vsub.f32 1.0, %v1046_v39 }
 0x477   :  { %v4145_v50 = vsel %vm1733_vm15, %v1693_v38, 0.0  ;;  %vm1989_vm6 = vmand %vm4070_vm11, %vm1701_vm12  ;;  %v1070_v38 = vsub.f32 1.0, %v1062_v34  ;;  %vm6019_vm12 = vcmp.ge.s32.totalorder %v3721_v40, 0 }
 0x478   :  { %6014 = vst [vmem:[#allocation100_spill] sm:$0xff] %v4145_v50  ;;  %vm1997_vm4 = vmand %vm1989_vm6, %vm1717_vm2  ;;  %vm1099_vm2 = vcmp.ge.s32.totalorder %v3803_v47, 0  ;;  %vm1123_vm6 = vcmp.ge.s32.totalorder %v3735_v23, 0  ;;  %v6025_v50 = vsub.f32 1.0, %v3890_v13  ;;  %v4242_v13 = vmul.f32 %v3863_v41, %v3858_v12 }
 0x479   :  { %vm2005_vm8 = vmand %vm1997_vm4, %vm3532_vm0  ;;  %v1091_v15 = vmul.f32 %v1070_v38, %v1054_v54  ;;  %v4271_v12 = vadd.s32 1, %v3721_v40 }
 0x47a   :  { %vm4165_vm11 = vmand %vm1094_vm9, %vm1102_vm13  ;;  %v4172_v63 = vsel %vm2005_vm8, %v1981_v58, 0.0  ;;  %v4207_v16 = vmul.f32 %v3895_v32, %v6025_v50  ;;  %vm5776_vm8 = vcmp.lt.s32.totalorder %v3735_v23, 16  ;;  %v4246_v32 = vmul.f32 %v1062_v34, %v1054_v54 }
 0x47b   :  { %6018 = vst [vmem:[#allocation109_spill] sm:$0xff] %v4172_v63  ;;  %vm1126_vm0 = vmand %vm4165_vm11, %vm6019_vm12  ;;  %v6023_v63 = vmov 0  ;;  %vm1423_vm12 = vcmp.ge.s32.totalorder %v4170_v57, 0  ;;  %v4253_v50 = vmul.f32 %v3863_v41, %v6031_v10  ;;  %v4268_v54 = vmul.f32 %v3955_v24, %v3950_v26 }
 0x47c   :  { %vm1142_vm15 = vmand %vm1126_vm0, %vm6020_vm10  ;;  %vm1431_vm0 = vcmp.lt.s32.totalorder %v4170_v57, 16  ;;  %v1419_v41 = vmul.f32 %v1070_v38, %v1046_v39  ;;  %v4325_v38 = vadd.s32 1, %v3681_v42 }
 0x47d   :  { %vm1150_vm9 = vmand %vm1142_vm15, %vm3591_vm3  ;;  %vm5777_vm15 = vcmp.ge.s32.totalorder %v3681_v42, 0 }
 0x47e   :  { %v4198_v58 = vsel %vm1150_vm9, %v1086_v51, 0.0  ;;  %vm4200_vm13 = vmand %vm1099_vm2, %vm1107_vm14  ;;  %vm6026_vm14 = vnez %v5961_v1  ;;  %vm5778_vm9 = vcmp.lt.s32.totalorder %v3681_v42, 16 }
 0x47f   :  { %6022 = vst [vmem:[#allocation101_spill] sm:$0xff] %v4198_v58  ;;  %v6024_v63 = vsel %vm4200_vm13, 4294967295, %v6023_v63  ;;  %vm1131_vm4 = vmand %vm4200_vm13, %vm1123_vm6 }
 0x480   :  { %vm1147_vm2 = vmand %vm1131_vm4, %vm5776_vm8  ;;  %vm1435_vm8 = vcmp.lt.s32.totalorder %v4210_v3, 16 }
 0x481   :  { %vm1155_vm10 = vmand %vm1147_vm2, %vm6026_vm14  ;;  %vm1427_vm2 = vcmp.ge.s32.totalorder %v4210_v3, 0 }
 0x482   :  { %v4225_v47 = vsel %vm1155_vm10, %v1091_v15, 0.0  ;;  %vm4227_vm7 = vmand %vm1423_vm12, %vm1431_vm0  ;;  %vm6030_vm0 = vnez %v5944_v35  ;;  %v6032_v15 = vmov 0 }
 0x483   :  { %6027 = vst [vmem:[#allocation112_spill] sm:$0xff] %v4225_v47  ;;  %v6029_v14 = vsel %vm4227_vm7, 4294967295, %v6028_v14  ;;  %vm1447_vm4 = vmand %vm4227_vm7, %vm5777_vm15  ;;  %v6034_v47 = vsub.f32 1.0, %v3950_v26 }
 0x484   :  { %vm1455_vm12 = vmand %vm1447_vm4, %vm5778_vm9  ;;  %vm1428_vm4 = vcmp.ge.s32.totalorder %v4232_v8, 0  ;;  %vm1095_vm9 = vcmp.ge.s32.totalorder %v3795_v25, 0  ;;  %v5795_v25 = vmov 0  }
 0x485   :  { %vm1463_vm10 = vmand %vm1455_vm12, %vm6030_vm0  ;;  %v4264_v58 = vmul.f32 %v3955_v24, %v6034_v47  ;;  %vm6035_vm12 = vcmp.lt.s32.totalorder %v3735_v23, 16  ;;  %v5786_v24 = vmov 24  }
 0x486   :  { %v4255_v51 = vsel %vm1463_vm10, %v1415_v28, 0.0  ;;  %vm4257_vm15 = vmand %vm1427_vm2, %vm1435_vm8  ;;  %vm1436_vm2 = vcmp.lt.s32.totalorder %v4232_v8, 16  ;;  %v4281_v28 = vmul.f32 %v1062_v34, %v1046_v39  ;;  %2649 = vset.pattern.permute.xlu1 %v5786_v24  ;;  %2648 = vset.pattern.permute.xlu0 %v5786_v24  ;;  %v4309_v34 = vadd.s32 1, %v3691_v19 }
 0x487   :  { %v6033_v15 = vsel %vm4257_vm15, 4294967295, %v6032_v15  ;;  %vm1451_vm8 = vmand %vm4257_vm15, %vm1123_vm6  ;;  %vm1702_vm15 = vcmp.ge.s32.totalorder %v4271_v12, 0  ;;  %2647 = vset.pattern.permute.xlu2 %v5786_v24 }
 0x488   :  { %vm1459_vm10 = vmand %vm1451_vm8, %vm6035_vm12  ;;  %vm6038_vm8 = vcmp.ge.s32.totalorder %v3780_v31, 0 }
 0x489   :  { %vm1467_vm13 = vmand %vm1459_vm10, %vm6026_vm14  ;;  %vm1718_vm10 = vcmp.lt.s32.totalorder %v4271_v12, 16  ;;  %vm6042_vm14 = vnez %v5972_v5 }
 0x48a   :  { %v4287_v40 = vsel %vm1467_vm13, %v1419_v41, 0.0  ;;  %vm4289_vm6 = vmand %vm1428_vm4, %vm1436_vm2  ;;  %vm6041_vm4 = vcmp.lt.s32.totalorder %v3780_v31, 16 }
 0x48b   :  { %vm1452_vm12 = vmand %vm4289_vm6, %vm6038_vm8  ;;  %vm1104_vm8 = vcmp.lt.s32.totalorder %v3772_v0, 16 }
 0x48c   :  { %vm4301_vm13 = vmand %vm1095_vm9, %vm1103_vm5  ;;  %vm1096_vm9 = vcmp.ge.s32.totalorder %v3772_v0, 0 }
 0x48d   :  { %vm1460_vm2 = vmand %vm1452_vm12, %vm6041_vm4 }
 0x48e   :  { %vm1468_vm7 = vmand %vm1460_vm2, %vm6042_vm14  ;;  %vm1704_vm2 = vcmp.ge.s32.totalorder %v4309_v34, 0 }
 0x48f   :  { %v4314_v39 = vsel %vm1468_vm7, %v4154_v53, 0.0  ;;  %vm1710_vm5 = vmand %vm4165_vm11, %vm1702_vm15  ;;  %vm6043_vm7 = vnez %v5987_v22 }
 0x490   :  { %vm1726_vm12 = vmand %vm1710_vm5, %vm1718_vm10 }
 0x491   :  { %vm1734_vm4 = vmand %vm1726_vm12, %vm3591_vm3 }
 0x492   :  { %v4332_v47 = vsel %vm1734_vm4, %v4157_v45, 0.0  ;;  %vm1990_vm11 = vmand %vm6043_vm7, %vm1702_vm15  ;;  %vm1720_vm4 = vcmp.lt.s32.totalorder %v4309_v34, 16  ;;  %vm6046_vm15 = vnez %v6003_v36  ;;  %v4369_v36 = vadd.s32 1, %v3735_v23 }
 0x493   :  { %vm4339_vm14 = vmand %vm1096_vm9, %vm1104_vm8  ;;  %vm1703_vm9 = vcmp.ge.s32.totalorder %v4325_v38, 0  ;;  %v4384_v23 = vadd.s32 1, %v3748_v17 }
 0x494   :  { %vm1998_vm5 = vmand %vm1990_vm11, %vm1718_vm10  ;;  %vm1719_vm10 = vcmp.lt.s32.totalorder %v4325_v38, 16 }
 0x495   :  { %vm2006_vm12 = vmand %vm1998_vm5, %vm3591_vm3 }
 0x496   :  { %v4348_v45 = vsel %vm2006_vm12, %v4163_v43, 0.0  ;;  %vm1992_vm7 = vmand %vm6046_vm15, %vm1704_vm2  ;;  %vm6047_vm15 = vnez %v6029_v14 }
 0x497   :  { %v4329_v53 = vpop.permute.xlu2 %1231  ;;  %vm2000_vm8 = vmand %vm1992_vm7, %vm1720_vm4 }
 0x498   :  { %vm2008_vm3 = vmand %vm2000_vm8, %vm3579_vm1 }
 0x499   :  { %v4362_v52 = vsel %vm2008_vm3, %v4185_v48, 0.0  ;;  %vm1711_vm11 = vmand %vm4301_vm13, %vm1703_vm9  ;;  %v2689_v48 = vld [vmem:[%s5700_s1 + $0x10] sm:$0xff] }
 0x49a   :  { %vm1727_vm5 = vmand %vm1711_vm11, %vm1719_vm10  ;;  %v2600_v10 = vceil.f32 %v2689_v48  ;;  %v2601_v41 = vfloor.f32 %v2689_v48  ;;  %vm2599_vm3 = vcmp.lt.s32.totalorder %v2689_v48, 0 }
 0x49b   :  { %vm1735_vm12 = vmand %vm1727_vm5, %vm6030_vm0  ;;  %vm5788_vm5 = vcmp.ge.s32.totalorder %v4369_v36, 0 }
 0x49c   :  { %v4374_v43 = vsel %vm1735_vm12, %v4190_v44, 0.0  ;;  %vm1991_vm7 = vmand %vm6047_vm15, %vm1703_vm9  ;;  %vm5785_vm12 = vcmp.lt.s32.totalorder %v4369_v36, 16  ;;  %v4399_v17 = vsel %vm2599_vm3, %v2600_v10, %v2601_v41  ;;  %vm1721_vm3 = vcmp.lt.s32.totalorder %v4384_v23, 16 }
 0x49d   :  { %v4378_v56 = vpop.permute.xlu1 %1229  ;;  %vm1999_vm8 = vmand %vm1991_vm7, %vm1719_vm10  ;;  %vm6050_vm7 = vnez %v6024_v63  ;;  %v5789_v48 = vcvt.f32.s32 %v4399_v17 }
 0x49e   :  { %vm2007_vm11 = vmand %vm1999_vm8, %vm6030_vm0  ;;  %vm1705_vm8 = vcmp.ge.s32.totalorder %v4384_v23, 0 }
 0x49f   :  { %v4366_v22 = vpop.permute.xlu2 %1237  ;;  %v4389_v44 = vsel %vm2007_vm11, %v4196_v18, 0.0  ;;  %vm1712_vm9 = vmand %vm4339_vm14, %vm1704_vm2  ;;  %vm6051_vm11 = vnez %v5961_v1 }
 0x4a0   :  { %6048 = vst [vmem:[#allocation108_spill] sm:$0xff] %v4389_v44  ;;  %vm1728_vm10 = vmand %vm1712_vm9, %vm1720_vm4  ;;  %v4476_v44 = vadd.s32 1, %v3780_v31 }
 0x4a1   :  { %vm1736_vm15 = vmand %vm1728_vm10, %vm3579_vm1  ;;  %vm6053_vm10 = vnez %v5980_v27  ;;  %v2690_v27 = vld [vmem:[%s5700_s1] sm:$0xff] }
 0x4a2   :  { %v4404_v18 = vsel %vm1736_vm15, %v4207_v16, 0.0  ;;  %vm1715_vm2 = vmand %vm6050_vm7, %vm5788_vm5  ;;  %v4418_v16 = vadd.s32 1, %v3729_v4  ;;  %v2590_v24 = vceil.f32 %v2690_v27 }
 0x4a3   :  { %6049 = vst [vmem:[#allocation115_spill] sm:$0xff] %v4404_v18  ;;  %vm1731_vm4 = vmand %vm1715_vm2, %vm5785_vm12  ;;  %vm6054_vm2 = vnez %v5965_v60 }
 0x4a4   :  { %vm1739_vm9 = vmand %vm1731_vm4, %vm6051_vm11  ;;  %vm6056_vm4 = vnez %v5990_v21  ;;  %v2691_v21 = vld [vmem:[%s5700_s1 + $0x8] sm:$0xff] }
 0x4a5   :  { %v4423_v63 = vsel %vm1739_vm9, %v4246_v32, 0.0  ;;  %vm1713_vm15 = vmand %vm6053_vm10, %vm1705_vm8  ;;  %vm1706_vm10 = vcmp.ge.s32.totalorder %v4418_v16, 0 }
 0x4a6   :  { %6052 = vst [vmem:[#allocation110_spill] sm:$0xff] %v4423_v63  ;;  %vm1729_vm7 = vmand %vm1713_vm15, %vm1721_vm3  ;;  %v2591_v63 = vfloor.f32 %v2690_v27 }
 0x4a7   :  { %v4411_v14 = vpop.permute.xlu2 %1243  ;;  %vm1737_vm12 = vmand %vm1729_vm7, %vm6054_vm2  ;;  %vm1722_vm7 = vcmp.lt.s32.totalorder %v4418_v16, 16 }
 0x4a8   :  { %v1234_v10 = vpop.permute.xlu0 %1233  ;;  %v4440_v32 = vsel %vm1737_vm12, %v4253_v50, 0.0  ;;  %vm1993_vm9 = vmand %vm6056_vm4, %vm1705_vm8  ;;  %vm2589_vm12 = vcmp.lt.s32.totalorder %v2690_v27, 0  ;;  %v2595_v50 = vceil.f32 %v2691_v21  ;;  %vm6058_vm8 = vnez %v5985_v2 }
 0x4a9   :  { %v4437_v4 = vadd.s32 %v5789_v48, %v1234_v10  ;;  %6055 = vst [vmem:[#allocation111_spill] sm:$0xff] %v4440_v32  ;;  %vm2001_vm15 = vmand %vm1993_vm9, %vm1721_vm3  ;;  %v2596_v10 = vfloor.f32 %v2691_v21  ;;  %vm2594_vm4 = vcmp.lt.s32.totalorder %v2691_v21, 0  ;;  %v4471_v27 = vsel %vm2589_vm12, %v2590_v24, %v2591_v63 }
 0x4aa   :  { %vm2009_vm5 = vmand %vm2001_vm15, %vm6054_vm2  ;;  %vm6061_vm15 = vnez %v6007_v11  ;;  %v5790_v31 = vcvt.f32.s32 %v4471_v27 }
 0x4ab   :  { %v4431_v41 = vpop.permute.xlu1 %1235  ;;  %v4461_v32 = vsel %vm2009_vm5, %v4242_v13, 0.0  ;;  %vm1714_vm3 = vmand %vm6058_vm8, %vm1706_vm10  ;;  %vm6059_vm5 = vnez %v5963_v55  ;;  %v4487_v13 = vsel %vm2594_vm4, %v2595_v50, %v2596_v10  ;;  %vm6064_vm4 = vnez %v6033_v15  ;;  %v2693_v55 = vld [vmem:[%s5700_s1 + $0x20] sm:$0xff] }
 0x4ac   :  { %6057 = vst [vmem:[#allocation113_spill] sm:$0xff] %v4461_v32  ;;  %vm1730_vm2 = vmand %vm1714_vm3, %vm1722_vm7  ;;  %v5791_v50 = vcvt.f32.s32 %v4487_v13  ;;  %v2610_v10 = vceil.f32 %v2693_v55  ;;  %v4518_v15 = vadd.s32 %v5790_v31, %v4378_v56 }
 0x4ad   :  { %vm1738_vm9 = vmand %vm1730_vm2, %vm6059_vm5 }
 0x4ae   :  { %v4481_v2 = vsel %vm1738_vm9, %v4264_v58, 0.0  ;;  %vm1994_vm8 = vmand %vm6061_vm15, %vm1706_vm10  ;;  %v2692_v58 = vld [vmem:[%s5700_s1 + $0x18] sm:$0xff]  ;;  %vm6063_vm10 = vcmp.ge.s32.totalorder %v4369_v36, 0 }
 0x4af   :  { %v4458_v48 = vpop.permute.xlu2 %1257  ;;  %6060 = vst [vmem:[#allocation125_spill] sm:$0xff] %v4481_v2  ;;  %vm2002_vm12 = vmand %vm1994_vm8, %vm1722_vm7  ;;  %v2605_v63 = vceil.f32 %v2692_v58  ;;  %v2606_v21 = vfloor.f32 %v2692_v58  ;;  %vm1708_vm7 = vcmp.ge.s32.totalorder %v4476_v44, 0  ;;  %vm2604_vm9 = vcmp.lt.s32.totalorder %v2692_v58, 0 }
 0x4b0   :  { %v1271_v60 = vadd.s32 %v4458_v48, %v4437_v4  ;;  %vm2010_vm3 = vmand %vm2002_vm12, %vm6059_vm5  ;;  %vm6065_vm5 = vcmp.lt.s32.totalorder %v4369_v36, 16  ;;  %vm2609_vm12 = vcmp.lt.s32.totalorder %v2693_v55, 0 }
 0x4b1   :  { %v4473_v18 = vpop.permute.xlu0 %1239  ;;  %v4500_v11 = vsel %vm2010_vm3, %v4268_v54, 0.0  ;;  %vm1995_vm2 = vmand %vm6064_vm4, %vm6063_vm10  ;;  %v2611_v54 = vfloor.f32 %v2693_v55  ;;  %vm1724_vm3 = vcmp.lt.s32.totalorder %v4476_v44, 16  ;;  %v4528_v58 = vsel %vm2604_vm9, %v2605_v63, %v2606_v21  ;;  %v2694_v63 = vld [vmem:[%s5700_s1 + $0x28] sm:$0xff] }
 0x4b2   :  { %1292 = vperm.xlu1 %2649, %v1271_v60   ;;  %6062 = vst [vmem:[#allocation114_spill] sm:$0xff] %v4500_v11  ;;  %vm2003_vm15 = vmand %vm1995_vm2, %vm6065_vm5  ;;  %v1988_v55 = vmul.f32 %v3932_v59, %v3927_v9  ;;  %v2615_v21 = vceil.f32 %v2694_v63  ;;  %v2616_v31 = vfloor.f32 %v2694_v63  ;;  %vm6069_vm2 = vnez %v5983_v20 }
 0x4b3   :  { %v4489_v24 = vpop.permute.xlu1 %1241  ;;  %vm2011_vm8 = vmand %vm2003_vm15, %vm6051_vm11  ;;  %v4545_v26 = vsel %vm2609_vm12, %v2610_v10, %v2611_v54  ;;  %vm2614_vm5 = vcmp.lt.s32.totalorder %v2694_v63, 0  ;;  %v6070_v54 = vsub.f32 1.0, %v3927_v9  ;;  %v2696_v9 = vld [vmem:[%s5700_s1 + $0x38] sm:$0xff] }
 0x4b4   :  { %v4521_v60 = vsel %vm2011_vm8, %v4281_v28, 0.0  ;;  %vm1996_vm10 = vmand %vm4289_vm6, %vm1708_vm7  ;;  %v4539_v28 = vadd.s32 %v5791_v50, %v4329_v53  ;;  %vm6067_vm6 = vnez %v5972_v5  ;;  %v4578_v2 = vsel %vm2614_vm5, %v2615_v21, %v2616_v31 }
 0x4b5   :  { %6066 = vst [vmem:[#allocation122_spill] sm:$0xff] %v4521_v60  ;;  %vm2004_vm11 = vmand %vm1996_vm10, %vm1724_vm3  ;;  %v1700_v50 = vmul.f32 %v3932_v59, %v6070_v54  ;;  %v2625_v59 = vceil.f32 %v2696_v9  ;;  %v2626_v54 = vfloor.f32 %v2696_v9  ;;  %vm2624_vm12 = vcmp.lt.s32.totalorder %v2696_v9, 0 }
 0x4b6   :  { %vm2012_vm4 = vmand %vm2004_vm11, %vm6067_vm6  ;;  %v6072_v5 = vcvt.f32.s32 %v4528_v58  ;;  %vm6075_vm10 = vcmp.ge.s32.totalorder %v3681_v42, 0  ;;  %vm1477_vm5 = vcmp.gt.s32.totalorder %v4000_v61, 0 }
 0x4b7   :  { %v4552_v11 = vsel %vm2012_vm4, %v1988_v55, 0.0  ;;  %vm1716_vm9 = vmand %vm6069_vm2, %vm1708_vm7  ;;  %v2695_v55 = vld [vmem:[%s5700_s1 + $0x30] sm:$0xff]  ;;  %v4597_v63 = vsel %vm2624_vm12, %v2625_v59, %v2626_v54  ;;  %v4615_v59 = vpop.permute.xlu2 %1263  ;;  %vm1483_vm12 = vcmp.gt.s32.totalorder %v4232_v8, 0 }
 0x4b8   :  { %6068 = vst [vmem:[#allocation116_spill] sm:$0xff] %v4552_v11  ;;  %vm1732_vm15 = vmand %vm1716_vm9, %vm1724_vm3  ;;  %v2620_v20 = vceil.f32 %v2695_v55  ;;  %v2621_v11 = vfloor.f32 %v2695_v55  ;;  %vm2619_vm8 = vcmp.lt.s32.totalorder %v2695_v55, 0  ;;  %v4583_v32 = vadd.s32 %v6072_v5, %v4431_v41 }
 0x4b9   :  { %v4530_v1 = vpop.permute.xlu0 %1253  ;;  %vm1740_vm7 = vmand %vm1732_vm15, %vm6067_vm6  ;;  %vm1471_vm3 = vcmp.gt.s32.totalorder %v3986_v30, 0  ;;  %vm6076_vm6 = vcmp.lt.s32.totalorder %v3681_v42, 16  ;;  %vm6077_vm15 = vcmp.ge.s32.totalorder %v3691_v19, 0  ;;  %v1478_v42 = vsel %vm1477_vm5, %v4000_v61, 0 }
 0x4ba   :  { %v1269_v56 = vadd.s32 %v4530_v1, %v4518_v15  ;;  %v4585_v53 = vsel %vm2619_vm8, %v2620_v20, %v2621_v11  ;;  %v5793_v20 = vcvt.f32.s32 %v4597_v63  ;;  %vm1127_vm11 = vmand %vm4301_vm13, %vm6075_vm10  ;;  %vm1493_vm8 = vcmp.lt.s32.totalorder %v1478_v42, 15 }
 0x4bb   :  { %v4550_v60 = vpop.permute.xlu1 %1255  ;;  %v5792_v41 = vcvt.f32.s32 %v4585_v53  ;;  %vm1143_vm4 = vmand %vm1127_vm11, %vm6076_vm6  ;;  %v1484_v61 = vsel %vm1483_vm12, %v4232_v8, 0  ;;  %vm1469_vm10 = vcmp.gt.s32.totalorder %v4025_v7, 0  ;;  %v6080_v8 = vld [vmem:[#allocation107_spill] sm:$0xff] }
 0x4bc   :  { %v1270_v10 = vadd.s32 %v4550_v60, %v4539_v28  ;;  %1286 = vperm.xlu2 %2647, %v1269_v56   ;;  %v4572_v56 = vsel %vm1740_vm7, %v1700_v50, 0.0  ;;  %v6073_v50 = vcvt.f32.s32 %v4545_v26  ;;  %v4622_v5 = vadd.s32 %v5793_v20, %v4411_v14  ;;  %vm1151_vm9 = vmand %vm1143_vm4, %vm6030_vm0 }
 0x4bd   :  { %6071 = vst [vmem:[#allocation117_spill] sm:$0xff] %v4572_v56  ;;  %v5794_v56 = vcvt.f32.s32 %v4578_v2  ;;  %v4613_v9 = vadd.s32 %v5792_v41, %v4489_v24  ;;  %v1472_v14 = vsel %vm1471_vm3, %v3986_v30, 0  ;;  %vm1128_vm7 = vmand %vm4339_vm14, %vm6077_vm15  ;;  %v1279_v35 = vsel %vm1151_vm9, %v3848_v29, 0.0 }
 0x4be   :  { %1289 = vperm.xlu0 %2648, %v1270_v10   ;;  %v4592_v55 = vadd.s32 %v6073_v50, %v4366_v22  ;;  %vm1487_vm2 = vcmp.lt.s32.totalorder %v1472_v14, 15  ;;  %vm6078_vm0 = vcmp.lt.s32.totalorder %v3691_v19, 16  ;;  %v1494_v30 = vsel %vm1493_vm8, %v1478_v42, 15 }
 0x4bf   :  { %v4608_v22 = vadd.s32 %v5794_v56, %v4473_v18  ;;  %vm1144_vm13 = vmand %vm1128_vm7, %vm6078_vm0  ;;  %vm1499_vm3 = vcmp.lt.s32.totalorder %v1484_v61, 15  ;;  %v1470_v46 = vsel %vm1469_vm10, %v4025_v7, 0  ;;  %vm1481_vm15 = vcmp.gt.s32.totalorder %v4210_v3, 0 }
 0x4c0   :  { %vm1152_vm14 = vmand %vm1144_vm13, %vm3579_vm1  ;;  %v1500_v19 = vsel %vm1499_vm3, %v1484_v61, 15  ;;  %vm1473_vm1 = vcmp.gt.s32.totalorder %v4170_v57, 0  ;;  %vm1485_vm11 = vcmp.lt.s32.totalorder %v1470_v46, 15  ;;  %v1080_v42 = vlaneseq }
 0x4c1   :  { %v4587_v10 = vpop.permute.xlu0 %1259  ;;  %v1274_v50 = vadd.s32 %v4615_v59, %v4608_v22  ;;  %v1474_v29 = vsel %vm1473_vm1, %v4170_v57, 0 }
 0x4c2   :  { %v1272_v31 = vadd.s32 %v4587_v10, %v4583_v32  ;;  %vm1489_vm6 = vcmp.lt.s32.totalorder %v1474_v29, 15 }
 0x4c3   :  { %v4599_v21 = vpop.permute.xlu1 %1261  ;;  %v1490_v0 = vsel %vm1489_vm6, %v1474_v29, 15 }
 0x4c4   :  { %v1273_v11 = vadd.s32 %v4599_v21, %v4592_v55  ;;  %1295 = vperm.xlu2 %2647, %v1272_v31  }
 0x4c6   :  { %1298 = vperm.xlu1 %2649, %v1273_v11   ;;  %v1488_v11 = vsel %vm1487_vm2, %v1472_v14, 15  ;;  %vm1479_vm2 = vcmp.gt.s32.totalorder %v6080_v8, 0 }
 0x4c9   :  { %v4617_v54 = vpop.permute.xlu0 %1265 }
 0x4ca   :  { %v1275_v18 = vadd.s32 %v4617_v54, %v4613_v9 }
 0x4cb   :  { %v4629_v31 = vpop.permute.xlu1 %1267 }
 0x4cc   :  { %6074 = vst [vmem:[#allocation124_spill] sm:$0xff] %v4629_v31  ;;  %v1276_v24 = vadd.s32 %v4629_v31, %v4622_v5  ;;  %1301 = vperm.xlu2 %2647, %v1274_v50   ;;  %1304 = vperm.xlu0 %2648, %v1275_v18   ;;  %v6081_v50 = vmov 24   ;;  %v1482_v18 = vsel %vm1481_vm15, %v4210_v3, 0  ;;  %v6098_v31 = vmov 0  }
 0x4cd   :  { %vm1497_vm7 = vcmp.lt.s32.totalorder %v1482_v18, 15 }
 0x4ce   :  { %1307 = vperm.xlu1 %2649, %v1276_v24   ;;  %v1498_v24 = vsel %vm1497_vm7, %v1482_v18, 15 }
 0x4d4   :  { %2650 = vset.pattern.permute.xlu2 %v5795_v25  ;;  %1503 = vrot.lane.b32.xlu0 %v1488_v11, %s2710_s27 }
 0x4d5   :  { %1343 = vperm.xlu2 %2650, %v3908_v37   ;;  %v1280_v37 = vsel %vm1152_vm14, %v3938_v6, 0.0  ;;  %v6079_v6 = vld [vmem:[#allocation98_spill] sm:$0xff] }
 0x4d6   :  { %2651 = vset.pattern.permute.xlu1 %v5795_v25  ;;  %vm1475_vm4 = vcmp.gt.s32.totalorder %v6079_v6, 0 }
 0x4d7   :  { %1353 = vperm.xlu1 %2651, %v1279_v35  }
 0x4dc   :  { %1509 = vrot.lane.b32.xlu0 %v1494_v30, %s2710_s27  ;;  %v4682_v30 = vand.u32 127, %v1080_v42 }
 0x4dd   :  { %1358 = vperm.xlu2 %2650, %v1280_v37  }
 0x4de   :  { %v4685_v37 = vadd.s32 128, %v4682_v30  ;;  %v4688_v61 = vadd.s32 256, %v4682_v30  ;;  %v4691_v3 = vadd.s32 384, %v4682_v30 }
 0x4df   :  { %1363 = vperm.xlu1 %2651, %v3944_v33   ;;  %v1486_v33 = vsel %vm1485_vm11, %v1470_v46, 15 }
 0x4e4   :  { %1515 = vrot.lane.b32.xlu0 %v1500_v19, %s2710_s27 }
 0x4e5   :  { %1368 = vperm.xlu2 %2650, %v4022_v62   ;;  %v1476_v62 = vsel %vm1475_vm4, %v6079_v6, 0 }
 0x4e6   :  { %vm1491_vm9 = vcmp.lt.s32.totalorder %v1476_v62, 15 }
 0x4e7   :  { %1378 = vperm.xlu1 %2651, %v3993_v49   ;;  %v1480_v49 = vsel %vm1479_vm2, %v6080_v8, 0  ;;  %v1492_v7 = vsel %vm1491_vm9, %v1476_v62, 15 }
 0x4e8   :  { %vm1495_vm5 = vcmp.lt.s32.totalorder %v1480_v49, 15 }
 0x4e9   :  { %v1496_v57 = vsel %vm1495_vm5, %v1480_v49, 15 }
 0x4ed   :  { %1501 = vrot.lane.b32.xlu2 %v1486_v33, %s2710_s27 }
 0x4ee   :  { %2653 = vset.pattern.permute.xlu2 %v6081_v50 }
 0x4ef   :  { %1505 = vrot.lane.b32.xlu1 %v1490_v0, %s2710_s27 }
 0x4f0   :  { %2652 = vset.pattern.permute.xlu1 %v6081_v50 }
 0x4f5   :  { %1507 = vrot.lane.b32.xlu2 %v1492_v7, %s2710_s27 }
 0x4f7   :  { %1511 = vrot.lane.b32.xlu1 %v1496_v57, %s2710_s27 }
 0x4fd   :  { %1513 = vrot.lane.b32.xlu2 %v1498_v24, %s2710_s27 }
 0x516   :  { %v1287_v14 = vpop.permute.xlu2 %1286 }
 0x517   :  { %vm1309_vm0 = vcmp.eq.s32.totalorder %v4682_v30, %v1287_v14  ;;  %vm1310_vm13 = vcmp.eq.s32.totalorder %v4685_v37, %v1287_v14  ;;  %vm1311_vm8 = vcmp.eq.s32.totalorder %v4688_v61, %v1287_v14  ;;  %vm1312_vm14 = vcmp.eq.s32.totalorder %v4691_v3, %v1287_v14 }
 0x51e   :  { %v1296_v11 = vpop.permute.xlu2 %1295 }
 0x51f   :  { %vm1321_vm12 = vcmp.eq.s32.totalorder %v4682_v30, %v1296_v11  ;;  %vm1322_vm3 = vcmp.eq.s32.totalorder %v4685_v37, %v1296_v11  ;;  %vm1323_vm10 = vcmp.eq.s32.totalorder %v4688_v61, %v1296_v11  ;;  %vm1324_vm1 = vcmp.eq.s32.totalorder %v4691_v3, %v1296_v11 }
 0x524   :  { %v1293_v46 = vpop.permute.xlu1 %1292 }
 0x525   :  { %vm1317_vm9 = vcmp.eq.s32.totalorder %v4682_v30, %v1293_v46  ;;  %vm1318_vm5 = vcmp.eq.s32.totalorder %v4685_v37, %v1293_v46  ;;  %vm1319_vm15 = vcmp.eq.s32.totalorder %v4688_v61, %v1293_v46  ;;  %vm1320_vm7 = vcmp.eq.s32.totalorder %v4691_v3, %v1293_v46 }
 0x526   :  { %v1302_v35 = vpop.permute.xlu2 %1301 }
 0x527   :  { %vm1329_vm11 = vcmp.eq.s32.totalorder %v4682_v30, %v1302_v35  ;;  %vm1330_vm6 = vcmp.eq.s32.totalorder %v4685_v37, %v1302_v35  ;;  %vm1331_vm4 = vcmp.eq.s32.totalorder %v4688_v61, %v1302_v35  ;;  %vm1332_vm2 = vcmp.eq.s32.totalorder %v4691_v3, %v1302_v35 }
 0x52f   :  { %v1344_v19 = vpop.permute.xlu2 %1343 }
 0x530   :  { %v4697_v29 = vsel %vm1309_vm0, %v1344_v19, 0.0  ;;  %v4699_v6 = vsel %vm1310_vm13, %v1344_v19, 0.0  ;;  %v4701_v33 = vsel %vm1311_vm8, %v1344_v19, 0.0  ;;  %v4703_v8 = vsel %vm1312_vm14, %v1344_v19, 0.0  ;;  %v4705_v0 = vpop.permute.xlu0 %1289 }
 0x531   :  { %6082 = vst [vmem:[#allocation126_spill] sm:$0xff] %v4705_v0 }
 0x537   :  { %v1359_v62 = vpop.permute.xlu2 %1358 }
 0x538   :  { %v1299_v49 = vpop.permute.xlu1 %1298  ;;  %v4711_v7 = vsel %vm1321_vm12, %v1359_v62, 0.0  ;;  %v4713_v57 = vsel %vm1322_vm3, %v1359_v62, 0.0  ;;  %v4715_v18 = vsel %vm1323_vm10, %v1359_v62, 0.0  ;;  %v4717_v24 = vsel %vm1324_vm1, %v1359_v62, 0.0 }
 0x539   :  { %6083 = vst [vmem:[#allocation127_spill] sm:$0xff] %v4715_v18  ;;  %vm1325_vm0 = vcmp.eq.s32.totalorder %v4682_v30, %v1299_v49  ;;  %vm1326_vm13 = vcmp.eq.s32.totalorder %v4685_v37, %v1299_v49  ;;  %vm1327_vm8 = vcmp.eq.s32.totalorder %v4688_v61, %v1299_v49  ;;  %vm1328_vm14 = vcmp.eq.s32.totalorder %v4691_v3, %v1299_v49 }
 0x53a   :  { %6084 = vst [vmem:[#allocation118_spill] sm:$0xff] %v4717_v24  ;;  %v6099_v24 = vld [vmem:[#allocation103_spill] sm:$0xff] }
 0x53e   :  { %v4719_v14 = vpop.permute.xlu0 %1304 }
 0x53f   :  { %6085 = vst [vmem:[#allocation119_spill] sm:$0xff] %v4719_v14  ;;  %v1369_v11 = vpop.permute.xlu2 %1368 }
 0x540   :  { %v1308_v42 = vpop.permute.xlu1 %1307  ;;  %v4725_v19 = vsel %vm1329_vm11, %v1369_v11, 0.0  ;;  %v4727_v41 = vsel %vm1330_vm6, %v1369_v11, 0.0  ;;  %v4729_v20 = vsel %vm1331_vm4, %v1369_v11, 0.0  ;;  %v4731_v62 = vsel %vm1332_vm2, %v1369_v11, 0.0 }
 0x541   :  { %6086 = vst [vmem:[#allocation120_spill] sm:$0xff] %v4725_v19  ;;  %vm1337_vm12 = vcmp.eq.s32.totalorder %v4682_v30, %v1308_v42  ;;  %vm1338_vm3 = vcmp.eq.s32.totalorder %v4685_v37, %v1308_v42  ;;  %vm1339_vm10 = vcmp.eq.s32.totalorder %v4688_v61, %v1308_v42  ;;  %vm1340_vm1 = vcmp.eq.s32.totalorder %v4691_v3, %v1308_v42  ;;  %v6100_v42 = vld [vmem:[#allocation105_spill] sm:$0xff] }
 0x542   :  { %6087 = vst [vmem:[#allocation121_spill] sm:$0xff] %v4727_v41  ;;  %vm1741_vm11 = vcmp.gt.s32.totalorder %v6100_v42, 0  ;;  %vm1751_vm6 = vcmp.gt.s32.totalorder %v4418_v16, 0 }
 0x543   :  { %6088 = vst [vmem:[#allocation123_spill] sm:$0xff] %v4729_v20 }
 0x544   :  { %6089 = vst [vmem:[#allocation98_spill] sm:$0xff] %v4731_v62 }
 0x546   :  { %v4733_v56 = vpop.permute.xlu0 %1503 }
 0x547   :  { %v1518_v25 = vadd.s32 %v4733_v56, %v4539_v28  ;;  %v4737_v14 = vpop.permute.xlu2 %1501 }
 0x548   :  { %v1517_v35 = vadd.s32 %v4737_v14, %v4518_v15 }
 0x549   :  { %v1354_v11 = vpop.permute.xlu1 %1353  ;;  %1537 = vperm.xlu2 %2653, %v1518_v25  }
 0x54a   :  { %v4745_v0 = vsel %vm1317_vm9, %v1354_v11, 0.0  ;;  %v4747_v62 = vsel %vm1318_vm5, %v1354_v11, 0.0  ;;  %v4749_v28 = vsel %vm1319_vm15, %v1354_v11, 0.0  ;;  %v4751_v20 = vsel %vm1320_vm7, %v1354_v11, 0.0  ;;  %1534 = vperm.xlu1 %2652, %v1517_v35  }
 0x54b   :  { %6090 = vst [vmem:[#allocation107_spill] sm:$0xff] %v4745_v0  ;;  %vm1745_vm9 = vcmp.gt.s32.totalorder %v4325_v38, 0  ;;  %vm1749_vm15 = vcmp.gt.s32.totalorder %v4384_v23, 0 }
 0x54c   :  { %6091 = vst [vmem:[#allocation128_spill] sm:$0xff] %v4747_v62 }
 0x54d   :  { %6092 = vst [vmem:[#allocation129_spill] sm:$0xff] %v4749_v28 }
 0x54e   :  { %6093 = vst [vmem:[#allocation130_spill] sm:$0xff] %v4751_v20  ;;  %v4753_v15 = vpop.permute.xlu0 %1509 }
 0x54f   :  { %v1521_v41 = vadd.s32 %v4753_v15, %v4592_v55  ;;  %v4757_v19 = vpop.permute.xlu2 %1507 }
 0x550   :  { %v1520_v46 = vadd.s32 %v4757_v19, %v4583_v32 }
 0x551   :  { %v1364_v25 = vpop.permute.xlu1 %1363  ;;  %1546 = vperm.xlu2 %2653, %v1521_v41  }
 0x552   :  { %v4765_v35 = vsel %vm1325_vm0, %v1364_v25, 0.0  ;;  %v4767_v11 = vsel %vm1326_vm13, %v1364_v25, 0.0  ;;  %v4769_v55 = vsel %vm1327_vm8, %v1364_v25, 0.0  ;;  %v4771_v20 = vsel %vm1328_vm14, %v1364_v25, 0.0  ;;  %1543 = vperm.xlu1 %2652, %v1520_v46  }
 0x553   :  { %vm1755_vm0 = vcmp.gt.s32.totalorder %v4476_v44, 0  ;;  %vm1743_vm13 = vcmp.gt.s32.totalorder %v4271_v12, 0 }
 0x557   :  { %v4773_v32 = vpop.permute.xlu2 %1513 }
 0x558   :  { %v1523_v28 = vadd.s32 %v4773_v32, %v4613_v9 }
 0x559   :  { %v1379_v41 = vpop.permute.xlu1 %1378 }
 0x55a   :  { %v4781_v49 = vsel %vm1337_vm12, %v1379_v41, 0.0  ;;  %v4783_v62 = vsel %vm1338_vm3, %v1379_v41, 0.0  ;;  %v4785_v25 = vsel %vm1339_vm10, %v1379_v41, 0.0  ;;  %v4787_v46 = vsel %vm1340_vm1, %v1379_v41, 0.0  ;;  %1552 = vperm.xlu2 %2653, %v1523_v28  }
 0x55b   :  { %6094 = vst [vmem:[#allocation131_spill] sm:$0xff] %v4781_v49  ;;  %v1742_v41 = vsel %vm1741_vm11, %v6100_v42, 0  ;;  %v1752_v28 = vsel %vm1751_vm6, %v4418_v16, 0  ;;  %v1746_v49 = vsel %vm1745_vm9, %v4325_v38, 0  ;;  %v6103_v38 = vld [vmem:[#allocation99_spill] sm:$0xff]  ;;  %vm1747_vm12 = vcmp.gt.s32.totalorder %v4309_v34, 0 }
 0x55c   :  { %6095 = vst [vmem:[#allocation132_spill] sm:$0xff] %v4783_v62  ;;  %v4797_v62 = vpop.permute.xlu0 %1515  ;;  %vm1757_vm4 = vcmp.lt.s32.totalorder %v1742_v41, 15  ;;  %vm1767_vm2 = vcmp.lt.s32.totalorder %v1752_v28, 15  ;;  %vm1761_vm5 = vcmp.lt.s32.totalorder %v1746_v49, 15  ;;  %vm1753_vm10 = vcmp.gt.s32.totalorder %v4369_v36, 0 }
 0x55d   :  { %6096 = vst [vmem:[#allocation133_spill] sm:$0xff] %v4785_v25  ;;  %v1768_v42 = vsel %vm1767_vm2, %v1752_v28, 15  ;;  %v1756_v28 = vsel %vm1755_vm0, %v4476_v44, 0  ;;  %v1754_v44 = vsel %vm1753_vm10, %v4369_v36, 0 }
 0x55e   :  { %6097 = vst [vmem:[#allocation134_spill] sm:$0xff] %v4787_v46  ;;  %v1778_v16 = vmul.u32 16, %v1768_v42  ;;  %vm1771_vm8 = vcmp.lt.s32.totalorder %v1756_v28, 15  ;;  %vm1769_vm1 = vcmp.lt.s32.totalorder %v1754_v44, 15 }
 0x561   :  { %v4789_v0 = vpop.permute.xlu1 %1505 }
 0x562   :  { %v1519_v9 = vadd.s32 %v4789_v0, %v4437_v4  ;;  %2655 = vset.pattern.permute.xlu2 %v6098_v31  ;;  %v1524_v4 = vadd.s32 %v4797_v62, %v4622_v5  ;;  %v1762_v5 = vsel %vm1761_vm5, %v1746_v49, 15  ;;  %v1772_v49 = vsel %vm1771_vm8, %v1756_v28, 15  ;;  %v6106_v28 = vld [vmem:[#allocation109_spill] sm:$0xff] }
 0x563   :  { %1596 = vperm.xlu2 %2655, %v6099_v24   ;;  %v6101_v24 = vld [vmem:[#allocation104_spill] sm:$0xff]  ;;  %v1780_v42 = vmul.u32 16, %v1772_v49 }
 0x564   :  { %1540 = vperm.xlu0 %2648, %v1519_v9   ;;  %v1758_v9 = vsel %vm1757_vm4, %v1742_v41, 15  ;;  %v1775_v41 = vmul.u32 16, %v1762_v5 }
 0x565   :  { %v1773_v18 = vmul.u32 16, %v1758_v9 }
 0x569   :  { %v4800_v46 = vpop.permute.xlu1 %1511 }
 0x56a   :  { %v1522_v25 = vadd.s32 %v4800_v46, %v4608_v22  ;;  %v6102_v22 = vld [vmem:[#allocation102_spill] sm:$0xff] }
 0x56b   :  { %1611 = vperm.xlu2 %2655, %v6101_v24   ;;  %v1744_v24 = vsel %vm1743_vm13, %v4271_v12, 0 }
 0x56c   :  { %1549 = vperm.xlu1 %2652, %v1522_v25   ;;  %1555 = vperm.xlu0 %2648, %v1524_v4   ;;  %v1750_v25 = vsel %vm1749_vm15, %v4384_v23, 0  ;;  %v6104_v23 = vld [vmem:[#allocation106_spill] sm:$0xff]  ;;  %vm1759_vm14 = vcmp.lt.s32.totalorder %v1744_v24, 15 }
 0x56d   :  { %vm1765_vm7 = vcmp.lt.s32.totalorder %v1750_v25, 15  ;;  %v1760_v9 = vsel %vm1759_vm14, %v1744_v24, 15 }
 0x573   :  { %1781 = vrot.lane.b32.xlu2 %v1773_v18, %s2710_s27  ;;  %v1766_v18 = vsel %vm1765_vm7, %v1750_v25, 15  ;;  %v1770_v25 = vsel %vm1769_vm1, %v1754_v44, 15 }
 0x574   :  { %2654 = vset.pattern.permute.xlu1 %v6098_v31  ;;  %1791 = vrot.lane.b32.xlu0 %v1778_v16, %s2710_s27  ;;  %v1777_v4 = vmul.u32 16, %v1766_v18  ;;  %v1748_v16 = vsel %vm1747_vm12, %v4309_v34, 0 }
 0x575   :  { %1591 = vperm.xlu1 %2654, %v6102_v22   ;;  %2657 = vset.pattern.permute.xlu2 %v6081_v50  ;;  %v1774_v22 = vmul.u32 16, %v1760_v9  ;;  %vm1763_vm3 = vcmp.lt.s32.totalorder %v1748_v16, 15 }
 0x576   :  { %v1764_v12 = vsel %vm1763_vm3, %v1748_v16, 15 }
 0x577   :  { %v1776_v5 = vmul.u32 16, %v1764_v12 }
 0x57b   :  { %1785 = vrot.lane.b32.xlu2 %v1775_v41, %s2710_s27  ;;  %v1779_v41 = vmul.u32 16, %v1770_v25 }
 0x57d   :  { %1606 = vperm.xlu1 %2654, %v6103_v38   ;;  %v6105_v38 = vld [vmem:[#allocation100_spill] sm:$0xff] }
 0x583   :  { %1789 = vrot.lane.b32.xlu2 %v1777_v4, %s2710_s27 }
 0x585   :  { %1616 = vperm.xlu1 %2654, %v6104_v23  }
 0x58b   :  { %1795 = vrot.lane.b32.xlu2 %v1780_v42, %s2710_s27 }
 0x58d   :  { %1783 = vrot.lane.b32.xlu1 %v1774_v22, %s2710_s27 }
 0x595   :  { %1787 = vrot.lane.b32.xlu1 %v1776_v5, %s2710_s27 }
 0x59d   :  { %1793 = vrot.lane.b32.xlu1 %v1779_v41, %s2710_s27  ;;  %v6112_v41 = vcvt.f32.s32 %v4471_v27 }
 0x5a3   :  { %v1538_v34 = vpop.permute.xlu2 %1537 }
 0x5a4   :  { %vm1561_vm11 = vcmp.eq.s32.totalorder %v4682_v30, %v1538_v34  ;;  %vm1562_vm6 = vcmp.eq.s32.totalorder %v4685_v37, %v1538_v34  ;;  %vm1563_vm4 = vcmp.eq.s32.totalorder %v4688_v61, %v1538_v34  ;;  %vm1564_vm2 = vcmp.eq.s32.totalorder %v4691_v3, %v1538_v34 }
 0x5a5   :  { %1879 = vperm.xlu1 %2654, %v6105_v38  }
 0x5ab   :  { %v1547_v18 = vpop.permute.xlu2 %1546 }
 0x5ac   :  { %vm1573_vm9 = vcmp.eq.s32.totalorder %v4682_v30, %v1547_v18  ;;  %vm1574_vm5 = vcmp.eq.s32.totalorder %v4685_v37, %v1547_v18  ;;  %vm1575_vm15 = vcmp.eq.s32.totalorder %v4688_v61, %v1547_v18  ;;  %vm1576_vm7 = vcmp.eq.s32.totalorder %v4691_v3, %v1547_v18 }
 0x5ad   :  { %2087 = vperm.xlu1 %2654, %v6106_v28  }
 0x5b4   :  { %v4835_v4 = vpop.permute.xlu2 %1552 }
 0x5b5   :  { %6107 = vst [vmem:[#allocation103_spill] sm:$0xff] %v4835_v4  ;;  %2658 = vset.pattern.permute.xlu1 %v6081_v50 }
 0x5bc   :  { %v1535_v5 = vpop.permute.xlu1 %1534 }
 0x5bd   :  { %v1597_v36 = vpop.permute.xlu2 %1596  ;;  %vm1557_vm0 = vcmp.eq.s32.totalorder %v4682_v30, %v1535_v5  ;;  %vm1558_vm13 = vcmp.eq.s32.totalorder %v4685_v37, %v1535_v5  ;;  %vm1559_vm8 = vcmp.eq.s32.totalorder %v4688_v61, %v1535_v5  ;;  %vm1560_vm14 = vcmp.eq.s32.totalorder %v4691_v3, %v1535_v5 }
 0x5be   :  { %v4842_v24 = vsel %vm1561_vm11, %v1597_v36, 0.0  ;;  %v4844_v23 = vsel %vm1562_vm6, %v1597_v36, 0.0  ;;  %v4846_v49 = vsel %vm1563_vm4, %v1597_v36, 0.0  ;;  %v4848_v9 = vsel %vm1564_vm2, %v1597_v36, 0.0  ;;  %v6113_v36 = vld [vmem:[#allocation101_spill] sm:$0xff] }
 0x5bf   :  { %6108 = vst [vmem:[#allocation105_spill] sm:$0xff] %v4842_v24 }
 0x5c0   :  { %6109 = vst [vmem:[#allocation104_spill] sm:$0xff] %v4844_v23 }
 0x5c1   :  { %6110 = vst [vmem:[#allocation102_spill] sm:$0xff] %v4846_v49  ;;  %v6117_v49 = vcvt.f32.s32 %v4487_v13  ;;  %v2220_v13 = vld [vmem:[%s5701_s2 + $0xf8] sm:$0xff] }
 0x5c2   :  { %6111 = vst [vmem:[#allocation99_spill] sm:$0xff] %v4848_v9  ;;  %v6114_v9 = vld [vmem:[#allocation112_spill] sm:$0xff]  ;;  %2294 = vmatpush.msra.mxu1 %v2220_v13 }
 0x5c4   :  { %v1544_v18 = vpop.permute.xlu1 %1543 }
 0x5c5   :  { %v1612_v42 = vpop.permute.xlu2 %1611  ;;  %vm1569_vm12 = vcmp.eq.s32.totalorder %v4682_v30, %v1544_v18  ;;  %vm1570_vm3 = vcmp.eq.s32.totalorder %v4685_v37, %v1544_v18  ;;  %vm1571_vm10 = vcmp.eq.s32.totalorder %v4688_v61, %v1544_v18  ;;  %vm1572_vm1 = vcmp.eq.s32.totalorder %v4691_v3, %v1544_v18 }
 0x5c6   :  { %v4854_v16 = vsel %vm1573_vm9, %v1612_v42, 0.0  ;;  %v4856_v22 = vsel %vm1574_vm5, %v1612_v42, 0.0  ;;  %v4858_v12 = vsel %vm1575_vm15, %v1612_v42, 0.0  ;;  %v4860_v44 = vsel %vm1576_vm7, %v1612_v42, 0.0 }
 0x5cd   :  { %v1782_v25 = vpop.permute.xlu2 %1781 }
 0x5ce   :  { %v1797_v34 = vadd.s32 %v6112_v41, %v1782_v25 }
 0x5d0   :  { %v1805_v38 = vadd.s32 %v1797_v34, %v4530_v1  ;;  %v2013_v28 = vadd.s32 %v1797_v34, %v4737_v14 }
 0x5d2   :  { %2030 = vperm.xlu2 %2657, %v2013_v28   ;;  %1822 = vperm.xlu0 %2648, %v1805_v38  }
 0x5da   :  { %2656 = vset.pattern.permute.xlu0 %v6098_v31 }
 0x5db   :  { %1348 = vperm.xlu0 %2656, %v6113_v36  }
 0x5de   :  { %v1550_v4 = vpop.permute.xlu1 %1549 }
 0x5df   :  { %vm1577_vm11 = vcmp.eq.s32.totalorder %v4682_v30, %v1550_v4  ;;  %vm1578_vm6 = vcmp.eq.s32.totalorder %v4685_v37, %v1550_v4  ;;  %vm1579_vm4 = vcmp.eq.s32.totalorder %v4688_v61, %v1550_v4  ;;  %vm1580_vm2 = vcmp.eq.s32.totalorder %v4691_v3, %v1550_v4 }
 0x5e3   :  { %1373 = vperm.xlu0 %2656, %v6114_v9  }
 0x5e7   :  { %v1592_v27 = vpop.permute.xlu1 %1591 }
 0x5e8   :  { %v4873_v1 = vsel %vm1557_vm0, %v1592_v27, 0.0  ;;  %v4875_v14 = vsel %vm1558_vm13, %v1592_v27, 0.0  ;;  %v4877_v42 = vsel %vm1559_vm8, %v1592_v27, 0.0  ;;  %v4879_v25 = vsel %vm1560_vm14, %v1592_v27, 0.0 }
 0x5eb   :  { %1601 = vperm.xlu0 %2656, %v4255_v51  }
 0x5ef   :  { %v1607_v9 = vpop.permute.xlu1 %1606 }
 0x5f0   :  { %v4886_v5 = vsel %vm1569_vm12, %v1607_v9, 0.0  ;;  %v4888_v41 = vsel %vm1570_vm3, %v1607_v9, 0.0  ;;  %v4890_v34 = vsel %vm1571_vm10, %v1607_v9, 0.0  ;;  %v4892_v38 = vsel %vm1572_vm1, %v1607_v9, 0.0 }
 0x5f1   :  { %6115 = vst [vmem:[#allocation106_spill] sm:$0xff] %v4892_v38  ;;  %v1786_v38 = vpop.permute.xlu2 %1785 }
 0x5f3   :  { %1621 = vperm.xlu0 %2656, %v4287_v40   ;;  %v4908_v40 = vpop.permute.xlu0 %1540 }
 0x5f7   :  { %v1617_v51 = vpop.permute.xlu1 %1616 }
 0x5f8   :  { %v4899_v28 = vsel %vm1577_vm11, %v1617_v51, 0.0  ;;  %v4901_v18 = vsel %vm1578_vm6, %v1617_v51, 0.0  ;;  %v4903_v36 = vsel %vm1579_vm4, %v1617_v51, 0.0  ;;  %v4905_v27 = vsel %vm1580_vm2, %v1617_v51, 0.0 }
 0x5f9   :  { %6116 = vst [vmem:[#allocation100_spill] sm:$0xff] %v4905_v27  ;;  %v6118_v51 = vcvt.f32.s32 %v4399_v17 }
 0x5fb   :  { %1626 = vperm.xlu0 %2656, %v4314_v39   ;;  %v1799_v27 = vadd.s32 %v6118_v51, %v1786_v38  ;;  %v2204_v39 = vld [vmem:[%s5701_s2 + $0x78] sm:$0xff]  ;;  %v4929_v17 = vpop.permute.xlu0 %1555  ;;  %v2234_v38 = vld [vmem:[%s5701_s2 + $0x168] sm:$0xff] }
 0x5fc   :  { %2253 = vmatpush.msra.mxu0 %v2204_v39  ;;  %v2250_v51 = vld [vmem:[%s5701_s2 + $0x1e8] sm:$0xff]  ;;  %v2201_v39 = vld [vmem:[%s5701_s2 + $0x60] sm:$0xff] }
 0x5ff   :  { %v1784_v9 = vpop.permute.xlu1 %1783 }
 0x600   :  { %v1798_v23 = vadd.s32 %v6117_v49, %v1784_v9  ;;  %v2235_v49 = vld [vmem:[%s5701_s2 + $0x170] sm:$0xff]  ;;  %v2015_v9 = vadd.s32 %v1799_v27, %v4789_v0  ;;  %v2217_v0 = vld [vmem:[%s5701_s2 + $0xe0] sm:$0xff] }
 0x602   :  { %v1806_v24 = vadd.s32 %v1798_v23, %v4550_v60  ;;  %v2014_v4 = vadd.s32 %v1798_v23, %v4733_v56  ;;  %v2236_v60 = vld [vmem:[%s5701_s2 + $0x178] sm:$0xff]  ;;  %v1807_v56 = vadd.s32 %v1799_v27, %v4458_v48  ;;  %v2219_v23 = vld [vmem:[%s5701_s2 + $0xf0] sm:$0xff]  ;;  %v2218_v48 = vld [vmem:[%s5701_s2 + $0xe8] sm:$0xff] }
 0x603   :  { %1884 = vperm.xlu0 %2656, %v4332_v47   ;;  %v2252_v47 = vld [vmem:[%s5701_s2 + $0x1f8] sm:$0xff]  ;;  %2335 = vmatpush.msra.mxu2 %v2236_v60  ;;  %v2233_v27 = vld [vmem:[%s5701_s2 + $0x160] sm:$0xff]  ;;  %v6119_v60 = vld [vmem:[#allocation108_spill] sm:$0xff] }
 0x604   :  { %2033 = vperm.xlu1 %2658, %v2014_v4   ;;  %1825 = vperm.xlu2 %2657, %v1806_v24   ;;  %v2203_v24 = vld [vmem:[%s5701_s2 + $0x70] sm:$0xff]  ;;  %v1792_v4 = vpop.permute.xlu0 %1791 }
 0x605   :  { %2376 = vmatpush.msra.mxu3 %v2252_v47  ;;  %2254 = vmatpush.msra.mxu0 %v2203_v24  ;;  %v2249_v47 = vld [vmem:[%s5701_s2 + $0x1e0] sm:$0xff]  ;;  %v6120_v24 = vcvt.f32.s32 %v4578_v2  ;;  %v2199_v2 = vld [vmem:[%s5701_s2 + $0x50] sm:$0xff] }
 0x606   :  { %2295 = vmatpush.msra.mxu1 %v2219_v23  ;;  %2336 = vmatpush.msra.mxu2 %v2235_v49  ;;  %v2232_v49 = vld [vmem:[%s5701_s2 + $0x158] sm:$0xff] }
 0x607   :  { %v1788_v13 = vpop.permute.xlu1 %1787  ;;  %v4981_v23 = vadd.s32 %v6120_v24, %v1792_v4  ;;  %v2247_v4 = vld [vmem:[%s5701_s2 + $0x1d0] sm:$0xff]  ;;  %v2245_v24 = vld [vmem:[%s5701_s2 + $0x1c0] sm:$0xff] }
 0x608   :  { %2296 = vmatpush.msra.mxu1 %v2218_v48  ;;  %2337 = vmatpush.msra.mxu2 %v2234_v38  ;;  %v2215_v38 = vld [vmem:[%s5701_s2 + $0xd0] sm:$0xff] }
 0x60a   :  { %2297 = vmatpush.msra.mxu1 %v2217_v0  ;;  %2338 = vmatpush.msra.mxu2 %v2233_v27  ;;  %v2214_v27 = vld [vmem:[%s5701_s2 + $0xc8] sm:$0xff] }
 0x60b   :  { %2102 = vperm.xlu0 %2656, %v4362_v52   ;;  %v2251_v52 = vld [vmem:[%s5701_s2 + $0x1f0] sm:$0xff] }
 0x60c   :  { %2659 = vset.pattern.permute.xlu2 %v6098_v31  ;;  %1828 = vperm.xlu1 %2658, %v1807_v56   ;;  %v2200_v56 = vld [vmem:[%s5701_s2 + $0x58] sm:$0xff] }
 0x60d   :  { %2092 = vperm.xlu2 %2659, %v4348_v45   ;;  %v2202_v45 = vld [vmem:[%s5701_s2 + $0x68] sm:$0xff]  ;;  %2377 = vmatpush.msra.mxu3 %v2251_v52  ;;  %v2248_v52 = vld [vmem:[%s5701_s2 + $0x1d8] sm:$0xff] }
 0x60e   :  { %2255 = vmatpush.msra.mxu0 %v2202_v45  ;;  %v6121_v45 = vcvt.f32.s32 %v4528_v58  ;;  %2339 = vmatpush.msra.mxu2 %v2232_v49  ;;  %v1810_v58 = vadd.s32 %v4981_v23, %v4615_v59  ;;  %v2230_v59 = vld [vmem:[%s5701_s2 + $0x148] sm:$0xff]  ;;  %v5040_v49 = vadd.f32 %v4854_v16, %v4765_v35  ;;  %v2228_v35 = vld [vmem:[%s5701_s2 + $0x138] sm:$0xff] }
 0x60f   :  { %2378 = vmatpush.msra.mxu3 %v2250_v51  ;;  %v2198_v51 = vld [vmem:[%s5701_s2 + $0x48] sm:$0xff] }
 0x610   :  { %2256 = vmatpush.msra.mxu0 %v2201_v39  ;;  %v1800_v48 = vadd.s32 %v6121_v45, %v1788_v13  ;;  %v1790_v39 = vpop.permute.xlu2 %1789  ;;  %v6122_v13 = vld [vmem:[#allocation115_spill] sm:$0xff]  ;;  %v6123_v45 = vcvt.f32.s32 %v4545_v26  ;;  %v2244_v26 = vld [vmem:[%s5701_s2 + $0x1b8] sm:$0xff] }
 0x611   :  { %2379 = vmatpush.msra.mxu3 %v2249_v47  ;;  %v2213_v47 = vld [vmem:[%s5701_s2 + $0xc0] sm:$0xff] }
 0x612   :  { %2257 = vmatpush.msra.mxu0 %v2200_v56  ;;  %v1808_v0 = vadd.s32 %v1800_v48, %v4587_v10  ;;  %v2197_v10 = vld [vmem:[%s5701_s2 + $0x40] sm:$0xff]  ;;  %v2016_v16 = vadd.s32 %v1800_v48, %v4757_v19  ;;  %v2243_v19 = vld [vmem:[%s5701_s2 + $0x1b0] sm:$0xff]  ;;  %v2194_v48 = vld [vmem:[%s5701_s2 + $0x28] sm:$0xff] }
 0x613   :  { %2662 = vset.pattern.permute.xlu0 %v6081_v50  ;;  %2380 = vmatpush.msra.mxu3 %v2248_v52  ;;  %v2229_v56 = vld [vmem:[%s5701_s2 + $0x140] sm:$0xff]  ;;  %v5044_v52 = vadd.f32 %v4856_v22, %v4767_v11  ;;  %v5060_v11 = vadd.f32 %v4860_v44, %v4771_v20  ;;  %v2195_v20 = vld [vmem:[%s5701_s2 + $0x30] sm:$0xff] }
 0x614   :  { %2660 = vset.pattern.permute.xlu1 %v6098_v31  ;;  %2036 = vperm.xlu0 %2662, %v2015_v9   ;;  %v2231_v9 = vld [vmem:[%s5701_s2 + $0x150] sm:$0xff] }
 0x615   :  { %1889 = vperm.xlu2 %2659, %v4374_v43   ;;  %2097 = vperm.xlu1 %2660, %v6119_v60   ;;  %v2216_v43 = vld [vmem:[%s5701_s2 + $0xd8] sm:$0xff]  ;;  %v2246_v60 = vld [vmem:[%s5701_s2 + $0x1c8] sm:$0xff]  ;;  %v2211_v22 = vld [vmem:[%s5701_s2 + $0xb0] sm:$0xff] }
 0x616   :  { %2298 = vmatpush.msra.mxu1 %v2216_v43  ;;  %2258 = vmatpush.msra.mxu0 %v2199_v2  ;;  %v2196_v43 = vld [vmem:[%s5701_s2 + $0x38] sm:$0xff]  ;;  %v5048_v2 = vadd.f32 %v4858_v12, %v4769_v55  ;;  %v6124_v12 = vld [vmem:[#allocation110_spill] sm:$0xff] }
 0x617   :  { %2340 = vmatpush.msra.mxu2 %v2231_v9  ;;  %2381 = vmatpush.msra.mxu3 %v2247_v4  ;;  %v2212_v9 = vld [vmem:[%s5701_s2 + $0xb8] sm:$0xff]  ;;  %v2210_v4 = vld [vmem:[%s5701_s2 + $0xa8] sm:$0xff] }
 0x618   :  { %2299 = vmatpush.msra.mxu1 %v2215_v38  ;;  %2259 = vmatpush.msra.mxu0 %v2198_v51  ;;  %v1801_v38 = vadd.s32 %v6123_v45, %v1790_v39  ;;  %v1796_v44 = vpop.permute.xlu2 %1795  ;;  %v2242_v51 = vld [vmem:[%s5701_s2 + $0x1a8] sm:$0xff]  ;;  %v2193_v39 = vld [vmem:[%s5701_s2 + $0x20] sm:$0xff]  ;;  %v2207_v45 = vld [vmem:[%s5701_s2 + $0x90] sm:$0xff] }
 0x619   :  { %2341 = vmatpush.msra.mxu2 %v2230_v59  ;;  %2382 = vmatpush.msra.mxu3 %v2246_v60  ;;  %v2241_v60 = vld [vmem:[%s5701_s2 + $0x1a0] sm:$0xff] }
 0x61a   :  { %2300 = vmatpush.msra.mxu1 %v2214_v27  ;;  %2260 = vmatpush.msra.mxu0 %v2197_v10  ;;  %v1809_v55 = vadd.s32 %v1801_v38, %v4599_v21  ;;  %v2227_v21 = vld [vmem:[%s5701_s2 + $0x130] sm:$0xff]  ;;  %v6125_v27 = vcvt.f32.s32 %v4597_v63  ;;  %v5112_v10 = vadd.f32 %v4873_v1, %v4697_v29  ;;  %v2192_v63 = vld [vmem:[%s5701_s2 + $0x18] sm:$0xff]  ;;  %v5128_v29 = vadd.f32 %v4879_v25, %v4703_v8  ;;  %v1794_v25 = vpop.permute.xlu1 %1793 }
 0x61b   :  { %2342 = vmatpush.msra.mxu2 %v2229_v56  ;;  %2383 = vmatpush.msra.mxu3 %v2245_v24  ;;  %v5123_v56 = vadd.f32 %v4877_v42, %v4701_v33  ;;  %v2017_v24 = vadd.s32 %v1801_v38, %v4753_v15  ;;  %v2224_v33 = vld [vmem:[%s5701_s2 + $0x118] sm:$0xff]  ;;  %v6126_v15 = vld [vmem:[#allocation39_spill] sm:$0xff]  ;;  %v2223_v38 = vld [vmem:[%s5701_s2 + $0x110] sm:$0xff] }
 0x61c   :  { %1837 = vperm.xlu0 %2662, %v1810_v58   ;;  %2301 = vmatpush.msra.mxu1 %v2213_v47  ;;  %v2226_v58 = vld [vmem:[%s5701_s2 + $0x128] sm:$0xff]  ;;  %v5102_v59 = vadd.s32 %v6125_v27, %v1796_v44  ;;  %v5119_v47 = vadd.f32 %v4875_v14, %v4699_v6  ;;  %v2208_v6 = vld [vmem:[%s5701_s2 + $0x98] sm:$0xff]  ;;  %v6127_v14 = vld [vmem:[#allocation44_spill] sm:$0xff] }
 0x61d   :  { %2661 = vset.pattern.permute.xlu2 %v6081_v50  ;;  %1894 = vperm.xlu1 %2660, %v6122_v13   ;;  %v2225_v13 = vld [vmem:[%s5701_s2 + $0x120] sm:$0xff]  ;;  %v219_v42 = vadd.f32 %v6127_v14, %v6126_v15  ;;  %v2240_v8 = vld [vmem:[%s5701_s2 + $0x198] sm:$0xff] }
 0x61e   :  { %1831 = vperm.xlu2 %2661, %v1808_v0   ;;  %2261 = vmatpush.msra.mxu0 %v2196_v43  ;;  %v2209_v0 = vld [vmem:[%s5701_s2 + $0xa0] sm:$0xff]  ;;  %v2020_v1 = vadd.s32 %v5102_v59, %v4797_v62  ;;  %v2191_v62 = vld [vmem:[%s5701_s2 + $0x10] sm:$0xff]  ;;  %v6128_v43 = vld [vmem:[#allocation111_spill] sm:$0xff] }
 0x61f   :  { %2302 = vmatpush.msra.mxu1 %v2212_v9  ;;  %2343 = vmatpush.msra.mxu2 %v2228_v35  ;;  %v6129_v9 = vld [vmem:[#allocation50_spill] sm:$0xff]  ;;  %v6133_v27 = vld [vmem:[#allocation113_spill] sm:$0xff] }
 0x620   :  { %2384 = vmatpush.msra.mxu3 %v2244_v26  ;;  %2262 = vmatpush.msra.mxu0 %v2195_v20  ;;  %v251_v35 = vadd.f32 %v6129_v9, %v219_v42  ;;  %v2239_v26 = vld [vmem:[%s5701_s2 + $0x190] sm:$0xff]  ;;  %v2222_v20 = vld [vmem:[%s5701_s2 + $0x108] sm:$0xff]  ;;  %v2205_v44 = vld [vmem:[%s5701_s2 + $0x80] sm:$0xff] }
 0x621   :  { %2303 = vmatpush.msra.mxu1 %v2211_v22  ;;  %2344 = vmatpush.msra.mxu2 %v2227_v21  ;;  %v6130_v22 = vld [vmem:[#allocation65_spill] sm:$0xff]  ;;  %v2238_v21 = vld [vmem:[%s5701_s2 + $0x188] sm:$0xff]  ;;  %v6138_v15 = vld [vmem:[#allocation74_spill] sm:$0xff] }
 0x622   :  { %2385 = vmatpush.msra.mxu3 %v2243_v19  ;;  %2263 = vmatpush.msra.mxu0 %v2194_v48  ;;  %v2189_v19 = vld [vmem:[%s5701_s2] sm:$0xff]  ;;  %v6139_v42 = vld [vmem:[#allocation84_spill] sm:$0xff] }
 0x623   :  { %2304 = vmatpush.msra.mxu1 %v2210_v4  ;;  %2345 = vmatpush.msra.mxu2 %v2226_v58  ;;  %v2221_v48 = vld [vmem:[%s5701_s2 + $0x100] sm:$0xff]  ;;  %v6131_v4 = vld [vmem:[#allocation41_spill] sm:$0xff] }
 0x624   :  { %2667 = vset.pattern.permute.xlu0 %v6098_v31  ;;  %2386 = vmatpush.msra.mxu3 %v2242_v51  ;;  %v6132_v58 = vld [vmem:[#allocation46_spill] sm:$0xff] }
 0x625   :  { %2663 = vset.pattern.permute.xlu1 %v6081_v50  ;;  %1909 = vperm.xlu0 %2667, %v6124_v12   ;;  %v283_v12 = vadd.f32 %v6130_v22, %v251_v35  ;;  %v222_v51 = vadd.f32 %v6132_v58, %v6131_v4  ;;  %v6141_v35 = vcvt.f32.s32 %v4585_v53 }
 0x626   :  { %2039 = vperm.xlu2 %2661, %v2016_v16   ;;  %1834 = vperm.xlu1 %2663, %v1809_v55   ;;  %v2190_v55 = vld [vmem:[%s5701_s2 + $0x8] sm:$0xff] }
 0x627   :  { %2264 = vmatpush.msra.mxu0 %v2193_v39  ;;  %2305 = vmatpush.msra.mxu1 %v2209_v0  ;;  %v2206_v16 = vld [vmem:[%s5701_s2 + $0x88] sm:$0xff]  ;;  %v2429_v39 = vsub.f32 0.0, %v283_v12  ;;  %v2237_v0 = vld [vmem:[%s5701_s2 + $0x180] sm:$0xff]  ;;  %s2714_s2 = smov 2  }
 0x628   :  { %2346 = vmatpush.msra.mxu2 %v2225_v13  ;;  %2387 = vmatpush.msra.mxu3 %v2241_v60  ;;  %v6134_v13 = vld [vmem:[#allocation125_spill] sm:$0xff] }
 0x629   :  { %2265 = vmatpush.msra.mxu0 %v2192_v63  ;;  %2306 = vmatpush.msra.mxu1 %v2208_v6  ;;  %v6135_v60 = vld [vmem:[#allocation53_spill] sm:$0xff] }
 0x62a   :  { %2347 = vmatpush.msra.mxu2 %v2224_v33  ;;  %2388 = vmatpush.msra.mxu3 %v2240_v8  ;;  %v254_v63 = vadd.f32 %v6135_v60, %v222_v51  ;;  %v6137_v33 = vld [vmem:[#allocation71_spill] sm:$0xff] }
 0x62b   :  { %2266 = vmatpush.msra.mxu0 %v2191_v62  ;;  %2307 = vmatpush.msra.mxu1 %v2207_v45  ;;  %v353_v14 = vadd.f32 %v6138_v15, %v6137_v33  ;;  %v6148_v15 = vld [vmem:[#allocation118_spill] sm:$0xff] }
 0x62c   :  { %2348 = vmatpush.msra.mxu2 %v2223_v38  ;;  %2389 = vmatpush.msra.mxu3 %v2239_v26  ;;  %v2031_v45 = vpop.permute.xlu2 %2030  ;;  %v6140_v38 = vld [vmem:[#allocation92_spill] sm:$0xff]  ;;  %v1803_v26 = vadd.s32 %v6141_v35, %v1794_v25  ;;  %v6155_v35 = vld [vmem:[#allocation123_spill] sm:$0xff] }
 0x62d   :  { %2670 = vset.pattern.permute.xlu0 %v6081_v50  ;;  %2267 = vmatpush.msra.mxu0 %v2190_v55  ;;  %v385_v8 = vadd.f32 %v6139_v42, %v353_v14  ;;  %v6142_v55 = vld [vmem:[#allocation114_spill] sm:$0xff]  ;;  %vm2053_vm9 = vcmp.eq.s32.totalorder %v4682_v30, %v2031_v45  ;;  %vm2054_vm5 = vcmp.eq.s32.totalorder %v4685_v37, %v2031_v45 }
 0x62e   :  { %2664 = vset.pattern.permute.xlu2 %v6098_v31  ;;  %2042 = vperm.xlu1 %2663, %v2017_v24   ;;  %v1880_v24 = vpop.permute.xlu1 %1879  ;;  %vm2055_vm15 = vcmp.eq.s32.totalorder %v4688_v61, %v2031_v45  ;;  %v1811_v25 = vadd.s32 %v1803_v26, %v4617_v54  ;;  %v2019_v12 = vadd.s32 %v1803_v26, %v4773_v32 }
 0x62f   :  { %1899 = vperm.xlu2 %2664, %v6128_v43   ;;  %2051 = vperm.xlu0 %2670, %v2020_v1   ;;  %v6136_v1 = vld [vmem:[#allocation68_spill] sm:$0xff]  ;;  %v2018_v43 = vadd.s32 %v4981_v23, %v4800_v46  ;;  %v417_v9 = vadd.f32 %v6140_v38, %v385_v8  ;;  %v6145_v46 = vld [vmem:[#allocation87_spill] sm:$0xff]  ;;  %vm2056_vm7 = vcmp.eq.s32.totalorder %v4691_v3, %v2031_v45  ;;  %v6154_v38 = vld [vmem:[#allocation121_spill] sm:$0xff] }
 0x630   :  { %2308 = vmatpush.msra.mxu1 %v2206_v16  ;;  %2349 = vmatpush.msra.mxu2 %v2222_v20  ;;  %v286_v6 = vadd.f32 %v6136_v1, %v254_v63  ;;  %v6143_v16 = vld [vmem:[#allocation72_spill] sm:$0xff]  ;;  %v5226_v63 = vadd.f32 %v4886_v5, %v4711_v7  ;;  %v6149_v7 = vld [vmem:[#allocation106_spill] sm:$0xff]  ;;  %v5256_v26 = vadd.f32 %v4903_v36, %v6155_v35 }
 0x631   :  { %2390 = vmatpush.msra.mxu3 %v2238_v21  ;;  %2268 = vmatpush.msra.mxu0 %v2189_v19  ;;  %v6144_v20 = vld [vmem:[#allocation76_spill] sm:$0xff]  ;;  %v2435_v53 = vsub.f32 0.0, %v417_v9  ;;  %v5240_v5 = vadd.f32 %v6149_v7, %v6148_v15  ;;  %v5252_v9 = vadd.f32 %v4901_v18, %v6154_v38  ;;  %v6163_v36 = vld [vmem:[#allocation126_spill] sm:$0xff]  ;;  %v6172_v15 = vld [vmem:[#allocation117_spill] sm:$0xff] }
 0x632   :  { %2309 = vmatpush.msra.mxu1 %v2205_v44  ;;  %2350 = vmatpush.msra.mxu2 %v2221_v48  ;;  %v2432_v62 = vsub.f32 0.0, %v286_v6  ;;  %v356_v22 = vadd.f32 %v6144_v20, %v6143_v16  ;;  %v6147_v6 = vld [vmem:[#allocation95_spill] sm:$0xff]  ;;  %v6152_v8 = vld [vmem:[#allocation124_spill] sm:$0xff]  ;;  %vm1313_vm12 = vcmp.eq.s32.totalorder %v4682_v30, %v6163_v36  ;;  %vm1314_vm6 = vcmp.eq.s32.totalorder %v4685_v37, %v6163_v36  ;;  %v6173_v7 = vld [vmem:[#allocation105_spill] sm:$0xff] }
 0x633   :  { %2391 = vmatpush.msra.mxu3 %v2237_v0  ;;  %v6157_v16 = vld [vmem:[#allocation100_spill] sm:$0xff]  ;;  %vm1315_vm4 = vcmp.eq.s32.totalorder %v4688_v61, %v6163_v36  ;;  %vm1316_vm2 = vcmp.eq.s32.totalorder %v4691_v3, %v6163_v36  ;;  %v6178_v38 = vld [vmem:[#allocation63_spill] sm:$0xff] }
 0x634   :  { %v388_v23 = vadd.f32 %v6145_v46, %v356_v22  ;;  %v6160_v46 = vld [vmem:[#allocation97_spill] sm:$0xff] }
 0x636   :  { %2665 = vset.pattern.permute.xlu1 %v6098_v31  ;;  %v2088_v21 = vpop.permute.xlu1 %2087  ;;  %v420_v33 = vadd.f32 %v6147_v6, %v388_v23  ;;  %v6161_v23 = vld [vmem:[#allocation36_spill] sm:$0xff]  ;;  %v6171_v6 = vld [vmem:[#allocation47_spill] sm:$0xff] }
 0x637   :  { %2107 = vperm.xlu2 %2664, %v6133_v27   ;;  %1904 = vperm.xlu1 %2665, %v6134_v13   ;;  %v2125_v44 = vsel %vm2053_vm9, %v2088_v21, 0.0  ;;  %v2126_v48 = vsel %vm2054_vm5, %v2088_v21, 0.0  ;;  %v2127_v4 = vsel %vm2055_vm15, %v2088_v21, 0.0  ;;  %v2128_v60 = vsel %vm2056_vm7, %v2088_v21, 0.0 }
 0x638   :  { %2456 = vrot.lane.b32.xlu0 %v2429_v39, %s2713_s12  ;;  %v2438_v42 = vsub.f32 0.0, %v420_v33 }
 0x639   :  { %2672 = vset.pattern.permute.xlu0 %v6098_v31 }
 0x63f   :  { %2666 = vset.pattern.permute.xlu2 %v6081_v50  ;;  %2112 = vperm.xlu1 %2665, %v6142_v55   ;;  %v6156_v55 = vld [vmem:[#allocation98_spill] sm:$0xff] }
 0x640   :  { %2045 = vperm.xlu2 %2666, %v2018_v43   ;;  %2462 = vrot.lane.b32.xlu0 %v2432_v62, %s2713_s12  ;;  %v1812_v62 = vadd.s32 %v5102_v59, %v6152_v8  ;;  %v6153_v43 = vld [vmem:[#allocation120_spill] sm:$0xff]  ;;  %v5260_v20 = vadd.f32 %v6157_v16, %v6156_v55  ;;  %v6158_v59 = vld [vmem:[#allocation90_spill] sm:$0xff]  ;;  %v6179_v55 = vld [vmem:[#allocation99_spill] sm:$0xff] }
 0x641   :  { %v5248_v45 = vadd.f32 %v4899_v28, %v6153_v43  ;;  %v6159_v28 = vld [vmem:[#allocation122_spill] sm:$0xff] }
 0x644   :  { %v1823_v19 = vpop.permute.xlu0 %1822 }
 0x645   :  { %vm1845_vm0 = vcmp.eq.s32.totalorder %v4682_v30, %v1823_v19  ;;  %vm1846_vm13 = vcmp.eq.s32.totalorder %v4685_v37, %v1823_v19  ;;  %vm1847_vm8 = vcmp.eq.s32.totalorder %v4688_v61, %v1823_v19  ;;  %vm1848_vm14 = vcmp.eq.s32.totalorder %v4691_v3, %v1823_v19 }
 0x646   :  { %v1917_v58 = vsel %vm1845_vm0, %v1880_v24, 0.0  ;;  %v1918_v51 = vsel %vm1846_vm13, %v1880_v24, 0.0  ;;  %v1919_v54 = vsel %vm1847_vm8, %v1880_v24, 0.0  ;;  %v1920_v39 = vsel %vm1848_vm14, %v1880_v24, 0.0 }
 0x647   :  { %2668 = vset.pattern.permute.xlu1 %v6081_v50  ;;  %v1949_v32 = vadd.f32 %v1917_v58, %v5112_v10  ;;  %v1950_v0 = vadd.f32 %v1918_v51, %v5119_v47  ;;  %v1951_v27 = vadd.f32 %v1919_v54, %v5123_v56  ;;  %v1952_v13 = vadd.f32 %v1920_v39, %v5128_v29  ;;  %v6146_v10 = vld [vmem:[#allocation127_spill] sm:$0xff]  ;;  %v6165_v54 = vld [vmem:[#allocation37_spill] sm:$0xff]  ;;  %v6166_v39 = vld [vmem:[#allocation42_spill] sm:$0xff] }
 0x648   :  { %2048 = vperm.xlu1 %2668, %v2019_v12   ;;  %1840 = vperm.xlu2 %2666, %v1811_v25   ;;  %v5230_v50 = vadd.f32 %v4888_v41, %v4713_v57  ;;  %v5234_v47 = vadd.f32 %v4890_v34, %v6146_v10  ;;  %v6150_v41 = vld [vmem:[#allocation73_spill] sm:$0xff]  ;;  %v6151_v34 = vld [vmem:[#allocation79_spill] sm:$0xff]  ;;  %vm1565_vm0 = vcmp.eq.s32.totalorder %v4682_v30, %v4908_v40 }
 0x649   :  { %2484 = vrot.lane.b32.xlu0 %v2435_v53, %s2714_s2  ;;  %v2157_v56 = vadd.f32 %v2125_v44, %v1949_v32  ;;  %v2158_v29 = vadd.f32 %v2126_v48, %v1950_v0  ;;  %v2159_v24 = vadd.f32 %v2127_v4, %v1951_v27  ;;  %v2160_v1 = vadd.f32 %v2128_v60, %v1952_v13  ;;  %v6162_v53 = vld [vmem:[#allocation48_spill] sm:$0xff]  ;;  %v6164_v12 = vld [vmem:[#allocation119_spill] sm:$0xff]  ;;  %v6167_v13 = vld [vmem:[#allocation49_spill] sm:$0xff] }
 0x64a   :  { %v359_v14 = vadd.f32 %v6151_v34, %v6150_v41  ;;  %v217_v25 = vadd.f32 %v6162_v53, %v6161_v23  ;;  %vm1333_vm3 = vcmp.eq.s32.totalorder %v4682_v30, %v6164_v12  ;;  %vm1334_vm10 = vcmp.eq.s32.totalorder %v4685_v37, %v6164_v12  ;;  %v6174_v34 = vld [vmem:[#allocation56_spill] sm:$0xff]  ;;  %v6182_v53 = vld [vmem:[#allocation58_spill] sm:$0xff] }
 0x64b   :  { %2269 = vmatmul.f32.vlgmr.msra.gmra.mxu0 %v2157_v56  ;;  %2310 = vmatmul.f32.vlgmr.msra.gmra.mxu1 %v2158_v29  ;;  %vm1335_vm1 = vcmp.eq.s32.totalorder %v4688_v61, %v6164_v12  ;;  %vm1336_vm11 = vcmp.eq.s32.totalorder %v4691_v3, %v6164_v12  ;;  %v216_v32 = vadd.f32 %v6166_v39, %v6165_v54  ;;  %v6168_v56 = vld [vmem:[#allocation116_spill] sm:$0xff]  ;;  %v6169_v29 = vld [vmem:[#allocation29_spill] sm:$0xff] }
 0x64c   :  { %2351 = vmatmul.f32.vlgmr.msra.gmra.mxu2 %v2159_v24  ;;  %2392 = vmatmul.f32.vlgmr.msra.gmra.mxu3 %v2160_v1  ;;  %v391_v22 = vadd.f32 %v6158_v59, %v359_v14  ;;  %v249_v60 = vadd.f32 %v6167_v13, %v217_v25  ;;  %v6170_v24 = vld [vmem:[#allocation43_spill] sm:$0xff]  ;;  %v6180_v59 = vld [vmem:[#allocation38_spill] sm:$0xff]  ;;  %v6183_v12 = vld [vmem:[#allocation52_spill] sm:$0xff]  ;;  %vm1566_vm13 = vcmp.eq.s32.totalorder %v4685_v37, %v4908_v40 }
 0x64d   :  { %v1349_v57 = vpop.permute.xlu0 %1348  ;;  %v218_v1 = vadd.f32 %v6170_v24, %v6169_v29  ;;  %v248_v33 = vadd.f32 %v6171_v6, %v216_v32  ;;  %v6185_v54 = vld [vmem:[#allocation32_spill] sm:$0xff]  ;;  %v6186_v39 = vld [vmem:[#allocation45_spill] sm:$0xff]  ;;  %vm1567_vm8 = vcmp.eq.s32.totalorder %v4688_v61, %v4908_v40  ;;  %vm1568_vm14 = vcmp.eq.s32.totalorder %v4691_v3, %v4908_v40 }
 0x64e   :  { %v423_v18 = vadd.f32 %v6160_v46, %v391_v22  ;;  %v1385_v51 = vsel %vm1313_vm12, %v1349_v57, 0.0  ;;  %v1386_v0 = vsel %vm1314_vm6, %v1349_v57, 0.0  ;;  %v1387_v27 = vsel %vm1315_vm4, %v1349_v57, 0.0  ;;  %v6181_v22 = vld [vmem:[#allocation51_spill] sm:$0xff] }
 0x64f   :  { %v1388_v10 = vsel %vm1316_vm2, %v1349_v57, 0.0  ;;  %v5304_v41 = vadd.f32 %v6173_v7, %v1385_v51  ;;  %v281_v14 = vadd.f32 %v6174_v34, %v249_v60  ;;  %v6176_v57 = vld [vmem:[#allocation102_spill] sm:$0xff]  ;;  %v280_v35 = vadd.f32 %v6178_v38, %v248_v33  ;;  %v6190_v34 = vld [vmem:[#allocation60_spill] sm:$0xff] }
 0x650   :  { %1843 = vperm.xlu1 %2668, %v1812_v62   ;;  %2669 = vset.pattern.permute.xlu2 %v6098_v31  ;;  %v2441_v58 = vsub.f32 0.0, %v423_v18  ;;  %v5311_v8 = vadd.f32 %v6176_v57, %v1387_v27  ;;  %v6177_v62 = vld [vmem:[#allocation57_spill] sm:$0xff]  ;;  %v5316_v16 = vadd.f32 %v6179_v55, %v1388_v10  ;;  %v221_v32 = vadd.f32 %v6186_v39, %v6185_v54  ;;  %v6188_v27 = vld [vmem:[#allocation54_spill] sm:$0xff]  ;;  %v6189_v10 = vld [vmem:[#allocation103_spill] sm:$0xff] }
 0x651   :  { %2490 = vrot.lane.b32.xlu0 %v2438_v42, %s2714_s2  ;;  %2117 = vperm.xlu2 %2669, %v6159_v28   ;;  %v250_v43 = vadd.f32 %v6177_v62, %v218_v1  ;;  %v220_v28 = vadd.f32 %v6181_v22, %v6180_v59  ;;  %v2427_v23 = vsub.f32 0.0, %v281_v14  ;;  %v2426_v36 = vsub.f32 0.0, %v280_v35  ;;  %v6191_v62 = vld [vmem:[#allocation55_spill] sm:$0xff]  ;;  %v6192_v35 = vld [vmem:[#allocation64_spill] sm:$0xff]  ;;  %v6194_v22 = vld [vmem:[#allocation66_spill] sm:$0xff] }
 0x652   :  { %vm1581_vm9 = vcmp.eq.s32.totalorder %v4682_v30, %v6189_v10  ;;  %vm1582_vm5 = vcmp.eq.s32.totalorder %v4685_v37, %v6189_v10  ;;  %vm1583_vm15 = vcmp.eq.s32.totalorder %v4688_v61, %v6189_v10  ;;  %vm1584_vm7 = vcmp.eq.s32.totalorder %v4691_v3, %v6189_v10  ;;  %v6193_v55 = vld [vmem:[#allocation75_spill] sm:$0xff]  ;;  %v6201_v39 = vld [vmem:[#allocation82_spill] sm:$0xff] }
 0x653   :  { %v282_v25 = vadd.f32 %v6182_v53, %v250_v43  ;;  %v253_v14 = vadd.f32 %v6190_v34, %v221_v32  ;;  %v352_v59 = vadd.f32 %v6193_v55, %v6192_v35  ;;  %v6196_v53 = vld [vmem:[#allocation107_spill] sm:$0xff]  ;;  %vm1585_vm12 = vcmp.eq.s32.totalorder %v4682_v30, %v4929_v17  ;;  %v6207_v55 = vld [vmem:[#allocation78_spill] sm:$0xff] }
 0x655   :  { %v1374_v21 = vpop.permute.xlu0 %1373  ;;  %v2428_v60 = vsub.f32 0.0, %v282_v25 }
 0x656   :  { %v5279_v19 = vsel %vm1333_vm3, %v1374_v21, 0.0  ;;  %v5281_v44 = vsel %vm1334_vm10, %v1374_v21, 0.0  ;;  %v5283_v48 = vsel %vm1335_vm1, %v1374_v21, 0.0  ;;  %v5285_v4 = vsel %vm1336_vm11, %v1374_v21, 0.0 }
 0x657   :  { %v252_v21 = vadd.f32 %v6183_v12, %v220_v28  ;;  %v6195_v28 = vld [vmem:[#allocation77_spill] sm:$0xff]  ;;  %v6198_v12 = vld [vmem:[#allocation128_spill] sm:$0xff]  ;;  %vm1586_vm3 = vcmp.eq.s32.totalorder %v4685_v37, %v4929_v17  ;;  %vm1587_vm10 = vcmp.eq.s32.totalorder %v4688_v61, %v4929_v17  ;;  %vm1588_vm1 = vcmp.eq.s32.totalorder %v4691_v3, %v4929_v17  ;;  %v6206_v17 = vld [vmem:[#allocation67_spill] sm:$0xff] }
 0x658   :  { %2671 = vset.pattern.permute.xlu1 %v6098_v31  ;;  %v6175_v31 = vld [vmem:[#allocation104_spill] sm:$0xff] }
 0x659   :  { %2496 = vrot.lane.b32.xlu0 %v2441_v58, %s2714_s2  ;;  %2122 = vperm.xlu1 %2671, %v6168_v56   ;;  %v5308_v42 = vadd.f32 %v6175_v31, %v1386_v0  ;;  %v6184_v58 = vld [vmem:[#allocation59_spill] sm:$0xff]  ;;  %v6187_v0 = vld [vmem:[#allocation40_spill] sm:$0xff] }
 0x65a   :  { %1914 = vperm.xlu2 %2669, %v6172_v15   ;;  %v284_v51 = vadd.f32 %v6184_v58, %v252_v21  ;;  %v223_v13 = vadd.f32 %v6188_v27, %v6187_v0  ;;  %v6199_v58 = vld [vmem:[#allocation129_spill] sm:$0xff]  ;;  %v6202_v0 = vld [vmem:[#allocation83_spill] sm:$0xff] }
 0x65b   :  { %v384_v27 = vadd.f32 %v6202_v0, %v352_v59  ;;  %v355_v59 = vadd.f32 %v6207_v55, %v6206_v17  ;;  %v6212_v55 = vld [vmem:[#allocation91_spill] sm:$0xff] }
 0x65c   :  { %v2430_v33 = vsub.f32 0.0, %v284_v51  ;;  %v255_v43 = vadd.f32 %v6191_v62, %v223_v13  ;;  %v6200_v51 = vld [vmem:[#allocation61_spill] sm:$0xff]  ;;  %v6203_v13 = vld [vmem:[#allocation130_spill] sm:$0xff]  ;;  %v6204_v62 = vld [vmem:[#allocation88_spill] sm:$0xff] }
 0x65d   :  { %v1602_v46 = vpop.permute.xlu0 %1601  ;;  %v285_v54 = vadd.f32 %v6200_v51, %v253_v14 }
 0x65e   :  { %v5320_v18 = vpop.permute.xlu2 %1825  ;;  %v1637_v15 = vsel %vm1565_vm0, %v1602_v46, 0.0  ;;  %v1638_v31 = vsel %vm1566_vm13, %v1602_v46, 0.0  ;;  %v1639_v57 = vsel %vm1567_vm8, %v1602_v46, 0.0  ;;  %v1640_v38 = vsel %vm1568_vm14, %v1602_v46, 0.0 }
 0x65f   :  { %v5366_v25 = vadd.f32 %v1637_v15, %v6196_v53  ;;  %v5370_v21 = vadd.f32 %v1638_v31, %v6198_v12  ;;  %v5373_v46 = vadd.f32 %v1639_v57, %v6199_v58  ;;  %v5379_v10 = vadd.f32 %v1640_v38, %v6203_v13  ;;  %v6205_v38 = vld [vmem:[#allocation93_spill] sm:$0xff] }
 0x660   :  { %v2431_v57 = vsub.f32 0.0, %v285_v54  ;;  %v6210_v53 = vld [vmem:[#allocation85_spill] sm:$0xff]  ;;  %vm1849_vm11 = vcmp.eq.s32.totalorder %v4682_v30, %v5320_v18  ;;  %vm1850_vm6 = vcmp.eq.s32.totalorder %v4685_v37, %v5320_v18  ;;  %vm1851_vm4 = vcmp.eq.s32.totalorder %v4688_v61, %v5320_v18 }
 0x661   :  { %2452 = vrot.lane.b32.xlu1 %v2427_v23, %s2713_s12  ;;  %v354_v23 = vadd.f32 %v6195_v28, %v6194_v22  ;;  %v6208_v22 = vld [vmem:[#allocation69_spill] sm:$0xff]  ;;  %v6209_v28 = vld [vmem:[#allocation80_spill] sm:$0xff]  ;;  %vm1852_vm2 = vcmp.eq.s32.totalorder %v4691_v3, %v5320_v18 }
 0x662   :  { %2450 = vrot.lane.b32.xlu2 %v2426_v36, %s2713_s12  ;;  %v6197_v36 = vld [vmem:[#allocation62_spill] sm:$0xff] }
 0x663   :  { %v287_v40 = vadd.f32 %v6197_v36, %v255_v43  ;;  %v386_v32 = vadd.f32 %v6201_v39, %v354_v23  ;;  %v416_v43 = vadd.f32 %v6204_v62, %v384_v27  ;;  %v357_v23 = vadd.f32 %v6209_v28, %v6208_v22  ;;  %v6213_v22 = vld [vmem:[#allocation96_spill] sm:$0xff] }
 0x665   :  { %v1622_v56 = vpop.permute.xlu0 %1621  ;;  %v2433_v14 = vsub.f32 0.0, %v287_v40  ;;  %v418_v35 = vadd.f32 %v6205_v38, %v386_v32  ;;  %v389_v36 = vadd.f32 %v6210_v53, %v357_v23  ;;  %v6211_v40 = vld [vmem:[#allocation86_spill] sm:$0xff]  ;;  %v2434_v58 = vsub.f32 0.0, %v416_v43 }
 0x666   :  { %v5341_v29 = vsel %vm1581_vm9, %v1622_v56, 0.0  ;;  %v5343_v24 = vsel %vm1582_vm5, %v1622_v56, 0.0  ;;  %v5345_v1 = vsel %vm1583_vm15, %v1622_v56, 0.0  ;;  %v5347_v6 = vsel %vm1584_vm7, %v1622_v56, 0.0  ;;  %v6214_v53 = vld [vmem:[#allocation70_spill] sm:$0xff] }
 0x667   :  { %v5353_v7 = vpop.permute.xlu2 %2092  ;;  %v387_v12 = vadd.f32 %v6211_v40, %v355_v59  ;;  %v2436_v51 = vsub.f32 0.0, %v418_v35  ;;  %v421_v28 = vadd.f32 %v6213_v22, %v389_v36  ;;  %v6215_v40 = vld [vmem:[#allocation81_spill] sm:$0xff] }
 0x669   :  { %2458 = vrot.lane.b32.xlu1 %v2430_v33, %s2713_s12  ;;  %v419_v59 = vadd.f32 %v6212_v55, %v387_v12 }
 0x66a   :  { %2454 = vrot.lane.b32.xlu2 %v2428_v60, %s2713_s12 }
 0x66d   :  { %v1627_v60 = vpop.permute.xlu0 %1626 }
 0x66e   :  { %v5389_v56 = vsel %vm1585_vm12, %v1627_v60, 0.0  ;;  %v5391_v33 = vsel %vm1586_vm3, %v1627_v60, 0.0  ;;  %v5393_v15 = vsel %vm1587_vm10, %v1627_v60, 0.0  ;;  %v5395_v34 = vsel %vm1588_vm1, %v1627_v60, 0.0 }
 0x66f   :  { %v5397_v31 = vpop.permute.xlu2 %1889 }
 0x671   :  { %2464 = vrot.lane.b32.xlu1 %v2433_v14, %s2713_s12 }
 0x672   :  { %2460 = vrot.lane.b32.xlu2 %v2431_v57, %s2713_s12 }
 0x675   :  { %v1885_v54 = vpop.permute.xlu0 %1884 }
 0x676   :  { %v2034_v39 = vpop.permute.xlu1 %2033  ;;  %v1921_v32 = vsel %vm1849_vm11, %v1885_v54, 0.0  ;;  %v1922_v0 = vsel %vm1850_vm6, %v1885_v54, 0.0  ;;  %v1923_v27 = vsel %vm1851_vm4, %v1885_v54, 0.0  ;;  %v1924_v13 = vsel %vm1852_vm2, %v1885_v54, 0.0 }
 0x677   :  { %v1953_v60 = vadd.f32 %v1921_v32, %v5304_v41  ;;  %vm2057_vm9 = vcmp.eq.s32.totalorder %v4682_v30, %v2034_v39  ;;  %v1954_v14 = vadd.f32 %v1922_v0, %v5308_v42  ;;  %vm2058_vm5 = vcmp.eq.s32.totalorder %v4685_v37, %v2034_v39 }
 0x678   :  { %v5421_v57 = vpop.permute.xlu2 %1831  ;;  %v2129_v62 = vsel %vm2057_vm9, %v5353_v7, 0.0  ;;  %v2130_v43 = vsel %vm2058_vm5, %v5353_v7, 0.0  ;;  %v1955_v18 = vadd.f32 %v1923_v27, %v5311_v8  ;;  %vm2059_vm15 = vcmp.eq.s32.totalorder %v4688_v61, %v2034_v39 }
 0x679   :  { %2486 = vrot.lane.b32.xlu1 %v2436_v51, %s2714_s2  ;;  %v2161_v38 = vadd.f32 %v2129_v62, %v1953_v60  ;;  %v2162_v41 = vadd.f32 %v2130_v43, %v1954_v14  ;;  %v2131_v35 = vsel %vm2059_vm15, %v5353_v7, 0.0  ;;  %v1956_v42 = vadd.f32 %v1924_v13, %v5316_v16 }
 0x67a   :  { %2482 = vrot.lane.b32.xlu2 %v2434_v58, %s2714_s2  ;;  %v2163_v17 = vadd.f32 %v2131_v35, %v1955_v18  ;;  %vm2060_vm7 = vcmp.eq.s32.totalorder %v4691_v3, %v2034_v39  ;;  %v358_v51 = vadd.f32 %v6215_v40, %v6214_v53  ;;  %v6216_v58 = vld [vmem:[#allocation89_spill] sm:$0xff]  ;;  %v2437_v39 = vsub.f32 0.0, %v419_v59 }
 0x67b   :  { %2272 = vmatmul.f32.gmra.mxu0 %v2161_v38  ;;  %2313 = vmatmul.f32.gmra.mxu1 %v2162_v41  ;;  %v2132_v8 = vsel %vm2060_vm7, %v5353_v7, 0.0  ;;  %v2439_v0 = vsub.f32 0.0, %v421_v28  ;;  %v6217_v7 = vld [vmem:[#allocation94_spill] sm:$0xff]  ;;  %vm1857_vm11 = vcmp.eq.s32.totalorder %v4682_v30, %v5421_v57  ;;  %vm1858_vm6 = vcmp.eq.s32.totalorder %v4685_v37, %v5421_v57 }
 0x67c   :  { %2354 = vmatmul.f32.gmra.mxu2 %v2163_v17  ;;  %v2164_v23 = vadd.f32 %v2132_v8, %v1956_v42  ;;  %v390_v32 = vadd.f32 %v6216_v58, %v358_v51  ;;  %vm1859_vm4 = vcmp.eq.s32.totalorder %v4688_v61, %v5421_v57  ;;  %vm1860_vm2 = vcmp.eq.s32.totalorder %v4691_v3, %v5421_v57 }
 0x67d   :  { %v5437_v54 = vpop.permute.xlu0 %2102 }
 0x67e   :  { %2395 = vmatmul.f32.gmra.mxu3 %v2164_v23  ;;  %v1829_v16 = vpop.permute.xlu1 %1828  ;;  %v422_v36 = vadd.f32 %v6217_v7, %v390_v32 }
 0x67f   :  { %vm1853_vm0 = vcmp.eq.s32.totalorder %v4682_v30, %v1829_v16  ;;  %vm1854_vm13 = vcmp.eq.s32.totalorder %v4685_v37, %v1829_v16  ;;  %vm1855_vm8 = vcmp.eq.s32.totalorder %v4688_v61, %v1829_v16  ;;  %vm1856_vm14 = vcmp.eq.s32.totalorder %v4691_v3, %v1829_v16 }
 0x680   :  { %v2040_v12 = vpop.permute.xlu2 %2039  ;;  %v1925_v27 = vsel %vm1853_vm0, %v5397_v31, 0.0  ;;  %v1926_v13 = vsel %vm1854_vm13, %v5397_v31, 0.0  ;;  %v1927_v60 = vsel %vm1855_vm8, %v5397_v31, 0.0  ;;  %v1928_v14 = vsel %vm1856_vm14, %v5397_v31, 0.0 }
 0x681   :  { %2492 = vrot.lane.b32.xlu1 %v2439_v0, %s2714_s2  ;;  %v2440_v62 = vsub.f32 0.0, %v422_v36  ;;  %v1957_v18 = vadd.f32 %v1925_v27, %v5366_v25  ;;  %v1958_v38 = vadd.f32 %v1926_v13, %v5370_v21  ;;  %v1959_v41 = vadd.f32 %v1927_v60, %v5373_v46 }
 0x682   :  { %2488 = vrot.lane.b32.xlu2 %v2437_v39, %s2714_s2  ;;  %v1960_v35 = vadd.f32 %v1928_v14, %v5379_v10  ;;  %vm2065_vm9 = vcmp.eq.s32.totalorder %v4682_v30, %v2040_v12  ;;  %vm2066_vm5 = vcmp.eq.s32.totalorder %v4685_v37, %v2040_v12  ;;  %vm2067_vm15 = vcmp.eq.s32.totalorder %v4688_v61, %v2040_v12 }
 0x683   :  { %vm2068_vm7 = vcmp.eq.s32.totalorder %v4691_v3, %v2040_v12  ;;  %v2137_v39 = vsel %vm2065_vm9, %v5437_v54, 0.0  ;;  %v2138_v0 = vsel %vm2066_vm5, %v5437_v54, 0.0  ;;  %v2139_v7 = vsel %vm2067_vm15, %v5437_v54, 0.0 }
 0x684   :  { %v2140_v12 = vsel %vm2068_vm7, %v5437_v54, 0.0 }
 0x686   :  { %v2037_v43 = vpop.permute.xlu0 %2036 }
 0x687   :  { %v2098_v42 = vpop.permute.xlu1 %2097  ;;  %vm2061_vm12 = vcmp.eq.s32.totalorder %v4682_v30, %v2037_v43  ;;  %vm2062_vm3 = vcmp.eq.s32.totalorder %v4685_v37, %v2037_v43  ;;  %vm2063_vm10 = vcmp.eq.s32.totalorder %v4688_v61, %v2037_v43  ;;  %vm2064_vm1 = vcmp.eq.s32.totalorder %v4691_v3, %v2037_v43 }
 0x688   :  { %v2133_v31 = vsel %vm2061_vm12, %v2098_v42, 0.0  ;;  %v2134_v17 = vsel %vm2062_vm3, %v2098_v42, 0.0  ;;  %v2135_v55 = vsel %vm2063_vm10, %v2098_v42, 0.0  ;;  %v2136_v59 = vsel %vm2064_vm1, %v2098_v42, 0.0 }
 0x689   :  { %v1900_v25 = vpop.permute.xlu2 %1899  ;;  %v2165_v22 = vadd.f32 %v2133_v31, %v1957_v18  ;;  %v2166_v21 = vadd.f32 %v2134_v17, %v1958_v38  ;;  %v2167_v28 = vadd.f32 %v2135_v55, %v1959_v41  ;;  %v2168_v46 = vadd.f32 %v2136_v59, %v1960_v35  ;;  %v6218_v59 = vld [vmem:[#allocation131_spill] sm:$0xff] }
 0x68a   :  { %2494 = vrot.lane.b32.xlu2 %v2440_v62, %s2714_s2  ;;  %v5488_v62 = vadd.f32 %v5341_v29, %v5279_v19  ;;  %v5493_v38 = vadd.f32 %v5343_v24, %v5281_v44  ;;  %v5497_v41 = vadd.f32 %v5345_v1, %v5283_v48  ;;  %v5504_v19 = vadd.f32 %v5347_v6, %v5285_v4 }
 0x68b   :  { %2275 = vmatmul.f32.gmra.mxu0 %v2165_v22  ;;  %2316 = vmatmul.f32.gmra.mxu1 %v2166_v21 }
 0x68c   :  { %2357 = vmatmul.f32.gmra.mxu2 %v2167_v28  ;;  %2398 = vmatmul.f32.gmra.mxu3 %v2168_v46 }
 0x68e   :  { %v1838_v43 = vpop.permute.xlu0 %1837 }
 0x68f   :  { %v1895_v10 = vpop.permute.xlu1 %1894 }
 0x690   :  { %v1929_v8 = vsel %vm1857_vm11, %v1895_v10, 0.0  ;;  %v1930_v23 = vsel %vm1858_vm6, %v1895_v10, 0.0  ;;  %v1931_v53 = vsel %vm1859_vm4, %v1895_v10, 0.0  ;;  %v1932_v40 = vsel %vm1860_vm2, %v1895_v10, 0.0  ;;  %v6219_v10 = vld [vmem:[#allocation132_spill] sm:$0xff] }
 0x691   :  { %v2108_v51 = vpop.permute.xlu2 %2107  ;;  %v1961_v16 = vadd.f32 %v1929_v8, %v5226_v63  ;;  %v1962_v58 = vadd.f32 %v1930_v23, %v5230_v50  ;;  %v1963_v57 = vadd.f32 %v1931_v53, %v5234_v47  ;;  %v1964_v32 = vadd.f32 %v1932_v40, %v5240_v5  ;;  %v6220_v23 = vld [vmem:[#allocation133_spill] sm:$0xff] }
 0x692   :  { %vm1865_vm11 = vcmp.eq.s32.totalorder %v4682_v30, %v1838_v43  ;;  %vm1866_vm6 = vcmp.eq.s32.totalorder %v4685_v37, %v1838_v43  ;;  %vm1867_vm4 = vcmp.eq.s32.totalorder %v4688_v61, %v1838_v43  ;;  %vm1868_vm2 = vcmp.eq.s32.totalorder %v4691_v3, %v1838_v43 }
 0x693   :  { %v2169_v36 = vadd.f32 %v2137_v39, %v1961_v16  ;;  %v2170_v27 = vadd.f32 %v2138_v0, %v1962_v58  ;;  %v2171_v13 = vadd.f32 %v2139_v7, %v1963_v57  ;;  %v2172_v60 = vadd.f32 %v2140_v12, %v1964_v32 }
 0x694   :  { %v5522_v8 = vadd.f32 %v5391_v33, %v6219_v10  ;;  %v5526_v53 = vadd.f32 %v5393_v15, %v6220_v23 }
 0x695   :  { %2278 = vmatmul.f32.gmra.mxu0 %v2169_v36  ;;  %2319 = vmatmul.f32.gmra.mxu1 %v2170_v27 }
 0x696   :  { %2360 = vmatmul.f32.gmra.mxu2 %v2171_v13  ;;  %2401 = vmatmul.f32.gmra.mxu3 %v2172_v60 }
 0x697   :  { %v1910_v4 = vpop.permute.xlu0 %1909 }
 0x698   :  { %v1835_v63 = vpop.permute.xlu1 %1834 }
 0x699   :  { %vm1861_vm0 = vcmp.eq.s32.totalorder %v4682_v30, %v1835_v63  ;;  %vm1862_vm13 = vcmp.eq.s32.totalorder %v4685_v37, %v1835_v63  ;;  %vm1863_vm8 = vcmp.eq.s32.totalorder %v4688_v61, %v1835_v63  ;;  %vm1864_vm14 = vcmp.eq.s32.totalorder %v4691_v3, %v1835_v63 }
 0x69a   :  { %v5481_v50 = vpop.permute.xlu2 %2045  ;;  %v1933_v47 = vsel %vm1861_vm0, %v1900_v25, 0.0  ;;  %v1934_v5 = vsel %vm1862_vm13, %v1900_v25, 0.0  ;;  %v1935_v54 = vsel %vm1863_vm8, %v1900_v25, 0.0  ;;  %v1936_v14 = vsel %vm1864_vm14, %v1900_v25, 0.0 }
 0x69b   :  { %v1965_v18 = vadd.f32 %v1933_v47, %v5040_v49  ;;  %v1966_v42 = vadd.f32 %v1934_v5, %v5044_v52  ;;  %v1967_v31 = vadd.f32 %v1935_v54, %v5048_v2  ;;  %v1968_v17 = vadd.f32 %v1936_v14, %v5060_v11 }
 0x69c   :  { %v5516_v25 = vadd.f32 %v5389_v56, %v6218_v59  ;;  %vm2073_vm9 = vcmp.eq.s32.totalorder %v4682_v30, %v5481_v50  ;;  %vm2074_vm5 = vcmp.eq.s32.totalorder %v4685_v37, %v5481_v50  ;;  %vm2075_vm15 = vcmp.eq.s32.totalorder %v4688_v61, %v5481_v50  ;;  %v6221_v56 = vld [vmem:[#allocation134_spill] sm:$0xff] }
 0x69d   :  { %vm2076_vm7 = vcmp.eq.s32.totalorder %v4691_v3, %v5481_v50  ;;  %v5536_v40 = vadd.f32 %v5395_v34, %v6221_v56 }
 0x6a0   :  { %v2043_v35 = vpop.permute.xlu1 %2042 }
 0x6a1   :  { %vm2069_vm12 = vcmp.eq.s32.totalorder %v4682_v30, %v2043_v35  ;;  %vm2070_vm3 = vcmp.eq.s32.totalorder %v4685_v37, %v2043_v35  ;;  %vm2071_vm10 = vcmp.eq.s32.totalorder %v4688_v61, %v2043_v35  ;;  %vm2072_vm1 = vcmp.eq.s32.totalorder %v4691_v3, %v2043_v35  ;;  %v5542_v57 = vpop.permute.xlu0 %2051 }
 0x6a2   :  { %v1841_v49 = vpop.permute.xlu2 %1840  ;;  %v2141_v44 = vsel %vm2069_vm12, %v2108_v51, 0.0  ;;  %v2142_v48 = vsel %vm2070_vm3, %v2108_v51, 0.0  ;;  %v2143_v52 = vsel %vm2071_vm10, %v2108_v51, 0.0  ;;  %v2144_v29 = vsel %vm2072_vm1, %v2108_v51, 0.0 }
 0x6a3   :  { %v2173_v2 = vadd.f32 %v2141_v44, %v1965_v18  ;;  %v2174_v24 = vadd.f32 %v2142_v48, %v1966_v42  ;;  %v2175_v11 = vadd.f32 %v2143_v52, %v1967_v31  ;;  %v2176_v1 = vadd.f32 %v2144_v29, %v1968_v17 }
 0x6a4   :  { %vm1869_vm0 = vcmp.eq.s32.totalorder %v4682_v30, %v1841_v49  ;;  %vm1870_vm13 = vcmp.eq.s32.totalorder %v4685_v37, %v1841_v49  ;;  %vm1871_vm8 = vcmp.eq.s32.totalorder %v4688_v61, %v1841_v49  ;;  %vm1872_vm14 = vcmp.eq.s32.totalorder %v4691_v3, %v1841_v49 }
 0x6a5   :  { %2281 = vmatmul.f32.gmra.mxu0 %v2173_v2  ;;  %2322 = vmatmul.f32.gmra.mxu1 %v2174_v24  ;;  %v6222_v2 = vld [vmem:[#allocation4_spill] sm:$0xff]  ;;  %v6223_v24 = vld [vmem:[#allocation15_spill] sm:$0xff] }
 0x6a6   :  { %2363 = vmatmul.f32.gmra.mxu2 %v2175_v11  ;;  %2404 = vmatmul.f32.gmra.mxu3 %v2176_v1  ;;  %v72_v11 = vadd.f32 %v6223_v24, %v6222_v2  ;;  %v6224_v1 = vld [vmem:[#allocation7_spill] sm:$0xff]  ;;  %v6240_v2 = vld [vmem:[#allocation9_spill] sm:$0xff] }
 0x6a7   :  { %v6241_v24 = vld [vmem:[#allocation21_spill] sm:$0xff] }
 0x6a9   :  { %v1905_v6 = vpop.permute.xlu1 %1904 }
 0x6aa   :  { %v1937_v22 = vsel %vm1865_vm11, %v1905_v6, 0.0  ;;  %v1938_v21 = vsel %vm1866_vm6, %v1905_v6, 0.0  ;;  %v1939_v28 = vsel %vm1867_vm4, %v1905_v6, 0.0  ;;  %v1940_v46 = vsel %vm1868_vm2, %v1905_v6, 0.0  ;;  %v5556_v54 = vpop.permute.xlu0 %2456 }
 0x6ab   :  { %v2118_v55 = vpop.permute.xlu2 %2117  ;;  %v1969_v33 = vadd.f32 %v1937_v22, %v5248_v45  ;;  %v1970_v16 = vadd.f32 %v1938_v21, %v5252_v9  ;;  %v1971_v15 = vadd.f32 %v1939_v28, %v5256_v26  ;;  %v1972_v58 = vadd.f32 %v1940_v46, %v5260_v20 }
 0x6ac   :  { %v1941_v45 = vsel %vm1869_vm0, %v1910_v4, 0.0  ;;  %v1942_v9 = vsel %vm1870_vm13, %v1910_v4, 0.0  ;;  %v1943_v26 = vsel %vm1871_vm8, %v1910_v4, 0.0  ;;  %v1944_v20 = vsel %vm1872_vm14, %v1910_v4, 0.0  ;;  %v6225_v4 = vld [vmem:[#allocation18_spill] sm:$0xff] }
 0x6ad   :  { %v1973_v63 = vadd.f32 %v1941_v45, %v5488_v62  ;;  %v1974_v50 = vadd.f32 %v1942_v9, %v5493_v38  ;;  %v1975_v47 = vadd.f32 %v1943_v26, %v5497_v41  ;;  %v1976_v5 = vadd.f32 %v1944_v20, %v5504_v19  ;;  %v6231_v45 = vld [vmem:[#allocation10_spill] sm:$0xff]  ;;  %v6233_v20 = vld [vmem:[#allocation17_spill] sm:$0xff] }
 0x6ae   :  { %v73_v6 = vadd.f32 %v6225_v4, %v6224_v1  ;;  %vm2417_vm0 = vcmask 261120   ;;  %vm2515_vm13 = vcmask 15360   ;;  %vm2506_vm8 = vcmask 7168   ;;  %v6232_v26 = vld [vmem:[#allocation6_spill] sm:$0xff] }
 0x6af   :  { %vm2524_vm14 = vcmask 23552  }
 0x6b1   :  { %v2113_v51 = vpop.permute.xlu1 %2112 }
 0x6b2   :  { %v2145_v32 = vsel %vm2073_vm9, %v2113_v51, 0.0  ;;  %v2146_v39 = vsel %vm2074_vm5, %v2113_v51, 0.0  ;;  %v2147_v0 = vsel %vm2075_vm15, %v2113_v51, 0.0  ;;  %v2148_v7 = vsel %vm2076_vm7, %v2113_v51, 0.0  ;;  %v5566_v49 = vpop.permute.xlu0 %2462 }
 0x6b3   :  { %v2177_v12 = vadd.f32 %v2145_v32, %v1969_v33  ;;  %v2178_v36 = vadd.f32 %v2146_v39, %v1970_v16  ;;  %v2179_v27 = vadd.f32 %v2147_v0, %v1971_v15  ;;  %v2180_v13 = vadd.f32 %v2148_v7, %v1972_v58  ;;  %v6228_v0 = vld [vmem:[#allocation19_spill] sm:$0xff] }
 0x6b4   :  { %v1915_v34 = vpop.permute.xlu2 %1914  ;;  %vm2081_vm9 = vcmp.eq.s32.totalorder %v4682_v30, %v5542_v57  ;;  %vm2082_vm5 = vcmp.eq.s32.totalorder %v4685_v37, %v5542_v57  ;;  %vm2083_vm15 = vcmp.eq.s32.totalorder %v4688_v61, %v5542_v57  ;;  %vm2084_vm7 = vcmp.eq.s32.totalorder %v4691_v3, %v5542_v57 }
 0x6b5   :  { %2284 = vmatmul.f32.gmra.mxu0 %v2177_v12  ;;  %2325 = vmatmul.f32.gmra.mxu1 %v2178_v36  ;;  %v6229_v12 = vld [vmem:[#allocation28_spill] sm:$0xff] }
 0x6b6   :  { %2366 = vmatmul.f32.gmra.mxu2 %v2179_v27  ;;  %2407 = vmatmul.f32.gmra.mxu3 %v2180_v13  ;;  %v6230_v13 = vld [vmem:[#allocation2_spill] sm:$0xff] }
 0x6b7   :  { %v76_v9 = vadd.f32 %v6231_v45, %v6230_v13  ;;  %v6253_v13 = vld [vmem:[#allocation35_spill] sm:$0xff] }
 0x6ba   :  { %v2049_v60 = vpop.permute.xlu1 %2048 }
 0x6bb   :  { %vm2077_vm12 = vcmp.eq.s32.totalorder %v4682_v30, %v2049_v60  ;;  %vm2078_vm3 = vcmp.eq.s32.totalorder %v4685_v37, %v2049_v60  ;;  %vm2079_vm10 = vcmp.eq.s32.totalorder %v4688_v61, %v2049_v60  ;;  %vm2080_vm1 = vcmp.eq.s32.totalorder %v4691_v3, %v2049_v60  ;;  %v2485_v32 = vpop.permute.xlu0 %2484 }
 0x6bc   :  { %v5558_v14 = vpop.permute.xlu2 %2450  ;;  %v2149_v43 = vsel %vm2077_vm12, %v2118_v55, 0.0  ;;  %v2150_v62 = vsel %vm2078_vm3, %v2118_v55, 0.0  ;;  %v2151_v18 = vsel %vm2079_vm10, %v2118_v55, 0.0  ;;  %v2152_v38 = vsel %vm2080_vm1, %v2118_v55, 0.0 }
 0x6bd   :  { %v2181_v35 = vadd.f32 %v2149_v43, %v1973_v63  ;;  %v2182_v41 = vadd.f32 %v2150_v62, %v1974_v50  ;;  %v2183_v42 = vadd.f32 %v2151_v18, %v1975_v47  ;;  %v2184_v31 = vadd.f32 %v2152_v38, %v1976_v5  ;;  %v6234_v62 = vld [vmem:[#allocation27_spill] sm:$0xff] }
 0x6be   :  { %v75_v60 = vadd.f32 %v6233_v20, %v6232_v26  ;;  %v108_v18 = vadd.f32 %v6234_v62, %v76_v9 }
 0x6bf   :  { %2287 = vmatmul.f32.gmra.mxu0 %v2181_v35  ;;  %2328 = vmatmul.f32.gmra.mxu1 %v2182_v41  ;;  %v6236_v35 = vld [vmem:[#allocation22_spill] sm:$0xff] }
 0x6c0   :  { %2369 = vmatmul.f32.gmra.mxu2 %v2183_v42  ;;  %2410 = vmatmul.f32.gmra.mxu3 %v2184_v31  ;;  %v148_v41 = vadd.f32 %v6236_v35, %v108_v18  ;;  %v6237_v42 = vld [vmem:[#allocation31_spill] sm:$0xff] }
 0x6c2   :  { %v1844_v17 = vpop.permute.xlu1 %1843 }
 0x6c3   :  { %vm1873_vm11 = vcmp.eq.s32.totalorder %v4682_v30, %v1844_v17  ;;  %vm1874_vm6 = vcmp.eq.s32.totalorder %v4685_v37, %v1844_v17  ;;  %vm1875_vm4 = vcmp.eq.s32.totalorder %v4688_v61, %v1844_v17  ;;  %vm1876_vm2 = vcmp.eq.s32.totalorder %v4691_v3, %v1844_v17  ;;  %v6226_v3 = vld [vmem:[#allocation24_spill] sm:$0xff]  ;;  %v2491_v17 = vpop.permute.xlu0 %2490 }
 0x6c4   :  { %v5560_v19 = vpop.permute.xlu2 %2454  ;;  %v1945_v44 = vsel %vm1873_vm11, %v1915_v34, 0.0  ;;  %v1946_v48 = vsel %vm1874_vm6, %v1915_v34, 0.0  ;;  %v1947_v52 = vsel %vm1875_vm4, %v1915_v34, 0.0  ;;  %v1948_v29 = vsel %vm1876_vm2, %v1915_v34, 0.0 }
 0x6c5   :  { %v1977_v21 = vadd.f32 %v1945_v44, %v5516_v25  ;;  %v1978_v28 = vadd.f32 %v1946_v48, %v5522_v8  ;;  %v1979_v46 = vadd.f32 %v1947_v52, %v5526_v53  ;;  %v1980_v10 = vadd.f32 %v1948_v29, %v5536_v40  ;;  %v6227_v8 = vld [vmem:[#allocation12_spill] sm:$0xff] }
 0x6c6   :  { %v105_v15 = vadd.f32 %v6226_v3, %v73_v6  ;;  %v104_v53 = vadd.f32 %v6227_v8, %v72_v11  ;;  %v6238_v48 = vld [vmem:[#allocation8_spill] sm:$0xff]  ;;  %v78_v11 = vadd.f32 %v6241_v24, %v6240_v2  ;;  %v6246_v3 = vld [vmem:[#allocation3_spill] sm:$0xff] }
 0x6c7   :  { %v6239_v52 = vld [vmem:[#allocation20_spill] sm:$0xff]  ;;  %v6248_v8 = vld [vmem:[#allocation23_spill] sm:$0xff] }
 0x6c8   :  { %v2270_v55 = vpop.f32.mrf.mxu0  ;;  %v2311_v59 = vpop.f32.mrf.mxu1  ;;  %v145_v7 = vadd.f32 %v6228_v0, %v105_v15  ;;  %v144_v36 = vadd.f32 %v6229_v12, %v104_v53  ;;  %v79_v29 = vadd.f32 %v6239_v52, %v6238_v48  ;;  %v6247_v15 = vld [vmem:[#allocation14_spill] sm:$0xff]  ;;  %v6251_v12 = vld [vmem:[#allocation11_spill] sm:$0xff] }
 0x6c9   :  { %v2312_v58 = vadd.f32 %v2311_v59, %v2270_v55 }
 0x6ca   :  { %v2507_v63 = vsel %vm2506_vm8, %v144_v36, %v5558_v14  ;;  %v6235_v14 = vld [vmem:[#allocation13_spill] sm:$0xff] }
 0x6cb   :  { %v2123_v22 = vpop.permute.xlu1 %2122  ;;  %v107_v38 = vadd.f32 %v6235_v14, %v75_v60 }
 0x6cc   :  { %v5584_v30 = vpop.permute.xlu2 %2460  ;;  %v2153_v23 = vsel %vm2081_vm9, %v2123_v22, 0.0  ;;  %v2154_v37 = vsel %vm2082_vm5, %v2123_v22, 0.0  ;;  %v2155_v56 = vsel %vm2083_vm15, %v2123_v22, 0.0  ;;  %v2156_v51 = vsel %vm2084_vm7, %v2123_v22, 0.0  ;;  %v6242_v22 = vld [vmem:[#allocation30_spill] sm:$0xff] }
 0x6cd   :  { %v2185_v61 = vadd.f32 %v2153_v23, %v1977_v21  ;;  %v2186_v33 = vadd.f32 %v2154_v37, %v1978_v28  ;;  %v2187_v16 = vadd.f32 %v2155_v56, %v1979_v46  ;;  %v2188_v57 = vadd.f32 %v2156_v51, %v1980_v10  ;;  %v6244_v46 = vld [vmem:[#allocation25_spill] sm:$0xff]  ;;  %v6245_v23 = vld [vmem:[#allocation34_spill] sm:$0xff] }
 0x6ce   :  { %v147_v31 = vadd.f32 %v6237_v42, %v107_v38  ;;  %v111_v21 = vadd.f32 %v6242_v22, %v79_v29 }
 0x6cf   :  { %2290 = vmatmul.f32.gmra.mxu0 %v2185_v61  ;;  %2331 = vmatmul.f32.gmra.mxu1 %v2186_v33  ;;  %v2352_v25 = vpop.f32.mrf.mxu2  ;;  %v2393_v39 = vpop.f32.mrf.mxu3 }
 0x6d0   :  { %2372 = vmatmul.f32.gmra.mxu2 %v2187_v16  ;;  %2413 = vmatmul.f32.gmra.mxu3 %v2188_v57  ;;  %v2353_v40 = vadd.f32 %v2352_v25, %v2312_v58  ;;  %v2510_v1 = vsel %vm2506_vm8, %v147_v31, %v5556_v54  ;;  %v6243_v54 = vld [vmem:[#allocation16_spill] sm:$0xff]  ;;  %v151_v10 = vadd.f32 %v6244_v46, %v111_v21  ;;  %v2497_v61 = vpop.permute.xlu0 %2496 }
 0x6d1   :  { %v110_v28 = vadd.f32 %v6243_v54, %v78_v11  ;;  %v74_v58 = vadd.f32 %v6247_v15, %v6246_v3 }
 0x6d2   :  { %v2394_v27 = vadd.f32 %v2393_v39, %v2353_v40 }
 0x6d3   :  { %v2453_v34 = vpop.permute.xlu1 %2452  ;;  %v150_v37 = vadd.f32 %v6245_v23, %v110_v28  ;;  %v106_v53 = vadd.f32 %v6248_v8, %v74_v58 }
 0x6d4   :  { %2418 = vst.msk [vmem:[%s5702_s3] sm:$0xff] %vm2417_vm0, %v2394_v27  ;;  %v2508_v50 = vsel %vm2506_vm8, %v145_v7, %v2453_v34  ;;  %v2483_v47 = vpop.permute.xlu2 %2482  ;;  %v6250_v7 = vld [vmem:[#allocation5_spill] sm:$0xff]  ;;  %v6252_v27 = vld [vmem:[#allocation26_spill] sm:$0xff] }
 0x6d5   :  { %v2517_v5 = vsel %vm2515_vm13, %v2508_v50, %v2485_v32  ;;  %v2516_v43 = vsel %vm2515_vm13, %v2507_v63, %v2483_v47  ;;  %v2513_v51 = vsel %vm2506_vm8, %v150_v37, %v5566_v49  ;;  %v6249_v49 = vld [vmem:[#allocation33_spill] sm:$0xff]  ;;  %v77_v36 = vadd.f32 %v6251_v12, %v6250_v7 }
 0x6d6   :  { %2526 = vst.msk [vmem:[%s5703_s4 + $0x8] sm:$0xff] %vm2524_vm14, %v2517_v5  ;;  %v146_v32 = vadd.f32 %v6249_v49, %v106_v53 }
 0x6d7   :  { %2525 = vst.msk [vmem:[%s5703_s4] sm:$0xff] %vm2524_vm14, %v2516_v43  ;;  %v109_v34 = vadd.f32 %v6252_v27, %v77_v36 }
 0x6d8   :  { %v2509_v40 = vsel %vm2506_vm8, %v146_v32, %v5560_v19 }
 0x6d9   :  { %v149_v45 = vadd.f32 %v6253_v13, %v109_v34 }
 0x6db   :  { %v2459_v44 = vpop.permute.xlu1 %2458  ;;  %v2512_v9 = vsel %vm2506_vm8, %v149_v45, %v5584_v30 }
 0x6dc   :  { %v2511_v4 = vsel %vm2506_vm8, %v148_v41, %v2459_v44  ;;  %v2489_v6 = vpop.permute.xlu2 %2488 }
 0x6dd   :  { %v2520_v55 = vsel %vm2515_vm13, %v2511_v4, %v2491_v17  ;;  %v2519_v59 = vsel %vm2515_vm13, %v2510_v1, %v2489_v6 }
 0x6de   :  { %2529 = vst.msk [vmem:[%s5703_s4 + $0x20] sm:$0xff] %vm2524_vm14, %v2520_v55 }
 0x6df   :  { %2528 = vst.msk [vmem:[%s5703_s4 + $0x18] sm:$0xff] %vm2524_vm14, %v2519_v59 }
 0x6e3   :  { %v2465_v56 = vpop.permute.xlu1 %2464 }
 0x6e4   :  { %v2514_v33 = vsel %vm2506_vm8, %v151_v10, %v2465_v56  ;;  %v2495_v16 = vpop.permute.xlu2 %2494 }
 0x6e5   :  { %v2523_v57 = vsel %vm2515_vm13, %v2514_v33, %v2497_v61  ;;  %v2522_v25 = vsel %vm2515_vm13, %v2513_v51, %v2495_v16 }
 0x6e6   :  { %2532 = vst.msk [vmem:[%s5703_s4 + $0x38] sm:$0xff] %vm2524_vm14, %v2523_v57 }
 0x6e7   :  { %2531 = vst.msk [vmem:[%s5703_s4 + $0x30] sm:$0xff] %vm2524_vm14, %v2522_v25 }
 0x6eb   :  { %v2487_v39 = vpop.permute.xlu1 %2486 }
 0x6ec   :  { %v2518_v0 = vsel %vm2515_vm13, %v2509_v40, %v2487_v39 }
 0x6ed   :  { %2527 = vst.msk [vmem:[%s5703_s4 + $0x10] sm:$0xff] %vm2524_vm14, %v2518_v0 }
 0x6f3   :  { %v2493_v26 = vpop.permute.xlu1 %2492 }
 0x6f4   :  { %v2521_v19 = vsel %vm2515_vm13, %v2512_v9, %v2493_v26 }
 0x6f5   :  { %2530 = vst.msk [vmem:[%s5703_s4 + $0x28] sm:$0xff] %vm2524_vm14, %v2521_v19 }
 0x6f8   :  { %v2273_v20 = vpop.f32.mrf.mxu0  ;;  %v2314_v60 = vpop.f32.mrf.mxu1 }
 0x6f9   :  { %v2315_v63 = vadd.f32 %v2314_v60, %v2273_v20 }
 0x6ff   :  { %v2355_v50 = vpop.f32.mrf.mxu2 }
 0x700   :  { %v2356_v47 = vadd.f32 %v2355_v50, %v2315_v63 }
 0x701   :  { %v2396_v5 = vpop.f32.mrf.mxu3 }
 0x702   :  { %v2397_v43 = vadd.f32 %v2396_v5, %v2356_v47 }
 0x704   :  { %2419 = vst.msk [vmem:[%s5702_s3 + $0x8] sm:$0xff] %vm2417_vm0, %v2397_v43 }
 0x708   :  { %v2276_v30 = vpop.f32.mrf.mxu0  ;;  %v2317_v62 = vpop.f32.mrf.mxu1 }
 0x709   :  { %v2318_v18 = vadd.f32 %v2317_v62, %v2276_v30 }
 0x70f   :  { %v2358_v14 = vpop.f32.mrf.mxu2  ;;  %v2399_v35 = vpop.f32.mrf.mxu3 }
 0x710   :  { %v2359_v38 = vadd.f32 %v2358_v14, %v2318_v18 }
 0x712   :  { %v2400_v41 = vadd.f32 %v2399_v35, %v2359_v38  ;;  %v2279_v42 = vpop.f32.mrf.mxu0  ;;  %v2320_v31 = vpop.f32.mrf.mxu1 }
 0x713   :  { %v2321_v17 = vadd.f32 %v2320_v31, %v2279_v42 }
 0x714   :  { %2420 = vst.msk [vmem:[%s5702_s3 + $0x10] sm:$0xff] %vm2417_vm0, %v2400_v41 }
 0x719   :  { %v2361_v44 = vpop.f32.mrf.mxu2  ;;  %v2402_v52 = vpop.f32.mrf.mxu3 }
 0x71a   :  { %v2362_v48 = vadd.f32 %v2361_v44, %v2321_v17 }
 0x71c   :  { %v2403_v29 = vadd.f32 %v2402_v52, %v2362_v48 }
 0x71e   :  { %2421 = vst.msk [vmem:[%s5702_s3 + $0x18] sm:$0xff] %vm2417_vm0, %v2403_v29 }
 0x722   :  { %v2282_v2 = vpop.f32.mrf.mxu0  ;;  %v2323_v24 = vpop.f32.mrf.mxu1 }
 0x723   :  { %v2324_v11 = vadd.f32 %v2323_v24, %v2282_v2 }
 0x729   :  { %v2364_v1 = vpop.f32.mrf.mxu2  ;;  %v2405_v6 = vpop.f32.mrf.mxu3 }
 0x72a   :  { %v2365_v4 = vadd.f32 %v2364_v1, %v2324_v11 }
 0x72c   :  { %v2406_v55 = vadd.f32 %v2405_v6, %v2365_v4 }
 0x72e   :  { %2422 = vst.msk [vmem:[%s5702_s3 + $0x20] sm:$0xff] %vm2417_vm0, %v2406_v55 }
 0x732   :  { %v2285_v59 = vpop.f32.mrf.mxu0  ;;  %v2326_v22 = vpop.f32.mrf.mxu1 }
 0x733   :  { %v2327_v21 = vadd.f32 %v2326_v22, %v2285_v59 }
 0x739   :  { %v2367_v54 = vpop.f32.mrf.mxu2  ;;  %v2408_v46 = vpop.f32.mrf.mxu3 }
 0x73a   :  { %v2368_v28 = vadd.f32 %v2367_v54, %v2327_v21 }
 0x73c   :  { %v2409_v10 = vadd.f32 %v2408_v46, %v2368_v28  ;;  %v2288_v23 = vpop.f32.mrf.mxu0  ;;  %v2329_v37 = vpop.f32.mrf.mxu1 }
 0x73d   :  { %v2330_v56 = vadd.f32 %v2329_v37, %v2288_v23 }
 0x73e   :  { %2423 = vst.msk [vmem:[%s5702_s3 + $0x28] sm:$0xff] %vm2417_vm0, %v2409_v10 }
 0x743   :  { %v2370_v51 = vpop.f32.mrf.mxu2  ;;  %v2411_v33 = vpop.f32.mrf.mxu3 }
 0x744   :  { %v2371_v61 = vadd.f32 %v2370_v51, %v2330_v56 }
 0x746   :  { %v2412_v16 = vadd.f32 %v2411_v33, %v2371_v61 }
 0x748   :  { %2424 = vst.msk [vmem:[%s5702_s3 + $0x30] sm:$0xff] %vm2417_vm0, %v2412_v16 }
 0x74c   :  { %v2291_v3 = vpop.f32.mrf.mxu0  ;;  %v2332_v15 = vpop.f32.mrf.mxu1 }
 0x74d   :  { %v2333_v58 = vadd.f32 %v2332_v15, %v2291_v3 }
 0x753   :  { %v2373_v57 = vpop.f32.mrf.mxu2  ;;  %v2414_v8 = vpop.f32.mrf.mxu3 }
 0x754   :  { %v2374_v25 = vadd.f32 %v2373_v57, %v2333_v58 }
 0x756   :  { %v2415_v53 = vadd.f32 %v2414_v8, %v2374_v25 }
 0x758   :  { %2425 = vst.msk [vmem:[%s5702_s3 + $0x38] sm:$0xff] %vm2417_vm0, %v2415_v53 }

</bundles_post_ra>
